<compile_context>
chip_gen: v7x
topology: tpu7x:2x2x1
jax: 0.10.0
libtpu: 0.0.40
codegen_flags: <defaults>
</compile_context>

<pallas_src>
import functools

import jax
import jax.numpy as jnp
from jax.experimental import pallas as pl
from jax.experimental.pallas import tpu as pltpu


# ---------------------------------------------------------------------------
# Tiled linear (+ optional ReLU): grid over M, resident weights, bf16 MXU.
# ---------------------------------------------------------------------------
def _linear_kernel(x_ref, w_ref, b_ref, o_ref, *, relu):
    x = x_ref[...].astype(jnp.bfloat16)
    w = w_ref[...].astype(jnp.bfloat16)
    acc = jnp.dot(x, w, preferred_element_type=jnp.float32) + b_ref[...]
    if relu:
        acc = jnp.maximum(acc, 0.0)
    o_ref[...] = acc.astype(o_ref.dtype)


def linear_pallas(x2d, w, b, relu=False, tm=128):
    M, cin = x2d.shape
    cout = w.shape[1]
    tm = min(tm, M)
    b2 = b.reshape(1, cout).astype(jnp.float32)
    return pl.pallas_call(
        functools.partial(_linear_kernel, relu=relu),
        out_shape=jax.ShapeDtypeStruct((M, cout), x2d.dtype),
        grid=(pl.cdiv(M, tm),),
        in_specs=[
            pl.BlockSpec((tm, cin), lambda i: (i, 0)),
            pl.BlockSpec((cin, cout), lambda i: (0, 0)),   # resident weights
            pl.BlockSpec((1, cout), lambda i: (0, 0)),
        ],
        out_specs=pl.BlockSpec((tm, cout), lambda i: (i, 0)),
        compiler_params=pltpu.CompilerParams(dimension_semantics=("parallel",)),
    )(x2d, w, b2)


# ---------------------------------------------------------------------------
# Fused NA2D layer kernel: q/k/v -> banded neighborhood attention -> proj.
# One grid step handles one (query-block, batch) pair for ALL heads.
# ---------------------------------------------------------------------------
def _na_layer_kernel(h_ref, wq_ref, bq_ref, wk_ref, bk_ref, wv_ref, bv_ref,
                     wproj_ref, bproj_ref, bias_ref, o_ref,
                     *, T, TQ, KB, window, n_head, scale):
    qb = pl.program_id(0)
    r = window // 2
    C = o_ref.shape[-1]
    P = o_ref.shape[-2]
    D = C // n_head
    NQ = TQ * P
    NK = KB * P

    q0 = pl.multiple_of(qb * TQ, TQ)
    band_start = jnp.clip(q0 - r, 0, T - KB)   # clamped key band start (rows of T)

    # Lane-dense (rows, C) activations for this block / band, bf16 for the MXU.
    h_q = h_ref[:, pl.ds(q0, TQ), :, :].reshape(NQ, C).astype(jnp.bfloat16)
    h_b = h_ref[:, pl.ds(band_start, KB), :, :].reshape(NK, C).astype(jnp.bfloat16)

    # Projections: q only for the query rows, k/v only for the key band.
    q = jnp.dot(h_q, wq_ref[...].astype(jnp.bfloat16),
                preferred_element_type=jnp.float32) + bq_ref[...]
    k = jnp.dot(h_b, wk_ref[...].astype(jnp.bfloat16),
                preferred_element_type=jnp.float32) + bk_ref[...]
    v = jnp.dot(h_b, wv_ref[...].astype(jnp.bfloat16),
                preferred_element_type=jnp.float32) + bv_ref[...]
    q = (q * scale).astype(jnp.bfloat16)       # (NQ, C)
    k = k.astype(jnp.bfloat16)                 # (NK, C)
    v = v.astype(jnp.bfloat16)                 # (NK, C)

    heads = []
    for h in range(n_head):                    # static unroll over heads
        cs = slice(h * D, (h + 1) * D)
        s = jax.lax.dot_general(q[:, cs], k[:, cs],
                                (((1,), (1,)), ((), ())),
                                preferred_element_type=jnp.float32)   # (NQ, NK)
        s = s + bias_ref[0, h].astype(jnp.float32)   # rpb + neighborhood mask
        m = jnp.max(s, axis=-1, keepdims=True)
        pr = jnp.exp(s - m)
        l = jnp.sum(pr, axis=-1, keepdims=True)
        o_h = jnp.dot(pr.astype(jnp.bfloat16), v[:, cs],
                      preferred_element_type=jnp.float32)             # (NQ, D)
        heads.append(o_h * pl.reciprocal(l, approx=True))
    attn = jnp.concatenate(heads, axis=-1)                            # (NQ, C)

    out = jnp.dot(attn.astype(jnp.bfloat16),
                  wproj_ref[...].astype(jnp.bfloat16),
                  preferred_element_type=jnp.float32) + bproj_ref[...]
    o_ref[...] = out.reshape(1, TQ, P, C).astype(o_ref.dtype)


# ---------------------------------------------------------------------------
# Banded relative-position-bias + neighborhood mask (built ONCE, bf16).
# bias[qb, h, (ti,pi), (kj,pj)] for keys inside the per-query-block band.
# ---------------------------------------------------------------------------
def build_banded_bias(rpb, T, P, window, tq):
    H = rpb.shape[0]
    r = window // 2
    kb = min(T, tq + window - 1)
    n_qb = T // tq

    qb = jnp.arange(n_qb)
    band_start = jnp.clip(qb * tq - r, 0, T - kb)                   # (QB,)
    ti = qb[:, None] * tq + jnp.arange(tq)[None, :]                 # (QB, TQ)
    tj = band_start[:, None] + jnp.arange(kb)[None, :]              # (QB, KB)
    t_start = jnp.clip(ti - r, 0, T - window)                       # clamped window start
    in_t = ((tj[:, None, :] >= t_start[:, :, None]) &
            (tj[:, None, :] < t_start[:, :, None] + window))        # (QB, TQ, KB)
    rel_t = jnp.clip(tj[:, None, :] - ti[:, :, None] + window - 1,
                     0, 2 * window - 2)                             # (QB, TQ, KB)

    pi = jnp.arange(P)
    p_start = jnp.clip(pi - r, 0, P - window)                       # (P,)
    in_p = ((pi[None, :] >= p_start[:, None]) &
            (pi[None, :] < p_start[:, None] + window))              # (P, P)
    rel_p = jnp.clip(pi[None, :] - pi[:, None] + window - 1,
                     0, 2 * window - 2)                             # (P, P)

    shape = (n_qb, tq, P, kb, P)
    rt = jnp.broadcast_to(rel_t[:, :, None, :, None], shape)
    rp = jnp.broadcast_to(rel_p[None, None, :, None, :], shape)
    bias = rpb[:, rt, rp]                                           # (H,QB,TQ,P,KB,P)
    mask = in_t[:, :, None, :, None] & in_p[None, None, :, None, :]
    bias = jnp.where(mask[None], bias, jnp.float32(-30000.0))       # bf16-safe sentinel
    bias = bias.transpose(1, 0, 2, 3, 4, 5).reshape(n_qb, H, tq * P, kb * P)
    return bias.astype(jnp.bfloat16)


def na2d_layer(h, p, bias, window, n_head, tq):
    """One fused NeighborhoodAttention2D layer. h: (B, T, P, C)."""
    B, T, P, C = h.shape
    assert C % n_head == 0, "n_unit must be divisible by n_head"
    assert T % tq == 0, "query tile must divide T"  # TODO(synk): ragged last tile
    kb = min(T, tq + window - 1)
    n_qb = T // tq

    kernel = functools.partial(
        _na_layer_kernel, T=T, TQ=tq, KB=kb, window=window, n_head=n_head,
        scale=float(C // n_head) ** -0.5)

    mat_spec = pl.BlockSpec((C, C), lambda qb, b: (0, 0))
    vec_spec = pl.BlockSpec((1, C), lambda qb, b: (0, 0))

    return pl.pallas_call(
        kernel,
        out_shape=jax.ShapeDtypeStruct((B, T, P, C), h.dtype),
        grid=(n_qb, B),   # bias block index constant across the inner (batch) axis
        in_specs=[
            pl.BlockSpec((1, T, P, C), lambda qb, b: (b, 0, 0, 0)),
            mat_spec, vec_spec,         # w_q, b_q
            mat_spec, vec_spec,         # w_k, b_k
            mat_spec, vec_spec,         # w_v, b_v
            mat_spec, vec_spec,         # w_proj, b_proj
            pl.BlockSpec((1, n_head, tq * P, kb * P), lambda qb, b: (qb, 0, 0, 0)),
        ],
        out_specs=pl.BlockSpec((1, tq, P, C), lambda qb, b: (b, qb, 0, 0)),
        compiler_params=pltpu.CompilerParams(
            dimension_semantics=("parallel", "parallel")),
    )(h,
      p["w_q"], p["b_q"], p["w_k"], p["b_k"], p["w_v"], p["b_v"],
      p["w_proj"], p["b_proj"], bias)


# ---------------------------------------------------------------------------
# NATTEN module
# ---------------------------------------------------------------------------
def init_params(key, hidden_per_pitch, window, n_unit, na_heads):
    """Params contain ARRAYS ONLY (static config like n_head is passed separately)."""
    in_dim = hidden_per_pitch + 5
    ks = jax.random.split(key, 7)

    def lin(kw, kb, fan_in, fan_out):
        lim = 1.0 / float(fan_in) ** 0.5
        w = jax.random.uniform(kw, (fan_in, fan_out), jnp.float32, -lim, lim)
        b = jax.random.uniform(kb, (fan_out,), jnp.float32, -lim, lim)
        return w, b

    w_lin, b_lin = lin(ks[0], ks[1], in_dim, n_unit)
    w_qkv, b_qkv = lin(ks[2], ks[3], n_unit, 3 * n_unit)   # one qkv Linear, split below
    w_proj, b_proj = lin(ks[4], ks[5], n_unit, n_unit)
    rpb = 0.02 * jax.random.normal(
        ks[6], (na_heads, 2 * window - 1, 2 * window - 1), jnp.float32)
    assert n_unit % na_heads == 0
    return {
        "w_lin": w_lin, "b_lin": b_lin,
        "na": {  # one shared layer (nn.Sequential(*[layer]*n_layers))
            "w_q": w_qkv[:, :n_unit],            "b_q": b_qkv[:n_unit],
            "w_k": w_qkv[:, n_unit:2 * n_unit],  "b_k": b_qkv[n_unit:2 * n_unit],
            "w_v": w_qkv[:, 2 * n_unit:],        "b_v": b_qkv[2 * n_unit:],
            "w_proj": w_proj, "b_proj": b_proj,
            "rpb": rpb,
        },
    }


def natten_forward(x, params, *, window, n_layers, n_head, tq=8):
    # x: (B, T, P, hidden_per_pitch + 5)
    B, T, P, cin = x.shape
    assert window % 2 == 1 and window <= T and window <= P
    h = linear_pallas(x.reshape(B * T * P, cin),
                      params["w_lin"], params["b_lin"], relu=True)
    n_unit = params["w_lin"].shape[1]
    h = h.reshape(B, T, P, n_unit)

    na = params["na"]
    # Bias depends only on (rpb, T, P, window, tq); layer weights are shared,
    # so build it once and reuse for every layer (hoisted out of the loop).
    bias = build_banded_bias(na["rpb"], T, P, window, tq)
    # Kernel-facing param dict: biases as (1, C) rows, rpb excluded.
    na_l = {k: (v.reshape(1, -1) if k.startswith("b_") else v)
            for k, v in na.items() if k != "rpb"}
    for _ in range(n_layers):        # same layer weights applied n_layers times
        h = na2d_layer(h, na_l, bias, window, n_head, tq)
    return h


if __name__ == "__main__":
    # Small shapes consistent with the module:
    #   hidden_per_pitch=11 -> input feature = 16, n_unit=24, NA heads=4,
    #   window=5 (scaled from 25 for the small 16x8 time-pitch grid), 2 layers.
    hidden_per_pitch = 11
    window, n_unit, na_heads, n_layers = 5, 24, 4, 2
    B, T, P = 2, 16, 8
    TQ = 8   # query-block rows; key band = TQ + window - 1 rows

    key = jax.random.PRNGKey(0)
    kx, kp = jax.random.split(key)
    x = jax.random.normal(kx, (B, T, P, hidden_per_pitch + 5), jnp.float32)
    params = init_params(kp, hidden_per_pitch, window, n_unit, na_heads)

    fwd = jax.jit(functools.partial(natten_forward, window=window,
                                    n_layers=n_layers, n_head=na_heads, tq=TQ))
    out = fwd(x, params)
    out = jax.block_until_ready(out)
    assert out.shape == (B, T, P, n_unit), out.shape
    assert bool(jnp.all(jnp.isfinite(out)))
    print("KERNEL_OK")
</pallas_src>

<mosaic_0001>
module attributes {stable_mosaic.version = 11 : i64} {
  func.func @_linear_kernel(%arg0: i32, %arg1: memref<128x16xf32, #tpu.memory_space<vmem>>, %arg2: memref<16x24xf32, #tpu.memory_space<vmem>>, %arg3: memref<1x24xf32, #tpu.memory_space<vmem>>, %arg4: memref<128x24xf32, #tpu.memory_space<vmem>>) attributes {dimension_semantics = [#tpu.dimension_semantics<parallel>], iteration_bounds = array<i64: 2>, scalar_prefetch = 0 : i64, scratch_operands = 0 : i64, tpu.core_type = #tpu.core_type<tc>, window_params = [{transform_indices = @transform_0, window_bounds = array<i64: 128, 16>}, {pipeline_mode = #tpu.pipeline_mode<synchronous>, transform_indices = @transform_1, window_bounds = array<i64: 16, 24>}, {pipeline_mode = #tpu.pipeline_mode<synchronous>, transform_indices = @transform_2, window_bounds = array<i64: 1, 24>}, {transform_indices = @transform_3, window_bounds = array<i64: 128, 24>}]} {
    %c0 = arith.constant 0 : index
    %c0_0 = arith.constant 0 : index
    %0 = vector.load %arg1[%c0, %c0_0] : memref<128x16xf32, #tpu.memory_space<vmem>>, vector<128x16xf32>
    %1 = arith.truncf %0 : vector<128x16xf32> to vector<128x16xbf16>
    %c0_1 = arith.constant 0 : index
    %c0_2 = arith.constant 0 : index
    %2 = vector.load %arg2[%c0_1, %c0_2] : memref<16x24xf32, #tpu.memory_space<vmem>>, vector<16x24xf32>
    %3 = arith.truncf %2 : vector<16x24xf32> to vector<16x24xbf16>
    %cst = arith.constant dense<0.000000e+00> : vector<128x24xf32>
    %4 = tpu.matmul %1, %3, %cst {dimension_numbers = #tpu.dot_dimension_numbers<[1], [0], [0], [1], [0, 0, 1, 1], [], []>} : vector<128x16xbf16>, vector<16x24xbf16>, vector<128x24xf32> -> vector<128x24xf32>
    %c0_3 = arith.constant 0 : index
    %c0_4 = arith.constant 0 : index
    %5 = vector.load %arg3[%c0_3, %c0_4] : memref<1x24xf32, #tpu.memory_space<vmem>>, vector<1x24xf32>
    %6 = vector.broadcast %5 : vector<1x24xf32> to vector<128x24xf32>
    %7 = arith.addf %4, %6 : vector<128x24xf32>
    %cst_5 = arith.constant 0.000000e+00 : f32
    %8 = vector.broadcast %cst_5 : f32 to vector<128x24xf32>
    %9 = arith.maximumf %7, %8 : vector<128x24xf32>
    %c0_6 = arith.constant 0 : index
    %c0_7 = arith.constant 0 : index
    %10 = vector.load %arg4[%c0_6, %c0_7] : memref<128x24xf32, #tpu.memory_space<vmem>>, vector<128x24xf32>
    tpu.vector_store %arg4[%c0_6, %c0_7], %9 {strides = array<i32>} : memref<128x24xf32, #tpu.memory_space<vmem>>, vector<128x24xf32>,
    return
  }
  func.func @transform_0(%arg0: i32) -> (i32, i32) {
    %c0_i32 = arith.constant 0 : i32
    %c0_i32_0 = arith.constant 0 : i32
    return %arg0, %c0_i32 : i32, i32
  }
  func.func @transform_1(%arg0: i32) -> (i32, i32) {
    %c0_i32 = arith.constant 0 : i32
    %c0_i32_0 = arith.constant 0 : i32
    %c0_i32_1 = arith.constant 0 : i32
    return %c0_i32, %c0_i32_0 : i32, i32
  }
  func.func @transform_2(%arg0: i32) -> (i32, i32) {
    %c0_i32 = arith.constant 0 : i32
    %c0_i32_0 = arith.constant 0 : i32
    %c0_i32_1 = arith.constant 0 : i32
    return %c0_i32, %c0_i32_0 : i32, i32
  }
  func.func @transform_3(%arg0: i32) -> (i32, i32) {
    %c0_i32 = arith.constant 0 : i32
    %c0_i32_0 = arith.constant 0 : i32
    return %arg0, %c0_i32 : i32, i32
  }
}

module attributes {stable_mosaic.version = 11 : i64} {
  func.func @_na_layer_kernel(%arg0: i32, %arg1: i32, %arg2: memref<1x16x8x24xf32, #tpu.memory_space<vmem>>, %arg3: memref<24x24xf32, #tpu.memory_space<vmem>>, %arg4: memref<1x24xf32, #tpu.memory_space<vmem>>, %arg5: memref<24x24xf32, #tpu.memory_space<vmem>>, %arg6: memref<1x24xf32, #tpu.memory_space<vmem>>, %arg7: memref<24x24xf32, #tpu.memory_space<vmem>>, %arg8: memref<1x24xf32, #tpu.memory_space<vmem>>, %arg9: memref<24x24xf32, #tpu.memory_space<vmem>>, %arg10: memref<1x24xf32, #tpu.memory_space<vmem>>, %arg11: memref<1x4x64x96xbf16, #tpu.memory_space<vmem>>, %arg12: memref<1x8x8x24xf32, #tpu.memory_space<vmem>>) attributes {dimension_semantics = [#tpu.dimension_semantics<parallel>, #tpu.dimension_semantics<parallel>], iteration_bounds = array<i64: 2, 2>, scalar_prefetch = 0 : i64, scratch_operands = 0 : i64, tpu.core_type = #tpu.core_type<tc>, window_params = [{transform_indices = @transform_0, window_bounds = array<i64: 1, 16, 8, 24>}, {pipeline_mode = #tpu.pipeline_mode<synchronous>, transform_indices = @transform_1, window_bounds = array<i64: 24, 24>}, {pipeline_mode = #tpu.pipeline_mode<synchronous>, transform_indices = @transform_2, window_bounds = array<i64: 1, 24>}, {pipeline_mode = #tpu.pipeline_mode<synchronous>, transform_indices = @transform_3, window_bounds = array<i64: 24, 24>}, {pipeline_mode = #tpu.pipeline_mode<synchronous>, transform_indices = @transform_4, window_bounds = array<i64: 1, 24>}, {pipeline_mode = #tpu.pipeline_mode<synchronous>, transform_indices = @transform_5, window_bounds = array<i64: 24, 24>}, {pipeline_mode = #tpu.pipeline_mode<synchronous>, transform_indices = @transform_6, window_bounds = array<i64: 1, 24>}, {pipeline_mode = #tpu.pipeline_mode<synchronous>, transform_indices = @transform_7, window_bounds = array<i64: 24, 24>}, {pipeline_mode = #tpu.pipeline_mode<synchronous>, transform_indices = @transform_8, window_bounds = array<i64: 1, 24>}, {transform_indices = @transform_9, window_bounds = array<i64: 1, 4, 64, 96>}, {transform_indices = @transform_10, window_bounds = array<i64: 1, 8, 8, 24>}]} {
    %c8_i32 = arith.constant 8 : i32
    %0 = arith.muli %arg0, %c8_i32 : i32
    %1 = tpu.assume_multiple %0, 8 : i32
    %c2_i32 = arith.constant 2 : i32
    %2 = arith.subi %1, %c2_i32 : i32
    %c0_i32 = arith.constant 0 : i32
    %c4_i32 = arith.constant 4 : i32
    %3 = arith.maxsi %c0_i32, %2 : i32
    %4 = arith.minsi %c4_i32, %3 : i32
    %c0 = arith.constant 0 : index
    %5 = arith.index_cast %1 : i32 to index
    %c0_0 = arith.constant 0 : index
    %c0_1 = arith.constant 0 : index
    %6 = vector.load %arg2[%c0, %5, %c0_0, %c0_1] : memref<1x16x8x24xf32, #tpu.memory_space<vmem>>, vector<1x8x8x24xf32>
    %7 = vector.shape_cast %6 : vector<1x8x8x24xf32> to vector<64x24xf32>
    %8 = arith.truncf %7 : vector<64x24xf32> to vector<64x24xbf16>
    %c0_2 = arith.constant 0 : index
    %9 = arith.index_cast %4 : i32 to index
    %c0_3 = arith.constant 0 : index
    %c0_4 = arith.constant 0 : index
    %10 = vector.load %arg2[%c0_2, %9, %c0_3, %c0_4] : memref<1x16x8x24xf32, #tpu.memory_space<vmem>>, vector<1x12x8x24xf32>
    %11 = vector.shape_cast %10 : vector<1x12x8x24xf32> to vector<96x24xf32>
    %12 = arith.truncf %11 : vector<96x24xf32> to vector<96x24xbf16>
    %c0_5 = arith.constant 0 : index
    %c0_6 = arith.constant 0 : index
    %13 = vector.load %arg3[%c0_5, %c0_6] : memref<24x24xf32, #tpu.memory_space<vmem>>, vector<24x24xf32>
    %14 = arith.truncf %13 : vector<24x24xf32> to vector<24x24xbf16>
    %cst = arith.constant dense<0.000000e+00> : vector<64x24xf32>
    %15 = tpu.matmul %8, %14, %cst {dimension_numbers = #tpu.dot_dimension_numbers<[1], [0], [0], [1], [0, 0, 1, 1], [], []>} : vector<64x24xbf16>, vector<24x24xbf16>, vector<64x24xf32> -> vector<64x24xf32>
    %c0_7 = arith.constant 0 : index
    %c0_8 = arith.constant 0 : index
    %16 = vector.load %arg4[%c0_7, %c0_8] : memref<1x24xf32, #tpu.memory_space<vmem>>, vector<1x24xf32>
    %17 = vector.broadcast %16 : vector<1x24xf32> to vector<64x24xf32>
    %18 = arith.addf %15, %17 : vector<64x24xf32>
    %c0_9 = arith.constant 0 : index
    %c0_10 = arith.constant 0 : index
    %19 = vector.load %arg5[%c0_9, %c0_10] : memref<24x24xf32, #tpu.memory_space<vmem>>, vector<24x24xf32>
    %20 = arith.truncf %19 : vector<24x24xf32> to vector<24x24xbf16>
    %cst_11 = arith.constant dense<0.000000e+00> : vector<96x24xf32>
    %21 = tpu.matmul %12, %20, %cst_11 {dimension_numbers = #tpu.dot_dimension_numbers<[1], [0], [0], [1], [0, 0, 1, 1], [], []>} : vector<96x24xbf16>, vector<24x24xbf16>, vector<96x24xf32> -> vector<96x24xf32>
    %c0_12 = arith.constant 0 : index
    %c0_13 = arith.constant 0 : index
    %22 = vector.load %arg6[%c0_12, %c0_13] : memref<1x24xf32, #tpu.memory_space<vmem>>, vector<1x24xf32>
    %23 = vector.broadcast %22 : vector<1x24xf32> to vector<96x24xf32>
    %24 = arith.addf %21, %23 : vector<96x24xf32>
    %c0_14 = arith.constant 0 : index
    %c0_15 = arith.constant 0 : index
    %25 = vector.load %arg7[%c0_14, %c0_15] : memref<24x24xf32, #tpu.memory_space<vmem>>, vector<24x24xf32>
    %26 = arith.truncf %25 : vector<24x24xf32> to vector<24x24xbf16>
    %cst_16 = arith.constant dense<0.000000e+00> : vector<96x24xf32>
    %27 = tpu.matmul %12, %26, %cst_16 {dimension_numbers = #tpu.dot_dimension_numbers<[1], [0], [0], [1], [0, 0, 1, 1], [], []>} : vector<96x24xbf16>, vector<24x24xbf16>, vector<96x24xf32> -> vector<96x24xf32>
    %c0_17 = arith.constant 0 : index
    %c0_18 = arith.constant 0 : index
    %28 = vector.load %arg8[%c0_17, %c0_18] : memref<1x24xf32, #tpu.memory_space<vmem>>, vector<1x24xf32>
    %29 = vector.broadcast %28 : vector<1x24xf32> to vector<96x24xf32>
    %30 = arith.addf %27, %29 : vector<96x24xf32>
    %cst_19 = arith.constant 0.408248305 : f32
    %31 = vector.broadcast %cst_19 : f32 to vector<64x24xf32>
    %32 = arith.mulf %18, %31 : vector<64x24xf32>
    %33 = arith.truncf %32 : vector<64x24xf32> to vector<64x24xbf16>
    %34 = arith.truncf %24 : vector<96x24xf32> to vector<96x24xbf16>
    %35 = arith.truncf %30 : vector<96x24xf32> to vector<96x24xbf16>
    %36 = vector.extract_strided_slice %33 {offsets = [0, 0], sizes = [64, 6], strides = [1, 1]} : vector<64x24xbf16> to vector<64x6xbf16>
    %37 = vector.extract_strided_slice %34 {offsets = [0, 0], sizes = [96, 6], strides = [1, 1]} : vector<96x24xbf16> to vector<96x6xbf16>
    %cst_20 = arith.constant dense<0.000000e+00> : vector<64x96xf32>
    %38 = tpu.matmul %36, %37, %cst_20 {dimension_numbers = #tpu.dot_dimension_numbers<[1], [1], [0], [0], [0, 0, 1, 0], [], []>} : vector<64x6xbf16>, vector<96x6xbf16>, vector<64x96xf32> -> vector<64x96xf32>
    %c0_21 = arith.constant 0 : index
    %c0_22 = arith.constant 0 : index
    %c0_23 = arith.constant 0 : index
    %c0_24 = arith.constant 0 : index
    %39 = vector.load %arg11[%c0_21, %c0_22, %c0_23, %c0_24] : memref<1x4x64x96xbf16, #tpu.memory_space<vmem>>, vector<1x1x64x96xbf16>
    %40 = vector.shape_cast %39 : vector<1x1x64x96xbf16> to vector<64x96xbf16>
    %41 = arith.extf %40 : vector<64x96xbf16> to vector<64x96xf32>
    %42 = arith.addf %38, %41 : vector<64x96xf32>
    %cst_25 = arith.constant dense<0xFF800000> : vector<64xf32>
    %43 = vector.multi_reduction <maximumf>, %42, %cst_25 [1] : vector<64x96xf32> to vector<64xf32>
    %44 = vector.shape_cast %43 : vector<64xf32> to vector<64x1xf32>
    %45 = vector.broadcast %44 : vector<64x1xf32> to vector<64x96xf32>
    %46 = arith.subf %42, %45 : vector<64x96xf32>
    %47 = math.exp %46 : vector<64x96xf32>
    %cst_26 = arith.constant dense<0.000000e+00> : vector<64xf32>
    %48 = vector.multi_reduction <add>, %47, %cst_26 [1] : vector<64x96xf32> to vector<64xf32>
    %49 = vector.shape_cast %48 : vector<64xf32> to vector<64x1xf32>
    %50 = arith.truncf %47 : vector<64x96xf32> to vector<64x96xbf16>
    %51 = vector.extract_strided_slice %35 {offsets = [0, 0], sizes = [96, 6], strides = [1, 1]} : vector<96x24xbf16> to vector<96x6xbf16>
    %cst_27 = arith.constant dense<0.000000e+00> : vector<64x6xf32>
    %52 = tpu.matmul %50, %51, %cst_27 {dimension_numbers = #tpu.dot_dimension_numbers<[1], [0], [0], [1], [0, 0, 1, 1], [], []>} : vector<64x96xbf16>, vector<96x6xbf16>, vector<64x6xf32> -> vector<64x6xf32>
    %53 = tpu.reciprocal %49 {approx = true} : vector<64x1xf32> -> vector<64x1xf32>
    %54 = vector.broadcast %53 : vector<64x1xf32> to vector<64x6xf32>
    %55 = arith.mulf %52, %54 : vector<64x6xf32>
    %56 = vector.extract_strided_slice %33 {offsets = [0, 6], sizes = [64, 6], strides = [1, 1]} : vector<64x24xbf16> to vector<64x6xbf16>
    %57 = vector.extract_strided_slice %34 {offsets = [0, 6], sizes = [96, 6], strides = [1, 1]} : vector<96x24xbf16> to vector<96x6xbf16>
    %cst_28 = arith.constant dense<0.000000e+00> : vector<64x96xf32>
    %58 = tpu.matmul %56, %57, %cst_28 {dimension_numbers = #tpu.dot_dimension_numbers<[1], [1], [0], [0], [0, 0, 1, 0], [], []>} : vector<64x6xbf16>, vector<96x6xbf16>, vector<64x96xf32> -> vector<64x96xf32>
    %c0_29 = arith.constant 0 : index
    %c1 = arith.constant 1 : index
    %c0_30 = arith.constant 0 : index
    %c0_31 = arith.constant 0 : index
    %59 = vector.load %arg11[%c0_29, %c1, %c0_30, %c0_31] : memref<1x4x64x96xbf16, #tpu.memory_space<vmem>>, vector<1x1x64x96xbf16>
    %60 = vector.shape_cast %59 : vector<1x1x64x96xbf16> to vector<64x96xbf16>
    %61 = arith.extf %60 : vector<64x96xbf16> to vector<64x96xf32>
    %62 = arith.addf %58, %61 : vector<64x96xf32>
    %cst_32 = arith.constant dense<0xFF800000> : vector<64xf32>
    %63 = vector.multi_reduction <maximumf>, %62, %cst_32 [1] : vector<64x96xf32> to vector<64xf32>
    %64 = vector.shape_cast %63 : vector<64xf32> to vector<64x1xf32>
    %65 = vector.broadcast %64 : vector<64x1xf32> to vector<64x96xf32>
    %66 = arith.subf %62, %65 : vector<64x96xf32>
    %67 = math.exp %66 : vector<64x96xf32>
    %cst_33 = arith.constant dense<0.000000e+00> : vector<64xf32>
    %68 = vector.multi_reduction <add>, %67, %cst_33 [1] : vector<64x96xf32> to vector<64xf32>
    %69 = vector.shape_cast %68 : vector<64xf32> to vector<64x1xf32>
    %70 = arith.truncf %67 : vector<64x96xf32> to vector<64x96xbf16>
    %71 = vector.extract_strided_slice %35 {offsets = [0, 6], sizes = [96, 6], strides = [1, 1]} : vector<96x24xbf16> to vector<96x6xbf16>
    %cst_34 = arith.constant dense<0.000000e+00> : vector<64x6xf32>
    %72 = tpu.matmul %70, %71, %cst_34 {dimension_numbers = #tpu.dot_dimension_numbers<[1], [0], [0], [1], [0, 0, 1, 1], [], []>} : vector<64x96xbf16>, vector<96x6xbf16>, vector<64x6xf32> -> vector<64x6xf32>
    %73 = tpu.reciprocal %69 {approx = true} : vector<64x1xf32> -> vector<64x1xf32>
    %74 = vector.broadcast %73 : vector<64x1xf32> to vector<64x6xf32>
    %75 = arith.mulf %72, %74 : vector<64x6xf32>
    %76 = vector.extract_strided_slice %33 {offsets = [0, 12], sizes = [64, 6], strides = [1, 1]} : vector<64x24xbf16> to vector<64x6xbf16>
    %77 = vector.extract_strided_slice %34 {offsets = [0, 12], sizes = [96, 6], strides = [1, 1]} : vector<96x24xbf16> to vector<96x6xbf16>
    %cst_35 = arith.constant dense<0.000000e+00> : vector<64x96xf32>
    %78 = tpu.matmul %76, %77, %cst_35 {dimension_numbers = #tpu.dot_dimension_numbers<[1], [1], [0], [0], [0, 0, 1, 0], [], []>} : vector<64x6xbf16>, vector<96x6xbf16>, vector<64x96xf32> -> vector<64x96xf32>
    %c0_36 = arith.constant 0 : index
    %c2 = arith.constant 2 : index
    %c0_37 = arith.constant 0 : index
    %c0_38 = arith.constant 0 : index
    %79 = vector.load %arg11[%c0_36, %c2, %c0_37, %c0_38] : memref<1x4x64x96xbf16, #tpu.memory_space<vmem>>, vector<1x1x64x96xbf16>
    %80 = vector.shape_cast %79 : vector<1x1x64x96xbf16> to vector<64x96xbf16>
    %81 = arith.extf %80 : vector<64x96xbf16> to vector<64x96xf32>
    %82 = arith.addf %78, %81 : vector<64x96xf32>
    %cst_39 = arith.constant dense<0xFF800000> : vector<64xf32>
    %83 = vector.multi_reduction <maximumf>, %82, %cst_39 [1] : vector<64x96xf32> to vector<64xf32>
    %84 = vector.shape_cast %83 : vector<64xf32> to vector<64x1xf32>
    %85 = vector.broadcast %84 : vector<64x1xf32> to vector<64x96xf32>
    %86 = arith.subf %82, %85 : vector<64x96xf32>
    %87 = math.exp %86 : vector<64x96xf32>
    %cst_40 = arith.constant dense<0.000000e+00> : vector<64xf32>
    %88 = vector.multi_reduction <add>, %87, %cst_40 [1] : vector<64x96xf32> to vector<64xf32>
    %89 = vector.shape_cast %88 : vector<64xf32> to vector<64x1xf32>
    %90 = arith.truncf %87 : vector<64x96xf32> to vector<64x96xbf16>
    %91 = vector.extract_strided_slice %35 {offsets = [0, 12], sizes = [96, 6], strides = [1, 1]} : vector<96x24xbf16> to vector<96x6xbf16>
    %cst_41 = arith.constant dense<0.000000e+00> : vector<64x6xf32>
    %92 = tpu.matmul %90, %91, %cst_41 {dimension_numbers = #tpu.dot_dimension_numbers<[1], [0], [0], [1], [0, 0, 1, 1], [], []>} : vector<64x96xbf16>, vector<96x6xbf16>, vector<64x6xf32> -> vector<64x6xf32>
    %93 = tpu.reciprocal %89 {approx = true} : vector<64x1xf32> -> vector<64x1xf32>
    %94 = vector.broadcast %93 : vector<64x1xf32> to vector<64x6xf32>
    %95 = arith.mulf %92, %94 : vector<64x6xf32>
    %96 = vector.extract_strided_slice %33 {offsets = [0, 18], sizes = [64, 6], strides = [1, 1]} : vector<64x24xbf16> to vector<64x6xbf16>
    %97 = vector.extract_strided_slice %34 {offsets = [0, 18], sizes = [96, 6], strides = [1, 1]} : vector<96x24xbf16> to vector<96x6xbf16>
    %cst_42 = arith.constant dense<0.000000e+00> : vector<64x96xf32>
    %98 = tpu.matmul %96, %97, %cst_42 {dimension_numbers = #tpu.dot_dimension_numbers<[1], [1], [0], [0], [0, 0, 1, 0], [], []>} : vector<64x6xbf16>, vector<96x6xbf16>, vector<64x96xf32> -> vector<64x96xf32>
    %c0_43 = arith.constant 0 : index
    %c3 = arith.constant 3 : index
    %c0_44 = arith.constant 0 : index
    %c0_45 = arith.constant 0 : index
    %99 = vector.load %arg11[%c0_43, %c3, %c0_44, %c0_45] : memref<1x4x64x96xbf16, #tpu.memory_space<vmem>>, vector<1x1x64x96xbf16>
    %100 = vector.shape_cast %99 : vector<1x1x64x96xbf16> to vector<64x96xbf16>
    %101 = arith.extf %100 : vector<64x96xbf16> to vector<64x96xf32>
    %102 = arith.addf %98, %101 : vector<64x96xf32>
    %cst_46 = arith.constant dense<0xFF800000> : vector<64xf32>
    %103 = vector.multi_reduction <maximumf>, %102, %cst_46 [1] : vector<64x96xf32> to vector<64xf32>
    %104 = vector.shape_cast %103 : vector<64xf32> to vector<64x1xf32>
    %105 = vector.broadcast %104 : vector<64x1xf32> to vector<64x96xf32>
    %106 = arith.subf %102, %105 : vector<64x96xf32>
    %107 = math.exp %106 : vector<64x96xf32>
    %cst_47 = arith.constant dense<0.000000e+00> : vector<64xf32>
    %108 = vector.multi_reduction <add>, %107, %cst_47 [1] : vector<64x96xf32> to vector<64xf32>
    %109 = vector.shape_cast %108 : vector<64xf32> to vector<64x1xf32>
    %110 = arith.truncf %107 : vector<64x96xf32> to vector<64x96xbf16>
    %111 = vector.extract_strided_slice %35 {offsets = [0, 18], sizes = [96, 6], strides = [1, 1]} : vector<96x24xbf16> to vector<96x6xbf16>
    %cst_48 = arith.constant dense<0.000000e+00> : vector<64x6xf32>
    %112 = tpu.matmul %110, %111, %cst_48 {dimension_numbers = #tpu.dot_dimension_numbers<[1], [0], [0], [1], [0, 0, 1, 1], [], []>} : vector<64x96xbf16>, vector<96x6xbf16>, vector<64x6xf32> -> vector<64x6xf32>
    %113 = tpu.reciprocal %109 {approx = true} : vector<64x1xf32> -> vector<64x1xf32>
    %114 = vector.broadcast %113 : vector<64x1xf32> to vector<64x6xf32>
    %115 = arith.mulf %112, %114 : vector<64x6xf32>
    %116 = tpu.concatenate %55, %75, %95, %115 in 1 : vector<64x6xf32>, vector<64x6xf32>, vector<64x6xf32>, vector<64x6xf32> -> vector<64x24xf32>
    %117 = arith.truncf %116 : vector<64x24xf32> to vector<64x24xbf16>
    %c0_49 = arith.constant 0 : index
    %c0_50 = arith.constant 0 : index
    %118 = vector.load %arg9[%c0_49, %c0_50] : memref<24x24xf32, #tpu.memory_space<vmem>>, vector<24x24xf32>
    %119 = arith.truncf %118 : vector<24x24xf32> to vector<24x24xbf16>
    %cst_51 = arith.constant dense<0.000000e+00> : vector<64x24xf32>
    %120 = tpu.matmul %117, %119, %cst_51 {dimension_numbers = #tpu.dot_dimension_numbers<[1], [0], [0], [1], [0, 0, 1, 1], [], []>} : vector<64x24xbf16>, vector<24x24xbf16>, vector<64x24xf32> -> vector<64x24xf32>
    %c0_52 = arith.constant 0 : index
    %c0_53 = arith.constant 0 : index
    %121 = vector.load %arg10[%c0_52, %c0_53] : memref<1x24xf32, #tpu.memory_space<vmem>>, vector<1x24xf32>
    %122 = vector.broadcast %121 : vector<1x24xf32> to vector<64x24xf32>
    %123 = arith.addf %120, %122 : vector<64x24xf32>
    %124 = vector.shape_cast %123 : vector<64x24xf32> to vector<1x8x8x24xf32>
    %c0_54 = arith.constant 0 : index
    %c0_55 = arith.constant 0 : index
    %c0_56 = arith.constant 0 : index
    %c0_57 = arith.constant 0 : index
    %125 = vector.load %arg12[%c0_54, %c0_55, %c0_56, %c0_57] : memref<1x8x8x24xf32, #tpu.memory_space<vmem>>, vector<1x8x8x24xf32>
    tpu.vector_store %arg12[%c0_54, %c0_55, %c0_56, %c0_57], %124 {strides = array<i32>} : memref<1x8x8x24xf32, #tpu.memory_space<vmem>>, vector<1x8x8x24xf32>,
    return
  }
  func.func @transform_0(%arg0: i32, %arg1: i32) -> (i32, i32, i32, i32) {
    %c0_i32 = arith.constant 0 : i32
    %c0_i32_0 = arith.constant 0 : i32
    %c0_i32_1 = arith.constant 0 : i32
    %c0_i32_2 = arith.constant 0 : i32
    return %arg1, %c0_i32, %c0_i32_0, %c0_i32_1 : i32, i32, i32, i32
  }
  func.func @transform_1(%arg0: i32, %arg1: i32) -> (i32, i32) {
    %c0_i32 = arith.constant 0 : i32
    %c0_i32_0 = arith.constant 0 : i32
    %c0_i32_1 = arith.constant 0 : i32
    return %c0_i32, %c0_i32_0 : i32, i32
  }
  func.func @transform_2(%arg0: i32, %arg1: i32) -> (i32, i32) {
    %c0_i32 = arith.constant 0 : i32
    %c0_i32_0 = arith.constant 0 : i32
    %c0_i32_1 = arith.constant 0 : i32
    return %c0_i32, %c0_i32_0 : i32, i32
  }
  func.func @transform_3(%arg0: i32, %arg1: i32) -> (i32, i32) {
    %c0_i32 = arith.constant 0 : i32
    %c0_i32_0 = arith.constant 0 : i32
    %c0_i32_1 = arith.constant 0 : i32
    return %c0_i32, %c0_i32_0 : i32, i32
  }
  func.func @transform_4(%arg0: i32, %arg1: i32) -> (i32, i32) {
    %c0_i32 = arith.constant 0 : i32
    %c0_i32_0 = arith.constant 0 : i32
    %c0_i32_1 = arith.constant 0 : i32
    return %c0_i32, %c0_i32_0 : i32, i32
  }
  func.func @transform_5(%arg0: i32, %arg1: i32) -> (i32, i32) {
    %c0_i32 = arith.constant 0 : i32
    %c0_i32_0 = arith.constant 0 : i32
    %c0_i32_1 = arith.constant 0 : i32
    return %c0_i32, %c0_i32_0 : i32, i32
  }
  func.func @transform_6(%arg0: i32, %arg1: i32) -> (i32, i32) {
    %c0_i32 = arith.constant 0 : i32
    %c0_i32_0 = arith.constant 0 : i32
    %c0_i32_1 = arith.constant 0 : i32
    return %c0_i32, %c0_i32_0 : i32, i32
  }
  func.func @transform_7(%arg0: i32, %arg1: i32) -> (i32, i32) {
    %c0_i32 = arith.constant 0 : i32
    %c0_i32_0 = arith.constant 0 : i32
    %c0_i32_1 = arith.constant 0 : i32
    return %c0_i32, %c0_i32_0 : i32, i32
  }
  func.func @transform_8(%arg0: i32, %arg1: i32) -> (i32, i32) {
    %c0_i32 = arith.constant 0 : i32
    %c0_i32_0 = arith.constant 0 : i32
    %c0_i32_1 = arith.constant 0 : i32
    return %c0_i32, %c0_i32_0 : i32, i32
  }
  func.func @transform_9(%arg0: i32, %arg1: i32) -> (i32, i32, i32, i32) {
    %c0_i32 = arith.constant 0 : i32
    %c0_i32_0 = arith.constant 0 : i32
    %c0_i32_1 = arith.constant 0 : i32
    %c0_i32_2 = arith.constant 0 : i32
    return %arg0, %c0_i32, %c0_i32_0, %c0_i32_1 : i32, i32, i32, i32
  }
  func.func @transform_10(%arg0: i32, %arg1: i32) -> (i32, i32, i32, i32) {
    %c0_i32 = arith.constant 0 : i32
    %c0_i32_0 = arith.constant 0 : i32
    %c0_i32_1 = arith.constant 0 : i32
    return %arg1, %arg0, %c0_i32, %c0_i32_0 : i32, i32, i32, i32
  }
}

module attributes {stable_mosaic.version = 11 : i64} {
  func.func @_na_layer_kernel(%arg0: i32, %arg1: i32, %arg2: memref<1x16x8x24xf32, #tpu.memory_space<vmem>>, %arg3: memref<24x24xf32, #tpu.memory_space<vmem>>, %arg4: memref<1x24xf32, #tpu.memory_space<vmem>>, %arg5: memref<24x24xf32, #tpu.memory_space<vmem>>, %arg6: memref<1x24xf32, #tpu.memory_space<vmem>>, %arg7: memref<24x24xf32, #tpu.memory_space<vmem>>, %arg8: memref<1x24xf32, #tpu.memory_space<vmem>>, %arg9: memref<24x24xf32, #tpu.memory_space<vmem>>, %arg10: memref<1x24xf32, #tpu.memory_space<vmem>>, %arg11: memref<1x4x64x96xbf16, #tpu.memory_space<vmem>>, %arg12: memref<1x8x8x24xf32, #tpu.memory_space<vmem>>) attributes {dimension_semantics = [#tpu.dimension_semantics<parallel>, #tpu.dimension_semantics<parallel>], iteration_bounds = array<i64: 2, 2>, scalar_prefetch = 0 : i64, scratch_operands = 0 : i64, tpu.core_type = #tpu.core_type<tc>, window_params = [{transform_indices = @transform_0, window_bounds = array<i64: 1, 16, 8, 24>}, {pipeline_mode = #tpu.pipeline_mode<synchronous>, transform_indices = @transform_1, window_bounds = array<i64: 24, 24>}, {pipeline_mode = #tpu.pipeline_mode<synchronous>, transform_indices = @transform_2, window_bounds = array<i64: 1, 24>}, {pipeline_mode = #tpu.pipeline_mode<synchronous>, transform_indices = @transform_3, window_bounds = array<i64: 24, 24>}, {pipeline_mode = #tpu.pipeline_mode<synchronous>, transform_indices = @transform_4, window_bounds = array<i64: 1, 24>}, {pipeline_mode = #tpu.pipeline_mode<synchronous>, transform_indices = @transform_5, window_bounds = array<i64: 24, 24>}, {pipeline_mode = #tpu.pipeline_mode<synchronous>, transform_indices = @transform_6, window_bounds = array<i64: 1, 24>}, {pipeline_mode = #tpu.pipeline_mode<synchronous>, transform_indices = @transform_7, window_bounds = array<i64: 24, 24>}, {pipeline_mode = #tpu.pipeline_mode<synchronous>, transform_indices = @transform_8, window_bounds = array<i64: 1, 24>}, {transform_indices = @transform_9, window_bounds = array<i64: 1, 4, 64, 96>}, {transform_indices = @transform_10, window_bounds = array<i64: 1, 8, 8, 24>}]} {
    %c8_i32 = arith.constant 8 : i32
    %0 = arith.muli %arg0, %c8_i32 : i32
    %1 = tpu.assume_multiple %0, 8 : i32
    %c2_i32 = arith.constant 2 : i32
    %2 = arith.subi %1, %c2_i32 : i32
    %c0_i32 = arith.constant 0 : i32
    %c4_i32 = arith.constant 4 : i32
    %3 = arith.maxsi %c0_i32, %2 : i32
    %4 = arith.minsi %c4_i32, %3 : i32
    %c0 = arith.constant 0 : index
    %5 = arith.index_cast %1 : i32 to index
    %c0_0 = arith.constant 0 : index
    %c0_1 = arith.constant 0 : index
    %6 = vector.load %arg2[%c0, %5, %c0_0, %c0_1] : memref<1x16x8x24xf32, #tpu.memory_space<vmem>>, vector<1x8x8x24xf32>
    %7 = vector.shape_cast %6 : vector<1x8x8x24xf32> to vector<64x24xf32>
    %8 = arith.truncf %7 : vector<64x24xf32> to vector<64x24xbf16>
    %c0_2 = arith.constant 0 : index
    %9 = arith.index_cast %4 : i32 to index
    %c0_3 = arith.constant 0 : index
    %c0_4 = arith.constant 0 : index
    %10 = vector.load %arg2[%c0_2, %9, %c0_3, %c0_4] : memref<1x16x8x24xf32, #tpu.memory_space<vmem>>, vector<1x12x8x24xf32>
    %11 = vector.shape_cast %10 : vector<1x12x8x24xf32> to vector<96x24xf32>
    %12 = arith.truncf %11 : vector<96x24xf32> to vector<96x24xbf16>
    %c0_5 = arith.constant 0 : index
    %c0_6 = arith.constant 0 : index
    %13 = vector.load %arg3[%c0_5, %c0_6] : memref<24x24xf32, #tpu.memory_space<vmem>>, vector<24x24xf32>
    %14 = arith.truncf %13 : vector<24x24xf32> to vector<24x24xbf16>
    %cst = arith.constant dense<0.000000e+00> : vector<64x24xf32>
    %15 = tpu.matmul %8, %14, %cst {dimension_numbers = #tpu.dot_dimension_numbers<[1], [0], [0], [1], [0, 0, 1, 1], [], []>} : vector<64x24xbf16>, vector<24x24xbf16>, vector<64x24xf32> -> vector<64x24xf32>
    %c0_7 = arith.constant 0 : index
    %c0_8 = arith.constant 0 : index
    %16 = vector.load %arg4[%c0_7, %c0_8] : memref<1x24xf32, #tpu.memory_space<vmem>>, vector<1x24xf32>
    %17 = vector.broadcast %16 : vector<1x24xf32> to vector<64x24xf32>
    %18 = arith.addf %15, %17 : vector<64x24xf32>
    %c0_9 = arith.constant 0 : index
    %c0_10 = arith.constant 0 : index
    %19 = vector.load %arg5[%c0_9, %c0_10] : memref<24x24xf32, #tpu.memory_space<vmem>>, vector<24x24xf32>
    %20 = arith.truncf %19 : vector<24x24xf32> to vector<24x24xbf16>
    %cst_11 = arith.constant dense<0.000000e+00> : vector<96x24xf32>
    %21 = tpu.matmul %12, %20, %cst_11 {dimension_numbers = #tpu.dot_dimension_numbers<[1], [0], [0], [1], [0, 0, 1, 1], [], []>} : vector<96x24xbf16>, vector<24x24xbf16>, vector<96x24xf32> -> vector<96x24xf32>
    %c0_12 = arith.constant 0 : index
    %c0_13 = arith.constant 0 : index
    %22 = vector.load %arg6[%c0_12, %c0_13] : memref<1x24xf32, #tpu.memory_space<vmem>>, vector<1x24xf32>
    %23 = vector.broadcast %22 : vector<1x24xf32> to vector<96x24xf32>
    %24 = arith.addf %21, %23 : vector<96x24xf32>
    %c0_14 = arith.constant 0 : index
    %c0_15 = arith.constant 0 : index
    %25 = vector.load %arg7[%c0_14, %c0_15] : memref<24x24xf32, #tpu.memory_space<vmem>>, vector<24x24xf32>
    %26 = arith.truncf %25 : vector<24x24xf32> to vector<24x24xbf16>
    %cst_16 = arith.constant dense<0.000000e+00> : vector<96x24xf32>
    %27 = tpu.matmul %12, %26, %cst_16 {dimension_numbers = #tpu.dot_dimension_numbers<[1], [0], [0], [1], [0, 0, 1, 1], [], []>} : vector<96x24xbf16>, vector<24x24xbf16>, vector<96x24xf32> -> vector<96x24xf32>
    %c0_17 = arith.constant 0 : index
    %c0_18 = arith.constant 0 : index
    %28 = vector.load %arg8[%c0_17, %c0_18] : memref<1x24xf32, #tpu.memory_space<vmem>>, vector<1x24xf32>
    %29 = vector.broadcast %28 : vector<1x24xf32> to vector<96x24xf32>
    %30 = arith.addf %27, %29 : vector<96x24xf32>
    %cst_19 = arith.constant 0.408248305 : f32
    %31 = vector.broadcast %cst_19 : f32 to vector<64x24xf32>
    %32 = arith.mulf %18, %31 : vector<64x24xf32>
    %33 = arith.truncf %32 : vector<64x24xf32> to vector<64x24xbf16>
    %34 = arith.truncf %24 : vector<96x24xf32> to vector<96x24xbf16>
    %35 = arith.truncf %30 : vector<96x24xf32> to vector<96x24xbf16>
    %36 = vector.extract_strided_slice %33 {offsets = [0, 0], sizes = [64, 6], strides = [1, 1]} : vector<64x24xbf16> to vector<64x6xbf16>
    %37 = vector.extract_strided_slice %34 {offsets = [0, 0], sizes = [96, 6], strides = [1, 1]} : vector<96x24xbf16> to vector<96x6xbf16>
    %cst_20 = arith.constant dense<0.000000e+00> : vector<64x96xf32>
    %38 = tpu.matmul %36, %37, %cst_20 {dimension_numbers = #tpu.dot_dimension_numbers<[1], [1], [0], [0], [0, 0, 1, 0], [], []>} : vector<64x6xbf16>, vector<96x6xbf16>, vector<64x96xf32> -> vector<64x96xf32>
    %c0_21 = arith.constant 0 : index
    %c0_22 = arith.constant 0 : index
    %c0_23 = arith.constant 0 : index
    %c0_24 = arith.constant 0 : index
    %39 = vector.load %arg11[%c0_21, %c0_22, %c0_23, %c0_24] : memref<1x4x64x96xbf16, #tpu.memory_space<vmem>>, vector<1x1x64x96xbf16>
    %40 = vector.shape_cast %39 : vector<1x1x64x96xbf16> to vector<64x96xbf16>
    %41 = arith.extf %40 : vector<64x96xbf16> to vector<64x96xf32>
    %42 = arith.addf %38, %41 : vector<64x96xf32>
    %cst_25 = arith.constant dense<0xFF800000> : vector<64xf32>
    %43 = vector.multi_reduction <maximumf>, %42, %cst_25 [1] : vector<64x96xf32> to vector<64xf32>
    %44 = vector.shape_cast %43 : vector<64xf32> to vector<64x1xf32>
    %45 = vector.broadcast %44 : vector<64x1xf32> to vector<64x96xf32>
    %46 = arith.subf %42, %45 : vector<64x96xf32>
    %47 = math.exp %46 : vector<64x96xf32>
    %cst_26 = arith.constant dense<0.000000e+00> : vector<64xf32>
    %48 = vector.multi_reduction <add>, %47, %cst_26 [1] : vector<64x96xf32> to vector<64xf32>
    %49 = vector.shape_cast %48 : vector<64xf32> to vector<64x1xf32>
    %50 = arith.truncf %47 : vector<64x96xf32> to vector<64x96xbf16>
    %51 = vector.extract_strided_slice %35 {offsets = [0, 0], sizes = [96, 6], strides = [1, 1]} : vector<96x24xbf16> to vector<96x6xbf16>
    %cst_27 = arith.constant dense<0.000000e+00> : vector<64x6xf32>
    %52 = tpu.matmul %50, %51, %cst_27 {dimension_numbers = #tpu.dot_dimension_numbers<[1], [0], [0], [1], [0, 0, 1, 1], [], []>} : vector<64x96xbf16>, vector<96x6xbf16>, vector<64x6xf32> -> vector<64x6xf32>
    %53 = tpu.reciprocal %49 {approx = true} : vector<64x1xf32> -> vector<64x1xf32>
    %54 = vector.broadcast %53 : vector<64x1xf32> to vector<64x6xf32>
    %55 = arith.mulf %52, %54 : vector<64x6xf32>
    %56 = vector.extract_strided_slice %33 {offsets = [0, 6], sizes = [64, 6], strides = [1, 1]} : vector<64x24xbf16> to vector<64x6xbf16>
    %57 = vector.extract_strided_slice %34 {offsets = [0, 6], sizes = [96, 6], strides = [1, 1]} : vector<96x24xbf16> to vector<96x6xbf16>
    %cst_28 = arith.constant dense<0.000000e+00> : vector<64x96xf32>
    %58 = tpu.matmul %56, %57, %cst_28 {dimension_numbers = #tpu.dot_dimension_numbers<[1], [1], [0], [0], [0, 0, 1, 0], [], []>} : vector<64x6xbf16>, vector<96x6xbf16>, vector<64x96xf32> -> vector<64x96xf32>
    %c0_29 = arith.constant 0 : index
    %c1 = arith.constant 1 : index
    %c0_30 = arith.constant 0 : index
    %c0_31 = arith.constant 0 : index
    %59 = vector.load %arg11[%c0_29, %c1, %c0_30, %c0_31] : memref<1x4x64x96xbf16, #tpu.memory_space<vmem>>, vector<1x1x64x96xbf16>
    %60 = vector.shape_cast %59 : vector<1x1x64x96xbf16> to vector<64x96xbf16>
    %61 = arith.extf %60 : vector<64x96xbf16> to vector<64x96xf32>
    %62 = arith.addf %58, %61 : vector<64x96xf32>
    %cst_32 = arith.constant dense<0xFF800000> : vector<64xf32>
    %63 = vector.multi_reduction <maximumf>, %62, %cst_32 [1] : vector<64x96xf32> to vector<64xf32>
    %64 = vector.shape_cast %63 : vector<64xf32> to vector<64x1xf32>
    %65 = vector.broadcast %64 : vector<64x1xf32> to vector<64x96xf32>
    %66 = arith.subf %62, %65 : vector<64x96xf32>
    %67 = math.exp %66 : vector<64x96xf32>
    %cst_33 = arith.constant dense<0.000000e+00> : vector<64xf32>
    %68 = vector.multi_reduction <add>, %67, %cst_33 [1] : vector<64x96xf32> to vector<64xf32>
    %69 = vector.shape_cast %68 : vector<64xf32> to vector<64x1xf32>
    %70 = arith.truncf %67 : vector<64x96xf32> to vector<64x96xbf16>
    %71 = vector.extract_strided_slice %35 {offsets = [0, 6], sizes = [96, 6], strides = [1, 1]} : vector<96x24xbf16> to vector<96x6xbf16>
    %cst_34 = arith.constant dense<0.000000e+00> : vector<64x6xf32>
    %72 = tpu.matmul %70, %71, %cst_34 {dimension_numbers = #tpu.dot_dimension_numbers<[1], [0], [0], [1], [0, 0, 1, 1], [], []>} : vector<64x96xbf16>, vector<96x6xbf16>, vector<64x6xf32> -> vector<64x6xf32>
    %73 = tpu.reciprocal %69 {approx = true} : vector<64x1xf32> -> vector<64x1xf32>
    %74 = vector.broadcast %73 : vector<64x1xf32> to vector<64x6xf32>
    %75 = arith.mulf %72, %74 : vector<64x6xf32>
    %76 = vector.extract_strided_slice %33 {offsets = [0, 12], sizes = [64, 6], strides = [1, 1]} : vector<64x24xbf16> to vector<64x6xbf16>
    %77 = vector.extract_strided_slice %34 {offsets = [0, 12], sizes = [96, 6], strides = [1, 1]} : vector<96x24xbf16> to vector<96x6xbf16>
    %cst_35 = arith.constant dense<0.000000e+00> : vector<64x96xf32>
    %78 = tpu.matmul %76, %77, %cst_35 {dimension_numbers = #tpu.dot_dimension_numbers<[1], [1], [0], [0], [0, 0, 1, 0], [], []>} : vector<64x6xbf16>, vector<96x6xbf16>, vector<64x96xf32> -> vector<64x96xf32>
    %c0_36 = arith.constant 0 : index
    %c2 = arith.constant 2 : index
    %c0_37 = arith.constant 0 : index
    %c0_38 = arith.constant 0 : index
    %79 = vector.load %arg11[%c0_36, %c2, %c0_37, %c0_38] : memref<1x4x64x96xbf16, #tpu.memory_space<vmem>>, vector<1x1x64x96xbf16>
    %80 = vector.shape_cast %79 : vector<1x1x64x96xbf16> to vector<64x96xbf16>
    %81 = arith.extf %80 : vector<64x96xbf16> to vector<64x96xf32>
    %82 = arith.addf %78, %81 : vector<64x96xf32>
    %cst_39 = arith.constant dense<0xFF800000> : vector<64xf32>
    %83 = vector.multi_reduction <maximumf>, %82, %cst_39 [1] : vector<64x96xf32> to vector<64xf32>
    %84 = vector.shape_cast %83 : vector<64xf32> to vector<64x1xf32>
    %85 = vector.broadcast %84 : vector<64x1xf32> to vector<64x96xf32>
    %86 = arith.subf %82, %85 : vector<64x96xf32>
    %87 = math.exp %86 : vector<64x96xf32>
    %cst_40 = arith.constant dense<0.000000e+00> : vector<64xf32>
    %88 = vector.multi_reduction <add>, %87, %cst_40 [1] : vector<64x96xf32> to vector<64xf32>
    %89 = vector.shape_cast %88 : vector<64xf32> to vector<64x1xf32>
    %90 = arith.truncf %87 : vector<64x96xf32> to vector<64x96xbf16>
    %91 = vector.extract_strided_slice %35 {offsets = [0, 12], sizes = [96, 6], strides = [1, 1]} : vector<96x24xbf16> to vector<96x6xbf16>
    %cst_41 = arith.constant dense<0.000000e+00> : vector<64x6xf32>
    %92 = tpu.matmul %90, %91, %cst_41 {dimension_numbers = #tpu.dot_dimension_numbers<[1], [0], [0], [1], [0, 0, 1, 1], [], []>} : vector<64x96xbf16>, vector<96x6xbf16>, vector<64x6xf32> -> vector<64x6xf32>
    %93 = tpu.reciprocal %89 {approx = true} : vector<64x1xf32> -> vector<64x1xf32>
    %94 = vector.broadcast %93 : vector<64x1xf32> to vector<64x6xf32>
    %95 = arith.mulf %92, %94 : vector<64x6xf32>
    %96 = vector.extract_strided_slice %33 {offsets = [0, 18], sizes = [64, 6], strides = [1, 1]} : vector<64x24xbf16> to vector<64x6xbf16>
    %97 = vector.extract_strided_slice %34 {offsets = [0, 18], sizes = [96, 6], strides = [1, 1]} : vector<96x24xbf16> to vector<96x6xbf16>
    %cst_42 = arith.constant dense<0.000000e+00> : vector<64x96xf32>
    %98 = tpu.matmul %96, %97, %cst_42 {dimension_numbers = #tpu.dot_dimension_numbers<[1], [1], [0], [0], [0, 0, 1, 0], [], []>} : vector<64x6xbf16>, vector<96x6xbf16>, vector<64x96xf32> -> vector<64x96xf32>
    %c0_43 = arith.constant 0 : index
    %c3 = arith.constant 3 : index
    %c0_44 = arith.constant 0 : index
    %c0_45 = arith.constant 0 : index
    %99 = vector.load %arg11[%c0_43, %c3, %c0_44, %c0_45] : memref<1x4x64x96xbf16, #tpu.memory_space<vmem>>, vector<1x1x64x96xbf16>
    %100 = vector.shape_cast %99 : vector<1x1x64x96xbf16> to vector<64x96xbf16>
    %101 = arith.extf %100 : vector<64x96xbf16> to vector<64x96xf32>
    %102 = arith.addf %98, %101 : vector<64x96xf32>
    %cst_46 = arith.constant dense<0xFF800000> : vector<64xf32>
    %103 = vector.multi_reduction <maximumf>, %102, %cst_46 [1] : vector<64x96xf32> to vector<64xf32>
    %104 = vector.shape_cast %103 : vector<64xf32> to vector<64x1xf32>
    %105 = vector.broadcast %104 : vector<64x1xf32> to vector<64x96xf32>
    %106 = arith.subf %102, %105 : vector<64x96xf32>
    %107 = math.exp %106 : vector<64x96xf32>
    %cst_47 = arith.constant dense<0.000000e+00> : vector<64xf32>
    %108 = vector.multi_reduction <add>, %107, %cst_47 [1] : vector<64x96xf32> to vector<64xf32>
    %109 = vector.shape_cast %108 : vector<64xf32> to vector<64x1xf32>
    %110 = arith.truncf %107 : vector<64x96xf32> to vector<64x96xbf16>
    %111 = vector.extract_strided_slice %35 {offsets = [0, 18], sizes = [96, 6], strides = [1, 1]} : vector<96x24xbf16> to vector<96x6xbf16>
    %cst_48 = arith.constant dense<0.000000e+00> : vector<64x6xf32>
    %112 = tpu.matmul %110, %111, %cst_48 {dimension_numbers = #tpu.dot_dimension_numbers<[1], [0], [0], [1], [0, 0, 1, 1], [], []>} : vector<64x96xbf16>, vector<96x6xbf16>, vector<64x6xf32> -> vector<64x6xf32>
    %113 = tpu.reciprocal %109 {approx = true} : vector<64x1xf32> -> vector<64x1xf32>
    %114 = vector.broadcast %113 : vector<64x1xf32> to vector<64x6xf32>
    %115 = arith.mulf %112, %114 : vector<64x6xf32>
    %116 = tpu.concatenate %55, %75, %95, %115 in 1 : vector<64x6xf32>, vector<64x6xf32>, vector<64x6xf32>, vector<64x6xf32> -> vector<64x24xf32>
    %117 = arith.truncf %116 : vector<64x24xf32> to vector<64x24xbf16>
    %c0_49 = arith.constant 0 : index
    %c0_50 = arith.constant 0 : index
    %118 = vector.load %arg9[%c0_49, %c0_50] : memref<24x24xf32, #tpu.memory_space<vmem>>, vector<24x24xf32>
    %119 = arith.truncf %118 : vector<24x24xf32> to vector<24x24xbf16>
    %cst_51 = arith.constant dense<0.000000e+00> : vector<64x24xf32>
    %120 = tpu.matmul %117, %119, %cst_51 {dimension_numbers = #tpu.dot_dimension_numbers<[1], [0], [0], [1], [0, 0, 1, 1], [], []>} : vector<64x24xbf16>, vector<24x24xbf16>, vector<64x24xf32> -> vector<64x24xf32>
    %c0_52 = arith.constant 0 : index
    %c0_53 = arith.constant 0 : index
    %121 = vector.load %arg10[%c0_52, %c0_53] : memref<1x24xf32, #tpu.memory_space<vmem>>, vector<1x24xf32>
    %122 = vector.broadcast %121 : vector<1x24xf32> to vector<64x24xf32>
    %123 = arith.addf %120, %122 : vector<64x24xf32>
    %124 = vector.shape_cast %123 : vector<64x24xf32> to vector<1x8x8x24xf32>
    %c0_54 = arith.constant 0 : index
    %c0_55 = arith.constant 0 : index
    %c0_56 = arith.constant 0 : index
    %c0_57 = arith.constant 0 : index
    %125 = vector.load %arg12[%c0_54, %c0_55, %c0_56, %c0_57] : memref<1x8x8x24xf32, #tpu.memory_space<vmem>>, vector<1x8x8x24xf32>
    tpu.vector_store %arg12[%c0_54, %c0_55, %c0_56, %c0_57], %124 {strides = array<i32>} : memref<1x8x8x24xf32, #tpu.memory_space<vmem>>, vector<1x8x8x24xf32>,
    return
  }
  func.func @transform_0(%arg0: i32, %arg1: i32) -> (i32, i32, i32, i32) {
    %c0_i32 = arith.constant 0 : i32
    %c0_i32_0 = arith.constant 0 : i32
    %c0_i32_1 = arith.constant 0 : i32
    %c0_i32_2 = arith.constant 0 : i32
    return %arg1, %c0_i32, %c0_i32_0, %c0_i32_1 : i32, i32, i32, i32
  }
  func.func @transform_1(%arg0: i32, %arg1: i32) -> (i32, i32) {
    %c0_i32 = arith.constant 0 : i32
    %c0_i32_0 = arith.constant 0 : i32
    %c0_i32_1 = arith.constant 0 : i32
    return %c0_i32, %c0_i32_0 : i32, i32
  }
  func.func @transform_2(%arg0: i32, %arg1: i32) -> (i32, i32) {
    %c0_i32 = arith.constant 0 : i32
    %c0_i32_0 = arith.constant 0 : i32
    %c0_i32_1 = arith.constant 0 : i32
    return %c0_i32, %c0_i32_0 : i32, i32
  }
  func.func @transform_3(%arg0: i32, %arg1: i32) -> (i32, i32) {
    %c0_i32 = arith.constant 0 : i32
    %c0_i32_0 = arith.constant 0 : i32
    %c0_i32_1 = arith.constant 0 : i32
    return %c0_i32, %c0_i32_0 : i32, i32
  }
  func.func @transform_4(%arg0: i32, %arg1: i32) -> (i32, i32) {
    %c0_i32 = arith.constant 0 : i32
    %c0_i32_0 = arith.constant 0 : i32
    %c0_i32_1 = arith.constant 0 : i32
    return %c0_i32, %c0_i32_0 : i32, i32
  }
  func.func @transform_5(%arg0: i32, %arg1: i32) -> (i32, i32) {
    %c0_i32 = arith.constant 0 : i32
    %c0_i32_0 = arith.constant 0 : i32
    %c0_i32_1 = arith.constant 0 : i32
    return %c0_i32, %c0_i32_0 : i32, i32
  }
  func.func @transform_6(%arg0: i32, %arg1: i32) -> (i32, i32) {
    %c0_i32 = arith.constant 0 : i32
    %c0_i32_0 = arith.constant 0 : i32
    %c0_i32_1 = arith.constant 0 : i32
    return %c0_i32, %c0_i32_0 : i32, i32
  }
  func.func @transform_7(%arg0: i32, %arg1: i32) -> (i32, i32) {
    %c0_i32 = arith.constant 0 : i32
    %c0_i32_0 = arith.constant 0 : i32
    %c0_i32_1 = arith.constant 0 : i32
    return %c0_i32, %c0_i32_0 : i32, i32
  }
  func.func @transform_8(%arg0: i32, %arg1: i32) -> (i32, i32) {
    %c0_i32 = arith.constant 0 : i32
    %c0_i32_0 = arith.constant 0 : i32
    %c0_i32_1 = arith.constant 0 : i32
    return %c0_i32, %c0_i32_0 : i32, i32
  }
  func.func @transform_9(%arg0: i32, %arg1: i32) -> (i32, i32, i32, i32) {
    %c0_i32 = arith.constant 0 : i32
    %c0_i32_0 = arith.constant 0 : i32
    %c0_i32_1 = arith.constant 0 : i32
    %c0_i32_2 = arith.constant 0 : i32
    return %arg0, %c0_i32, %c0_i32_0, %c0_i32_1 : i32, i32, i32, i32
  }
  func.func @transform_10(%arg0: i32, %arg1: i32) -> (i32, i32, i32, i32) {
    %c0_i32 = arith.constant 0 : i32
    %c0_i32_0 = arith.constant 0 : i32
    %c0_i32_1 = arith.constant 0 : i32
    return %arg1, %arg0, %c0_i32, %c0_i32_0 : i32, i32, i32, i32
  }
}

</mosaic_0001>

<bundles_post_ra>
// kernel: natten_forward.3
= control target key start
LH: loop header
LB: loop body
LE: loop exit
PB: predicated region body
PF: predicated region fallthrough
CT: control target
= control target key end

     0   :  { %s505_s12 = smov 0   ;;  %s580_s0 = inlined_call_operand.vmem [shape: f32[256,16], index: 0, kind: input, shape index: {}]   ;;  %s581_s1 = inlined_call_operand.vmem [shape: f32[16,24], index: 1, kind: input, shape index: {}]   ;;  %s582_s2 = inlined_call_operand.vmem [shape: f32[1,24], index: 2, kind: input, shape index: {}]   ;;  %s583_s3 = inlined_call_operand.vmem [shape: f32[256,24], index: 3, kind: output, shape index: {}]  }
   0x1 LB: > { %s420_s13 = sadd.s32 4294967295, %s483_s12   ;;  %p424_p0 = scmp.ge.s32.totalorder %s483_s12, 1  ;;  %s483_s12 = sphi %s505_s12, %s13_s12  }
   0x2   : > { %p138_p1 = scmp.lt.s32.totalorder %s483_s12, 3 }
   0x4   : > { %p139_p2 = pnand %p424_p0, %p138_p1 }
   0x5   : > { %v199_v0 = vld [vmem:[%s581_s1] sm:$0xff] (!%p139_p2)  ;;  %v200_v1 = vld [vmem:[%s581_s1 + $0x8] sm:$0xff] (!%p139_p2)  ;;  %s425_s18 = sshll.u32 (!%p139_p2), %s420_s13, 4  ;;  %vm209_vm0 = vcmask (!%p139_p2), 130048   ;;  %vm347_vm1 = vcmask (!%p139_p2), 195584  }
   0x6   : > { %142 = sbr.rel (%p139_p2) target bundleno = 249 (0xf9), region = 32  ;;  %v201_v2 = vpack.c.bf16 (!%p139_p2), %v200_v1, %v199_v0  ;;  %p163_p3 = scmp.lt.s32.totalorder (!%p139_p2), %s425_s18, 31  ;;  %v429_v27 = vld [vmem:[%s582_s2] ss:$0 sm:$0xff] (!%p139_p2) }
   0x8   : > { %449 = vmatprep.subr.bf16.mxu0 (!%p139_p2), %v201_v2  ;;  %467 = vmatprep.subr.bf16.mxu1 (!%p139_p2), %v201_v2 }
   0x9   : > { %450 = vmatpush3.bf16.msra.mxu0 (!%p139_p2), %v201_v2  ;;  %468 = vmatpush3.bf16.msra.mxu1 (!%p139_p2), %v201_v2 }
   0xd   : > { %s585_s18 = smov (!%p163_p3, %s425_s18), 31 }
   0xe   : > { %s426_s19 = sshll.u32 %s585_s18, 3 }
   0xf   : > { %s166_s22 = scalar_lea.vmem %s580_s0, %s426_s19  ;;  %s543_s27 = scalar_lea.vmem %s583_s3, %s426_s19 }
  0x10   : > { %v175_v3 = vld [vmem:[%s166_s22] sm:$0xff]  ;;  %v176_v4 = vld [vmem:[%s166_s22 + $0x8] sm:$0xff]  ;;  %v177_v8 = vld [vmem:[%s166_s22 + $0x10] sm:$0xff] }
  0x11   : > { %v183_v5 = vld [vmem:[%s166_s22 + $0x40] sm:$0xff]  ;;  %v191_v6 = vpack.c.bf16 %v176_v4, %v175_v3  ;;  %v184_v7 = vld [vmem:[%s166_s22 + $0x48] sm:$0xff]  ;;  %v178_v9 = vld [vmem:[%s166_s22 + $0x18] sm:$0xff] }
  0x12   : > { %v195_v10 = vpack.c.bf16 %v184_v7, %v183_v5  ;;  %v192_v11 = vpack.c.bf16 %v178_v9, %v177_v8  ;;  %v185_v12 = vld [vmem:[%s166_s22 + $0x50] sm:$0xff]  ;;  %v186_v13 = vld [vmem:[%s166_s22 + $0x58] sm:$0xff]  ;;  %v179_v14 = vld [vmem:[%s166_s22 + $0x20] sm:$0xff] }
  0x13   : > { %451 = vmatprep.mubr.msk.bf16.mxu0 %vm209_vm0, %v191_v6  ;;  %v196_v15 = vpack.c.bf16 %v186_v13, %v185_v12  ;;  %v180_v16 = vld [vmem:[%s166_s22 + $0x28] sm:$0xff]  ;;  %v187_v17 = vld [vmem:[%s166_s22 + $0x60] sm:$0xff]  ;;  %v181_v21 = vld [vmem:[%s166_s22 + $0x30] sm:$0xff] }
  0x14   : > { %v188_v18 = vld [vmem:[%s166_s22 + $0x68] sm:$0xff]  ;;  %459 = vmatprep.mubr.msk.bf16.mxu1 %vm209_vm0, %v195_v10  ;;  %452 = vmatmul.mubr.msk.bf16.vlgmr.msra.gmra.mrb[0].mxu0 %vm209_vm0, %v192_v11  ;;  %v193_v19 = vpack.c.bf16 %v180_v16, %v179_v14  ;;  %v182_v22 = vld [vmem:[%s166_s22 + $0x38] sm:$0xff]  ;;  %v189_v23 = vld [vmem:[%s166_s22 + $0x70] sm:$0xff] }
  0x15   : > { %v197_v20 = vpack.c.bf16 %v188_v18, %v187_v17  ;;  %460 = vmatmul.mubr.msk.bf16.vlgmr.msra.gmra.mrb[0].mxu1 %vm209_vm0, %v196_v15  ;;  %v190_v24 = vld [vmem:[%s166_s22 + $0x78] sm:$0xff]  ;;  %v194_v25 = vpack.c.bf16 %v182_v22, %v181_v21 }
  0x16   : > { %455 = vmatprep.mubr.msk.bf16.mxu0 %vm209_vm0, %v193_v19  ;;  %v198_v26 = vpack.c.bf16 %v190_v24, %v189_v23 }
  0x17   : > { %463 = vmatprep.mubr.msk.bf16.mxu1 %vm209_vm0, %v197_v20 }
  0x1c   : > { %456 = vmatmul.mubr.msk.bf16.gmra.mrb[4].mxu0 %vm209_vm0, %v194_v25 }
  0x1d   : > { %464 = vmatmul.mubr.msk.bf16.gmra.mrb[4].mxu1 %vm209_vm0, %v198_v26 }
  0xe7   : > { %v453_v28 = vpop.f32.mrb[0].mxu0 }
  0xe8   : > { %v277_v29 = vadd.f32 %v453_v28, %v429_v27  ;;  %v461_v30 = vpop.f32.mrb[0].mxu1  ;;  %v268_v31 = vpop.f32.mrb[1].mxu0 }
  0xe9   : > { %v309_v32 = vadd.f32 %v461_v30, %v429_v27  ;;  %v269_v33 = vadd.f32 %v429_v27, %v268_v31  ;;  %v300_v34 = vpop.f32.mrb[1].mxu1  ;;  %v454_v35 = vpop.f32.mrb[2].mxu0 }
  0xea   : > { %v333_v36 = vmax.f32 %v277_v29, 0.0  ;;  %v301_v37 = vadd.f32 %v429_v27, %v300_v34  ;;  %v280_v38 = vadd.f32 %v454_v35, %v429_v27  ;;  %v462_v39 = vpop.f32.mrb[2].mxu1  ;;  %v271_v40 = vpop.f32.mrb[3].mxu0 }
  0xeb   : > { %v341_v41 = vmax.f32 %v309_v32, 0.0  ;;  %v331_v42 = vmax.f32 %v269_v33, 0.0  ;;  %v312_v43 = vadd.f32 %v462_v39, %v429_v27  ;;  %v272_v44 = vadd.f32 %v429_v27, %v271_v40  ;;  %v303_v45 = vpop.f32.mrb[3].mxu1 }
  0xec   : > { %350 = vst.msk [vmem:[%s543_s27 + $0x10] sm:$0xff] %vm347_vm1, %v333_v36  ;;  %v339_v46 = vmax.f32 %v301_v37, 0.0  ;;  %v334_v47 = vmax.f32 %v280_v38, 0.0  ;;  %v304_v48 = vadd.f32 %v429_v27, %v303_v45 }
  0xed   : > { %358 = vst.msk [vmem:[%s543_s27 + $0x50] sm:$0xff] %vm347_vm1, %v341_v41  ;;  %348 = vst.msk [vmem:[%s543_s27] sm:$0xff] %vm347_vm1, %v331_v42  ;;  %v342_v49 = vmax.f32 %v312_v43, 0.0  ;;  %v332_v50 = vmax.f32 %v272_v44, 0.0 }
  0xee   : > { %356 = vst.msk [vmem:[%s543_s27 + $0x40] sm:$0xff] %vm347_vm1, %v339_v46  ;;  %351 = vst.msk [vmem:[%s543_s27 + $0x18] sm:$0xff] %vm347_vm1, %v334_v47  ;;  %v340_v51 = vmax.f32 %v304_v48, 0.0 }
  0xef   : > { %359 = vst.msk [vmem:[%s543_s27 + $0x58] sm:$0xff] %vm347_vm1, %v342_v49  ;;  %349 = vst.msk [vmem:[%s543_s27 + $0x8] sm:$0xff] %vm347_vm1, %v332_v50  ;;  %v457_v52 = vpop.f32.mrb[4].mxu0 }
  0xf0   : > { %357 = vst.msk [vmem:[%s543_s27 + $0x48] sm:$0xff] %vm347_vm1, %v340_v51  ;;  %v293_v53 = vadd.f32 %v457_v52, %v429_v27  ;;  %v465_v54 = vpop.f32.mrb[4].mxu1  ;;  %v284_v55 = vpop.f32.mrb[5].mxu0 }
  0xf1   : > { %v325_v56 = vadd.f32 %v465_v54, %v429_v27  ;;  %v285_v57 = vadd.f32 %v429_v27, %v284_v55  ;;  %v316_v58 = vpop.f32.mrb[5].mxu1  ;;  %v458_v59 = vpop.f32.mrb[6].mxu0 }
  0xf2   : > { %v337_v60 = vmax.f32 %v293_v53, 0.0  ;;  %v317_v61 = vadd.f32 %v429_v27, %v316_v58  ;;  %v296_v62 = vadd.f32 %v458_v59, %v429_v27  ;;  %v466_v63 = vpop.f32.mrb[6].mxu1  ;;  %v287_v0 = vpop.f32.mrb[7].mxu0 }
  0xf3   : > { %v345_v1 = vmax.f32 %v325_v56, 0.0  ;;  %v335_v2 = vmax.f32 %v285_v57, 0.0  ;;  %v328_v3 = vadd.f32 %v466_v63, %v429_v27  ;;  %v288_v4 = vadd.f32 %v429_v27, %v287_v0  ;;  %v319_v5 = vpop.f32.mrb[7].mxu1 }
  0xf4   : > { %354 = vst.msk [vmem:[%s543_s27 + $0x30] sm:$0xff] %vm347_vm1, %v337_v60  ;;  %v343_v6 = vmax.f32 %v317_v61, 0.0  ;;  %v338_v7 = vmax.f32 %v296_v62, 0.0  ;;  %v320_v8 = vadd.f32 %v429_v27, %v319_v5 }
  0xf5   : > { %362 = vst.msk [vmem:[%s543_s27 + $0x70] sm:$0xff] %vm347_vm1, %v345_v1  ;;  %352 = vst.msk [vmem:[%s543_s27 + $0x20] sm:$0xff] %vm347_vm1, %v335_v2  ;;  %v346_v9 = vmax.f32 %v328_v3, 0.0  ;;  %v336_v10 = vmax.f32 %v288_v4, 0.0 }
  0xf6   : > { %360 = vst.msk [vmem:[%s543_s27 + $0x60] sm:$0xff] %vm347_vm1, %v343_v6  ;;  %355 = vst.msk [vmem:[%s543_s27 + $0x38] sm:$0xff] %vm347_vm1, %v338_v7  ;;  %v344_v11 = vmax.f32 %v320_v8, 0.0 }
  0xf7   : > { %363 = vst.msk [vmem:[%s543_s27 + $0x78] sm:$0xff] %vm347_vm1, %v346_v9  ;;  %353 = vst.msk [vmem:[%s543_s27 + $0x28] sm:$0xff] %vm347_vm1, %v336_v10 }
  0xf8   : > { %361 = vst.msk [vmem:[%s543_s27 + $0x68] sm:$0xff] %vm347_vm1, %v344_v11 }
  0xf9 PF: > { %s13_s12 = sadd.s32 1, %s483_s12  }
  0xfa   : > { %p10_p4 = scmp.ge.s32.totalorder %s13_s12, 4  }
  0xfc   :  { %12 = sbr.rel (!%p10_p4) target bundleno = 1 (0x1), region = 62 }

// kernel: natten_forward.4
= control target key start
LH: loop header
LB: loop body
LE: loop exit
PB: predicated region body
PF: predicated region fallthrough
CT: control target
= control target key end

     0   :  { %s3227_s13 = smov 0   ;;  %s3229_s14 = smov 0   ;;  %s4035_s0 = inlined_call_operand.vmem [shape: f32[2,16,8,24], index: 0, kind: input, shape index: {}]   ;;  %s4036_s1 = inlined_call_operand.vmem [shape: f32[24,24], index: 1, kind: input, shape index: {}]   ;;  %s4037_s2 = inlined_call_operand.vmem [shape: f32[1,24], index: 2, kind: input, shape index: {}]   ;;  %s4038_s3 = inlined_call_operand.vmem [shape: f32[24,24], index: 3, kind: input, shape index: {}]   ;;  %s4039_s4 = inlined_call_operand.vmem [shape: f32[1,24], index: 4, kind: input, shape index: {}]   ;;  %s4040_s5 = inlined_call_operand.vmem [shape: f32[24,24], index: 5, kind: input, shape index: {}]   ;;  %s4041_s6 = inlined_call_operand.vmem [shape: f32[1,24], index: 6, kind: input, shape index: {}]   ;;  %s4042_s7 = inlined_call_operand.vmem [shape: f32[24,24], index: 7, kind: input, shape index: {}]   ;;  %s4043_s8 = inlined_call_operand.vmem [shape: f32[1,24], index: 8, kind: input, shape index: {}]   ;;  %s4044_s9 = inlined_call_operand.vmem [shape: bf16[2,4,64,96], index: 9, kind: input, shape index: {}]   ;;  %s4045_s10 = inlined_call_operand.vmem [shape: f32[2,16,8,24], index: 10, kind: output, shape index: {}]  }
   0x1   :  { %s3231_s15 = smov 0   ;;  %s3233_s16 = smov 0  }
   0x2   :  { %s3235_s17 = smov 0  }
   0x3 LB: > { %s29_s18 = sadd.s32 1, %s3156_s15  ;;  %s32_s19 = sadd.s32 1, %s3160_s16  ;;  %s3164_s17 = sphi %s3235_s17, %s20_s17   ;;  %s3160_s16 = sphi %s3233_s16, %s4063_s16   ;;  %s3156_s15 = sphi %s3231_s15, %s4062_s15   ;;  %s3152_s14 = sphi %s3229_s14, %s4061_s14   ;;  %s3148_s13 = sphi %s3227_s13, %s4060_s13  }
   0x4   : > { %p30_p0 = scmp.ge.s32.totalorder %s29_s18, 2  ;;  %p2357_p1 = scmp.ge.s32.totalorder %s3164_s17, 1 }
   0x5   : > { %p336_p2 = scmp.lt.s32.totalorder %s3164_s17, 5 }
   0x6   : > { %s4065_s18 = smov (%p30_p0, %s29_s18), 0  ;;  %s4067_s19 = smov (!%p30_p0, %s32_s19), %s3160_s16 }
   0x7   : > { %p337_p3 = pnand %p2357_p1, %p336_p2  ;;  %p34_p4 = scmp.ge.s32.totalorder %s4067_s19, 2 }
   0x9   : > { %s4069_s19 = smov (%p34_p4, %s4067_s19), 0  ;;  %340 = sbr.rel (%p337_p3) target bundleno = 2587 (0xa1b), region = 60 }
  0x10   : > { %v538_v0 = vld [vmem:[%s4038_s3] sm:$0xff]  ;;  %v539_v1 = vld [vmem:[%s4038_s3 + $0x8] sm:$0xff]  ;;  %v540_v2 = vld [vmem:[%s4038_s3 + $0x10] sm:$0xff]  ;;  %p383_p5 = scmp.lt.s32.totalorder %s3148_s13, 1  ;;  %s3269_s26 = sshll.u32 %s3152_s14, 3  ;;  %vm469_vm0 = vcmask 1043456  }
  0x11   : > { %v541_v3 = vpack.c.bf16 %v539_v1, %v538_v0  ;;  %v542_v4 = vpack.c.bf16 %v540_v2, %v540_v2  ;;  %s2366_s27 = sadd.s32 4294967294, %s3269_s26  ;;  %v444_v5 = vld [vmem:[%s4036_s1] sm:$0xff]  ;;  %v445_v6 = vld [vmem:[%s4036_s1 + $0x8] sm:$0xff]  ;;  %v446_v7 = vld [vmem:[%s4036_s1 + $0x10] sm:$0xff]  ;;  %s2460_s21 = sshll.u32 %s3152_s14, 6  ;;  %vm456_vm1 = vcmask 195584  }
  0x12   : > { %s4071_s13 = smov (!%p383_p5, %s3148_s13), 1  ;;  %v447_v8 = vpack.c.bf16 %v445_v6, %v444_v5  ;;  %v448_v9 = vpack.c.bf16 %v446_v7, %v446_v7  ;;  %p406_p6 = scmp.gt.s32.totalorder %s2366_s27, 0  ;;  %v652_v10 = vld [vmem:[%s4040_s5] sm:$0xff]  ;;  %v653_v11 = vld [vmem:[%s4040_s5 + $0x8] sm:$0xff]  ;;  %v654_v15 = vld [vmem:[%s4040_s5 + $0x10] sm:$0xff]  ;;  %vm788_vm2 = vcmask 48128  }
  0x13   : > { %2660 = vmatprep.subr.bf16.mxu1 %v541_v3  ;;  %s2456_s28 = sshll.u32 %s4071_s13, 7  ;;  %p2367_p7 = scmp.lt.s32.totalorder %s2366_s27, 4  ;;  %v569_v12 = vsel %vm469_vm0, %v542_v4, 0  ;;  %v655_v14 = vpack.c.bf16 %v653_v11, %v652_v10  ;;  %v656_v25 = vpack.c.bf16 %v654_v15, %v654_v15  ;;  %v2374_v48 = vld [vmem:[%s4037_s2] ss:$0 sm:$0xff]  ;;  %vm884_vm3 = vcmask 785408  }
  0x14   : > { %2661 = vmatpush3.bf16.msra.mxu1 %v541_v3  ;;  %2648 = vmatprep.subr.bf16.mxu0 %v447_v8  ;;  %s387_s11 = scalar_lea.vmem %s4035_s0, %s2456_s28  ;;  %s4073_s27 = smov (!%p406_p6, %s2366_s27), 0  ;;  %v471_v13 = vsel %vm469_vm0, %v448_v9, 0  ;;  %v3339_v58 = vld [vmem:[%s4039_s4] ss:$0 sm:$0xff]  ;;  %vm2131_vm4 = vcmask 97280   ;;  %vm2140_vm5 = vcmask 146432  }
  0x15   : > { %2865 = vmatprep.subr.msk.bf16.mxu1 %vm469_vm0, %v542_v4  ;;  %2649 = vmatpush3.bf16.msra.mxu0 %v447_v8  ;;  %s411_s12 = scalar_lea.vmem %s387_s11, %s2460_s21  ;;  %s4075_s27 = smov (!%p2367_p7, %s4073_s27), 4  ;;  %v665_v37 = vsel %vm469_vm0, %v656_v25, 0 }
  0x16   : > { %2864 = vmatprep.subr.msk.bf16.mxu0 %vm469_vm0, %v448_v9  ;;  %v412_v16 = vld [vmem:[%s411_s12] sm:$0xff]  ;;  %v413_v17 = vld [vmem:[%s411_s12 + $0x8] sm:$0xff]  ;;  %v414_v18 = vld [vmem:[%s411_s12 + $0x10] sm:$0xff]  ;;  %s2373_s23 = sshll.u32 %s4075_s27, 3  ;;  %s3166_s29 = smov 122  }
  0x17   : > { %v420_v19 = vpack.c.bf16 %v413_v17, %v412_v16  ;;  %v415_v20 = vld [vmem:[%s411_s12 + $0x18] sm:$0xff]  ;;  %v416_v21 = vld [vmem:[%s411_s12 + $0x20] sm:$0xff]  ;;  %v417_v22 = vld [vmem:[%s411_s12 + $0x28] sm:$0xff]  ;;  %s3301_s21 = scalar_lea.vmem %s387_s11, %s2373_s23  ;;  %p388_p8 = scmp.lt.s32.totalorder %s3152_s14, 1 }
  0x18   : > { %2663 = vmatpush3.bf16.msra.mxu1 %v569_v12  ;;  %v421_v23 = vpack.c.bf16 %v415_v20, %v414_v18  ;;  %v422_v24 = vpack.c.bf16 %v417_v22, %v416_v21  ;;  %v418_v26 = vld [vmem:[%s411_s12 + $0x30] sm:$0xff]  ;;  %v419_v27 = vld [vmem:[%s411_s12 + $0x38] sm:$0xff]  ;;  %v426_v28 = vld [vmem:[%s3301_s21] sm:$0xff]  ;;  %s3169_s27 = smov 6   ;;  %s3170_s24 = smov 12  }
  0x19   : > { %2651 = vmatpush3.bf16.msra.mxu0 %v471_v13  ;;  %2652 = vmatprep.mubr.msk.bf16.mxu0 %vm456_vm1, %v420_v19  ;;  %v427_v29 = vld [vmem:[%s3301_s21 + $0x8] sm:$0xff]  ;;  %v428_v30 = vld [vmem:[%s3301_s21 + $0x10] sm:$0xff]  ;;  %v429_v32 = vld [vmem:[%s3301_s21 + $0x18] sm:$0xff]  ;;  %v423_v38 = vpack.c.bf16 %v419_v27, %v418_v26  ;;  %s4077_s14 = smov (!%p388_p8, %s3152_s14), 1  ;;  %s3171_s20 = smov 18  }
  0x1a   : > { %2676 = vmatprep.subr.bf16.mxu0 %v655_v14  ;;  %v438_v31 = vpack.c.bf16 %v427_v29, %v426_v28  ;;  %v430_v33 = vld [vmem:[%s3301_s21 + $0x20] sm:$0xff]  ;;  %v431_v34 = vld [vmem:[%s3301_s21 + $0x28] sm:$0xff]  ;;  %v439_v35 = vpack.c.bf16 %v429_v32, %v428_v30  ;;  %v432_v39 = vld [vmem:[%s3301_s21 + $0x30] sm:$0xff]  ;;  %s2457_s12 = sshll.u32 %s4077_s14, 7  ;;  %s3167_s14 = smov 116  }
  0x1b   : > { %v440_v36 = vpack.c.bf16 %v431_v34, %v430_v33  ;;  %v433_v40 = vld [vmem:[%s3301_s21 + $0x38] sm:$0xff]  ;;  %v434_v41 = vld [vmem:[%s3301_s21 + $0x40] sm:$0xff]  ;;  %v435_v42 = vld [vmem:[%s3301_s21 + $0x48] sm:$0xff]  ;;  %s3445_s23 = scalar_lea.vmem %s4044_s9, %s2457_s12  ;;  %p396_p9 = scmp.lt.s32.totalorder %s3269_s26, 15 }
  0x1c   : > { %2653 = vmatmul.mubr.msk.bf16.vlgmr.msra.gmra.mrb[0].mxu0 %vm456_vm1, %v421_v23  ;;  %2664 = vmatprep.mubr.msk.bf16.mxu1 %vm456_vm1, %v438_v31  ;;  %v441_v43 = vpack.c.bf16 %v433_v40, %v432_v39  ;;  %v442_v44 = vpack.c.bf16 %v435_v42, %v434_v41  ;;  %v436_v45 = vld [vmem:[%s3301_s21 + $0x50] sm:$0xff]  ;;  %v437_v46 = vld [vmem:[%s3301_s21 + $0x58] sm:$0xff]  ;;  %s3168_s21 = smov 110   ;;  %s2363_s22 = sshll.u32 %s4071_s13, 4 }
  0x1d   : > { %2656 = vmatprep.mubr.msk.bf16.mxu0 %vm456_vm1, %v422_v24  ;;  %2677 = vmatpush3.bf16.msra.mxu0 %v655_v14  ;;  %v443_v47 = vpack.c.bf16 %v437_v46, %v436_v45  ;;  %s4079_s26 = smov (!%p396_p9, %s3269_s26), 15 }
  0x1e   : > { %2866 = vmatprep.subr.msk.bf16.mxu0 %vm469_vm0, %v656_v25  ;;  %2665 = vmatmul.mubr.msk.bf16.vlgmr.msra.gmra.mrb[0].mxu1 %vm456_vm1, %v439_v35 }
  0x1f   : > { %2668 = vmatprep.mubr.msk.bf16.mxu1 %vm456_vm1, %v440_v36 }
  0x21   : > { %2679 = vmatpush3.bf16.msra.mxu0 %v665_v37 }
  0x24   : > { %2657 = vmatmul.mubr.msk.bf16.gmra.mrb[4].mxu0 %vm456_vm1, %v423_v38 }
  0x25   : > { %2680 = vmatprep.mubr.msk.bf16.mxu0 %vm456_vm1, %v438_v31  ;;  %v2386_v31 = vld [vmem:[%s4041_s6] ss:$0 sm:$0xff] }
  0x26   : > { %2669 = vmatmul.mubr.msk.bf16.gmra.mrb[4].mxu1 %vm456_vm1, %v441_v43 }
  0x27   : > { %2672 = vmatprep.mubr.msk.bf16.mxu1 %vm456_vm1, %v442_v44 }
  0x2c   : > { %2681 = vmatmul.mubr.msk.bf16.vlgmr.msra.gmra.mrb[8].mxu0 %vm456_vm1, %v439_v35 }
  0x2d   : > { %2684 = vmatprep.mubr.msk.bf16.mxu0 %vm456_vm1, %v440_v36 }
  0x2e   : > { %2673 = vmatmul.mubr.msk.bf16.gmra.mrb[8].mxu1 %vm456_vm1, %v443_v47 }
  0x34   : > { %2685 = vmatmul.mubr.msk.bf16.gmra.mrb[12].mxu0 %vm456_vm1, %v441_v43 }
  0x35   : > { %2688 = vmatprep.mubr.msk.bf16.mxu0 %vm456_vm1, %v442_v44 }
  0x3c   : > { %2689 = vmatmul.mubr.msk.bf16.gmra.mrb[16].mxu0 %vm456_vm1, %v443_v47 }
  0xef   : > { %v2654_v49 = vpop.f32.mrb[0].mxu0 }
  0xf0   : > { %v516_v50 = vadd.f32 %v2654_v49, %v2374_v48  ;;  %v507_v51 = vpop.f32.mrb[1].mxu0 }
  0xf1   : > { %v508_v52 = vadd.f32 %v2374_v48, %v507_v51  ;;  %v2655_v53 = vpop.f32.mrb[2].mxu0  ;;  %v2666_v57 = vpop.f32.mrb[0].mxu1 }
  0xf2   : > { %v750_v54 = vmul.f32 0.4082483, %v516_v50  ;;  %v519_v55 = vadd.f32 %v2655_v53, %v2374_v48  ;;  %v510_v56 = vpop.f32.mrb[3].mxu0  ;;  %v605_v61 = vpop.f32.mrb[1].mxu1  ;;  %v614_v1 = vadd.f32 %v2666_v57, %v3339_v58 }
  0xf3   : > { %v748_v59 = vmul.f32 0.4082483, %v508_v52  ;;  %v511_v60 = vadd.f32 %v2374_v48, %v510_v56  ;;  %v2667_v63 = vpop.f32.mrb[2].mxu1  ;;  %v606_v5 = vadd.f32 %v3339_v58, %v605_v61 }
  0xf4   : > { %v751_v62 = vmul.f32 0.4082483, %v519_v55  ;;  %v617_v2 = vadd.f32 %v2667_v63, %v3339_v58  ;;  %v608_v3 = vpop.f32.mrb[3].mxu1 }
  0xf5   : > { %v749_v0 = vmul.f32 0.4082483, %v511_v60  ;;  %v609_v6 = vadd.f32 %v3339_v58, %v608_v3 }
  0xf6   : > { %v3343_v4 = vpack.c.bf16 %v751_v62, %v750_v54  ;;  %v3349_v9 = vpack.c.bf16 %v617_v2, %v614_v1 }
  0xf7   : > { %v3347_v7 = vpack.c.bf16 %v749_v0, %v748_v59  ;;  %v2658_v8 = vpop.f32.mrb[4].mxu0  ;;  %v3351_v12 = vpack.c.bf16 %v609_v6, %v606_v5 }
  0xf8   : > { %v532_v10 = vadd.f32 %v2658_v8, %v2374_v48  ;;  %v523_v11 = vpop.f32.mrb[5].mxu0  ;;  %1091 = vrot.lane.b32.xlu1 %v3349_v9, %s3166_s29  ;;  %v805_v43 = vsel %vm788_vm2, %v3349_v9, 0 }
  0xf9   : > { %2704 = vmatprep.mubr.msk.bf16.mxu1 %vm788_vm2, %v3347_v7  ;;  %v524_v13 = vadd.f32 %v2374_v48, %v523_v11  ;;  %v2659_v14 = vpop.f32.mrb[6].mxu0  ;;  %1089 = vrot.lane.b32.xlu0 %v3351_v12, %s3166_s29  ;;  %v802_v18 = vsel %vm788_vm2, %v3351_v12, 0  ;;  %v2670_v19 = vpop.f32.mrb[4].mxu1 }
  0xfa   : > { %v754_v15 = vmul.f32 0.4082483, %v532_v10  ;;  %v535_v16 = vadd.f32 %v2659_v14, %v2374_v48  ;;  %v526_v17 = vpop.f32.mrb[7].mxu0  ;;  %2867 = vmatprep.subr.msk.bf16.mxu1 %vm788_vm2, %v3351_v12  ;;  %v630_v22 = vadd.f32 %v2670_v19, %v3339_v58  ;;  %v621_v23 = vpop.f32.mrb[5].mxu1 }
  0xfb   : > { %v752_v20 = vmul.f32 0.4082483, %v524_v13  ;;  %v527_v21 = vadd.f32 %v2374_v48, %v526_v17  ;;  %2693 = vmatpush3.bf16.xpose.msra.mxu1 %v802_v18  ;;  %v622_v25 = vadd.f32 %v3339_v58, %v621_v23  ;;  %v2671_v26 = vpop.f32.mrb[6].mxu1  ;;  %v2462_v23 = vld [vmem:[%s3445_s23] sm:$0xff]  }
  0xfc   : > { %v755_v24 = vmul.f32 0.4082483, %v535_v16  ;;  %2868 = vmatprep.subr.msk.bf16.mxu1 %vm788_vm2, %v3349_v9  ;;  %v633_v28 = vadd.f32 %v2671_v26, %v3339_v58  ;;  %v624_v29 = vpop.f32.mrb[7].mxu1 }
  0xfd   : > { %v753_v27 = vmul.f32 0.4082483, %v527_v21  ;;  %v625_v32 = vadd.f32 %v3339_v58, %v624_v29 }
  0xfe   : > { %v3368_v30 = vpack.c.bf16 %v755_v24, %v754_v15  ;;  %v3376_v35 = vpack.c.bf16 %v633_v28, %v630_v22  ;;  %v2525_v22 = vld [vmem:[%s3445_s23 + $0x8] sm:$0xff]   ;;  %v2464_v28 = vunpack.c.h.bf16 %v2462_v23 }
  0xff   : > { %v3374_v33 = vpack.c.bf16 %v753_v27, %v752_v20  ;;  %v2682_v34 = vpop.f32.mrb[8].mxu0  ;;  %v3378_v38 = vpack.c.bf16 %v625_v32, %v622_v25  ;;  %v2467_v24 = vunpack.c.l.bf16 %v2525_v22  ;;  %v2463_v25 = vunpack.c.l.bf16 %v2462_v23 }
 0x100   : > { %v710_v36 = vadd.f32 %v2682_v34, %v2386_v31  ;;  %v701_v37 = vpop.f32.mrb[9].mxu0  ;;  %v811_v15 = vsel %vm788_vm2, %v3376_v35, 0  ;;  %v2468_v26 = vunpack.c.h.bf16 %v2525_v22 }
 0x101   : > { %v702_v39 = vadd.f32 %v2386_v31, %v701_v37  ;;  %v2683_v40 = vpop.f32.mrb[10].mxu0  ;;  %v2674_v44 = vpop.f32.mrb[8].mxu1 }
 0x102   : > { %v713_v41 = vadd.f32 %v2683_v40, %v2386_v31  ;;  %v704_v42 = vpop.f32.mrb[11].mxu0  ;;  %v646_v46 = vadd.f32 %v2674_v44, %v3339_v58  ;;  %v637_v47 = vpop.f32.mrb[9].mxu1 }
 0x103   : > { %v705_v45 = vadd.f32 %v2386_v31, %v704_v42  ;;  %2695 = vmatpush3.bf16.xpose.msra.mxu1 %v805_v43  ;;  %v638_v49 = vadd.f32 %v3339_v58, %v637_v47  ;;  %v2675_v50 = vpop.f32.mrb[10].mxu1 }
 0x104   : > { %v3383_v48 = vpack.c.bf16 %v713_v41, %v710_v36  ;;  %2869 = vmatprep.subr.msk.bf16.mxu1 %vm788_vm2, %v3378_v38  ;;  %v649_v52 = vadd.f32 %v2675_v50, %v3339_v58  ;;  %v640_v53 = vpop.f32.mrb[11].mxu1  ;;  %v2527_v50 = vld [vmem:[%s3445_s23 + $0x18] sm:$0xff]  }
 0x105   : > { %v3388_v51 = vpack.c.bf16 %v705_v45, %v702_v39  ;;  %v641_v54 = vadd.f32 %v3339_v58, %v640_v53  ;;  %v808_v58 = vsel %vm788_vm2, %v3378_v38, 0  ;;  %v2475_v53 = vunpack.c.l.bf16 %v2527_v50 }
 0x106   : > { %v3393_v56 = vpack.c.bf16 %v649_v52, %v646_v46 }
 0x107   : > { %v2686_v55 = vpop.f32.mrb[12].mxu0  ;;  %2712 = vmatprep.subr.bf16.mxu0 %v3388_v51  ;;  %v3396_v60 = vpack.c.bf16 %v641_v54, %v638_v49  ;;  %v2526_v49 = vld [vmem:[%s3445_s23 + $0x10] sm:$0xff]  }
 0x108   : > { %v726_v57 = vadd.f32 %v2686_v55, %v2386_v31  ;;  %v717_v59 = vpop.f32.mrb[13].mxu0  ;;  %2713 = vmatpush3.bf16.msra.mxu0 %v3388_v51  ;;  %v817_v20 = vsel %vm788_vm2, %v3393_v56, 0  ;;  %v2471_v52 = vunpack.c.l.bf16 %v2526_v49  ;;  %v2476_v55 = vunpack.c.h.bf16 %v2527_v50 }
 0x109   : > { %v718_v61 = vadd.f32 %v2386_v31, %v717_v59  ;;  %v2687_v62 = vpop.f32.mrb[14].mxu0  ;;  %2714 = vmatprep.subr.bf16.mxu0 %v3383_v48  ;;  %v814_v19 = vsel %vm788_vm2, %v3396_v60, 0 }
 0x10a   : > { %v729_v63 = vadd.f32 %v2687_v62, %v2386_v31  ;;  %v720_v0 = vpop.f32.mrb[15].mxu0 }
 0x10b   : > { %v721_v1 = vadd.f32 %v2386_v31, %v720_v0  ;;  %2697 = vmatpush3.bf16.xpose.msra.mxu1 %v808_v58 }
 0x10c   : > { %v3401_v2 = vpack.c.bf16 %v729_v63, %v726_v57  ;;  %2715 = vmatpush3.bf16.msra.mxu0 %v3383_v48  ;;  %2870 = vmatprep.subr.msk.bf16.mxu1 %vm788_vm2, %v3376_v35 }
 0x10d   : > { %v3406_v3 = vpack.c.bf16 %v721_v1, %v718_v61  ;;  %v2472_v61 = vunpack.c.h.bf16 %v2526_v49 }
 0x10f   : > { %v2690_v5 = vpop.f32.mrb[16].mxu0  ;;  %2716 = vmatprep.subr.bf16.mxu0 %v3406_v3 }
 0x110   : > { %v742_v6 = vadd.f32 %v2690_v5, %v2386_v31  ;;  %v733_v8 = vpop.f32.mrb[17].mxu0  ;;  %2717 = vmatpush3.bf16.msra.mxu0 %v3406_v3 }
 0x111   : > { %v734_v10 = vadd.f32 %v2386_v31, %v733_v8  ;;  %v2691_v11 = vpop.f32.mrb[18].mxu0  ;;  %2718 = vmatprep.subr.bf16.mxu0 %v3401_v2 }
 0x112   : > { %v745_v13 = vadd.f32 %v2691_v11, %v2386_v31  ;;  %v736_v14 = vpop.f32.mrb[19].mxu0 }
 0x113   : > { %v737_v16 = vadd.f32 %v2386_v31, %v736_v14  ;;  %2699 = vmatpush3.bf16.xpose.msra.mxu1 %v811_v15 }
 0x114   : > { %v3413_v17 = vpack.c.bf16 %v745_v13, %v742_v6  ;;  %2719 = vmatpush3.bf16.msra.mxu0 %v3401_v2  ;;  %2871 = vmatprep.subr.msk.bf16.mxu1 %vm788_vm2, %v3396_v60 }
 0x115   : > { %v3418_v18 = vpack.c.bf16 %v737_v16, %v734_v10 }
 0x117   : > { %2720 = vmatprep.subr.bf16.mxu0 %v3418_v18 }
 0x118   : > { %2721 = vmatpush3.bf16.msra.mxu0 %v3418_v18 }
 0x119   : > { %2722 = vmatprep.subr.bf16.mxu0 %v3413_v17 }
 0x11b   : > { %2701 = vmatpush3.bf16.xpose.msra.mxu1 %v814_v19 }
 0x11c   : > { %2723 = vmatpush3.bf16.msra.mxu0 %v3413_v17  ;;  %2872 = vmatprep.subr.msk.bf16.mxu1 %vm788_vm2, %v3393_v56 }
 0x123   : > { %2703 = vmatpush3.bf16.xpose.msra.mxu1 %v817_v20 }
 0x12a   : > { %2705 = vmatmul.mubr.msk.bf16.vlgmr.msra.gmra.mrb[12].mxu1 %vm788_vm2, %v3343_v4 }
 0x12b   : > { %2708 = vmatprep.mubr.msk.bf16.mxu1 %vm788_vm2, %v3374_v33 }
 0x132   : > { %2709 = vmatmul.mubr.msk.bf16.gmra.mrb[16].mxu1 %vm788_vm2, %v3368_v30 }
 0x16a   : > { %v1092_v5 = vpop.permute.xlu1 %1091 }
 0x16b   : > { %v3436_v21 = vpop.permute.xlu0 %1089 }
 0x16c   : > { %2873 = vmatprep.subr.msk.bf16.mxu0 %vm788_vm2, %v3436_v21 }
 0x1fd   : > { %v2706_v27 = vpop.f32.mrb[12].mxu1 }
 0x1fe   : > { %v3449_v29 = vadd.f32 %v2706_v27, %v2467_v24  ;;  %v853_v31 = vpop.f32.mrb[13].mxu1 }
 0x1ff   : > { %v854_v32 = vadd.f32 %v2463_v25, %v853_v31  ;;  %v2707_v34 = vpop.f32.mrb[14].mxu1  ;;  %v1114_v31 = vsel %vm788_vm2, %v3436_v21, 0 }
 0x200   : > { %v865_v36 = vadd.f32 %v2707_v34, %v2468_v26  ;;  %v856_v37 = vpop.f32.mrb[15].mxu1  ;;  %v891_v39 = vsel %vm884_vm3, %v3449_v29, -inf }
 0x201   : > { %v857_v40 = vadd.f32 %v2464_v28, %v856_v37  ;;  %892 = vmax.xlane.f32.xlu1 %v891_v39  ;;  %v885_v41 = vsel %vm884_vm3, %v854_v32, -inf }
 0x202   : > { %886 = vmax.xlane.f32.xlu0 %v885_v41  ;;  %v894_v42 = vsel %vm884_vm3, %v865_v36, -inf }
 0x203   : > { %v888_v43 = vsel %vm884_vm3, %v857_v40, -inf }
 0x205   : > { %895 = vmax.xlane.f32.xlu1 %v894_v42  ;;  %v2710_v44 = vpop.f32.mrb[16].mxu1 }
 0x206   : > { %889 = vmax.xlane.f32.xlu0 %v888_v43  ;;  %v869_v45 = vpop.f32.mrb[17].mxu1  ;;  %v3464_v57 = vadd.f32 %v2710_v44, %v2475_v53 }
 0x207   : > { %v2711_v46 = vpop.f32.mrb[18].mxu1  ;;  %v3462_v54 = vadd.f32 %v2471_v52, %v869_v45 }
 0x208   : > { %v872_v47 = vpop.f32.mrb[19].mxu1  ;;  %v3466_v59 = vadd.f32 %v2711_v46, %v2476_v55  ;;  %v903_v63 = vsel %vm884_vm3, %v3464_v57, -inf }
 0x209   : > { %v897_v62 = vsel %vm884_vm3, %v3462_v54, -inf  ;;  %v3472_v0 = vadd.f32 %v2472_v61, %v872_v47 }
 0x20a   : > { %v906_v58 = vsel %vm884_vm3, %v3466_v59, -inf }
 0x20b   : > { %v900_v1 = vsel %vm884_vm3, %v3472_v0, -inf }
 0x216   : > { %1095 = vrot.lane.b32.xlu1 %v3376_v35, %s3166_s29 }
 0x21c   : > { %1093 = vrot.lane.b32.xlu0 %v3378_v38, %s3166_s29 }
 0x23a   : > { %898 = vmax.xlane.f32.xlu1 %v897_v62 }
 0x23b   : > { %904 = vmax.xlane.f32.xlu0 %v903_v63 }
 0x23e   : > { %907 = vmax.xlane.f32.xlu1 %v906_v58 }
 0x242   : > { %901 = vmax.xlane.f32.xlu1 %v900_v1 }
 0x251   : > { %1097 = vrot.lane.b32.xlu0 %v3396_v60, %s3166_s29 }
 0x253   : > { %1099 = vrot.lane.b32.xlu1 %v3393_v56, %s3166_s29 }
 0x255   : > { %1075 = vrot.lane.b32.xlu0 %v3347_v7, %s3166_s29 }
 0x257   : > { %1077 = vrot.lane.b32.xlu1 %v3343_v4, %s3166_s29 }
 0x259   : > { %1079 = vrot.lane.b32.xlu0 %v3374_v33, %s3166_s29 }
 0x25b   : > { %1081 = vrot.lane.b32.xlu1 %v3368_v30, %s3166_s29 }
 0x25d   : > { %1278 = vrot.lane.b32.xlu0 %v3388_v51, %s3166_s29 }
 0x25f   : > { %1280 = vrot.lane.b32.xlu1 %v3383_v48, %s3166_s29 }
 0x261   : > { %1286 = vrot.lane.b32.xlu0 %v3418_v18, %s3166_s29 }
 0x263   : > { %1282 = vrot.lane.b32.xlu1 %v3406_v3, %s3166_s29 }
 0x265   : > { %1414 = vrot.lane.b32.xlu0 %v3351_v12, %s3167_s14 }
 0x267   : > { %1284 = vrot.lane.b32.xlu1 %v3401_v2, %s3166_s29 }
 0x269   : > { %1416 = vrot.lane.b32.xlu0 %v3349_v9, %s3167_s14 }
 0x26b   : > { %1288 = vrot.lane.b32.xlu1 %v3413_v17, %s3166_s29 }
 0x28e   : > { %v893_v6 = vpop.xlane.xlu1 %892 }
 0x28f   : > { %v887_v8 = vpop.xlane.xlu0 %886  ;;  %v911_v11 = vsub.f32 %v3449_v29, %v893_v6 }
 0x290   : > { %v909_v10 = vsub.f32 %v854_v32, %v887_v8  ;;  %v1117_v32 = vsel %vm788_vm2, %v1092_v5, 0 }
 0x291   : > { %v921_v20 = vmul.f32 1.442695, %v911_v11 }
 0x292   : > { %v917_v13 = vmul.f32 1.442695, %v909_v10  ;;  %v896_v14 = vpop.xlane.xlu1 %895 }
 0x293   : > { %v912_v15 = vsub.f32 %v865_v36, %v896_v14  ;;  %v890_v16 = vpop.xlane.xlu0 %889 }
 0x294   : > { %v910_v19 = vsub.f32 %v857_v40, %v890_v16  ;;  %2998 = vpow2.f32 %v917_v13 }
 0x295   : > { %v923_v22 = vmul.f32 1.442695, %v912_v15 }
 0x296   : > { %v919_v23 = vmul.f32 1.442695, %v910_v19  ;;  %v1096_v37 = vpop.permute.xlu1 %1095 }
 0x297   : > { %3000 = vpow2.f32 %v923_v22  ;;  %v1094_v34 = vpop.permute.xlu0 %1093  ;;  %v1123_v39 = vsel %vm788_vm2, %v1096_v37, 0 }
 0x298   : > { %3002 = vpow2.f32 %v919_v23  ;;  %v1120_v36 = vsel %vm788_vm2, %v1094_v34, 0 }
 0x299   : > { %3004 = vpow2.f32 %v921_v20 }
 0x29e   : > { %v3507_v24 = vpop.eup %2998 }
 0x2a1   : > { %v3509_v25 = vpop.eup %3000 }
 0x2a2   : > { %v3511_v26 = vpop.eup %3002 }
 0x2a3   : > { %v3513_v27 = vpop.eup %3004  ;;  %v957_v28 = vpack.c.bf16 %v3511_v26, %v3507_v24 }
 0x2a4   : > { %v958_v29 = vpack.c.bf16 %v3509_v25, %v3513_v27 }
 0x2a5   : > { %2724 = vmatprep.mubr.msk.bf16.mxu0 %vm884_vm3, %v957_v28 }
 0x2a6   : > { %2725 = vmatmul.mubr.msk.bf16.vlgmr.msra.gmra.mrb[20].mxu0 %vm884_vm3, %v958_v29 }
 0x2a7   : > { %2733 = vmatpush3.bf16.xpose.msra.mxu0 %v1114_v31 }
 0x2a8   : > { %2874 = vmatprep.subr.msk.bf16.mxu0 %vm788_vm2, %v1092_v5 }
 0x2af   : > { %2735 = vmatpush3.bf16.xpose.msra.mxu0 %v1117_v32 }
 0x2b0   : > { %2875 = vmatprep.subr.msk.bf16.mxu0 %vm788_vm2, %v1094_v34  ;;  %v2529_v34 = vld [vmem:[%s3445_s23 + $0x28] sm:$0xff]  }
 0x2b7   : > { %2737 = vmatpush3.bf16.xpose.msra.mxu0 %v1120_v36 }
 0x2b8   : > { %2876 = vmatprep.subr.msk.bf16.mxu0 %vm788_vm2, %v1096_v37  ;;  %v2528_v37 = vld [vmem:[%s3445_s23 + $0x20] sm:$0xff]  }
 0x2bf   : > { %2739 = vmatpush3.bf16.xpose.msra.mxu0 %v1123_v39  ;;  %v2483_v39 = vunpack.c.l.bf16 %v2529_v34 }
 0x2c7   : > { %v899_v40 = vpop.xlane.xlu1 %898 }
 0x2c8   : > { %v905_v21 = vpop.xlane.xlu0 %904  ;;  %v913_v41 = vsub.f32 %v3462_v54, %v899_v40  ;;  %v2479_v40 = vunpack.c.l.bf16 %v2528_v37 }
 0x2c9   : > { %v915_v45 = vsub.f32 %v3464_v57, %v905_v21 }
 0x2ca   : > { %v925_v47 = vmul.f32 1.442695, %v913_v41  ;;  %v2480_v41 = vunpack.c.h.bf16 %v2528_v37 }
 0x2cb   : > { %v908_v42 = vpop.xlane.xlu1 %907  ;;  %v929_v55 = vmul.f32 1.442695, %v915_v45 }
 0x2cc   : > { %v916_v43 = vsub.f32 %v3466_v59, %v908_v42  ;;  %v1098_v44 = vpop.permute.xlu0 %1097  ;;  %3006 = vpow2.f32 %v925_v47 }
 0x2cd   : > { %2877 = vmatprep.subr.msk.bf16.mxu0 %vm788_vm2, %v1098_v44  ;;  %v1126_v46 = vsel %vm788_vm2, %v1098_v44, 0 }
 0x2ce   : > { %2741 = vmatpush3.bf16.xpose.msra.mxu0 %v1126_v46  ;;  %v931_v49 = vmul.f32 1.442695, %v916_v43  ;;  %v2484_v46 = vunpack.c.h.bf16 %v2529_v34 }
 0x2cf   : > { %v902_v50 = vpop.xlane.xlu1 %901 }
 0x2d0   : > { %v914_v52 = vsub.f32 %v3472_v0, %v902_v50  ;;  %v1076_v53 = vpop.permute.xlu0 %1075  ;;  %3008 = vpow2.f32 %v931_v49 }
 0x2d2   : > { %v927_v54 = vmul.f32 1.442695, %v914_v52 }
 0x2d3   : > { %v1100_v61 = vpop.permute.xlu1 %1099 }
 0x2d4   : > { %3010 = vpow2.f32 %v927_v54  ;;  %2878 = vmatprep.subr.msk.bf16.mxu0 %vm788_vm2, %v1100_v61  ;;  %v1080_v57 = vpop.permute.xlu0 %1079  ;;  %v1129_v59 = vsel %vm788_vm2, %v1100_v61, 0 }
 0x2d5   : > { %3012 = vpow2.f32 %v929_v55 }
 0x2d6   : > { %2743 = vmatpush3.bf16.xpose.msra.mxu0 %v1129_v59  ;;  %v3537_v0 = vpop.eup %3006 }
 0x2d7   : > { %v1078_v62 = vpop.permute.xlu1 %1077 }
 0x2d8   : > { %v1279_v63 = vpop.permute.xlu0 %1278 }
 0x2d9   : > { %2752 = vmatprep.subr.bf16.mxu1 %v1279_v63 }
 0x2da   : > { %2753 = vmatpush3.bf16.msra.mxu1 %v1279_v63  ;;  %v3539_v1 = vpop.eup %3008  ;;  %v2531_v63 = vld [vmem:[%s3445_s23 + $0x38] sm:$0xff]  }
 0x2db   : > { %v1082_v58 = vpop.permute.xlu1 %1081 }
 0x2dc   : > { %v1287_v15 = vpop.permute.xlu0 %1286 }
 0x2de   : > { %v3541_v5 = vpop.eup %3010 }
 0x2df   : > { %v3543_v6 = vpop.eup %3012  ;;  %v1281_v8 = vpop.permute.xlu1 %1280  ;;  %v959_v10 = vpack.c.bf16 %v3541_v5, %v3537_v0 }
 0x2e0   : > { %2754 = vmatprep.subr.bf16.mxu1 %v1281_v8  ;;  %v960_v11 = vpack.c.bf16 %v3539_v1, %v3543_v6  ;;  %v3554_v19 = vpop.permute.xlu0 %1414 }
 0x2e1   : > { %2728 = vmatprep.mubr.msk.bf16.mxu0 %vm884_vm3, %v959_v10  ;;  %2755 = vmatpush3.bf16.msra.mxu1 %v1281_v8  ;;  %v2530_v8 = vld [vmem:[%s3445_s23 + $0x30] sm:$0xff]  }
 0x2e2   : > { %2729 = vmatmul.mubr.msk.bf16.gmra.mrb[24].mxu0 %vm884_vm3, %v960_v11  ;;  %v2487_v11 = vunpack.c.l.bf16 %v2530_v8 }
 0x2e3   : > { %v1283_v13 = vpop.permute.xlu1 %1282  ;;  %2744 = vmatprep.mubr.msk.bf16.mxu0 %vm788_vm2, %v1076_v53 }
 0x2e4   : > { %2756 = vmatprep.subr.bf16.mxu1 %v1283_v13 }
 0x2e5   : > { %2757 = vmatpush3.bf16.msra.mxu1 %v1283_v13  ;;  %v2488_v13 = vunpack.c.h.bf16 %v2530_v8 }
 0x2e7   : > { %v1285_v14 = vpop.permute.xlu1 %1284 }
 0x2e8   : > { %2758 = vmatprep.subr.bf16.mxu1 %v1285_v14 }
 0x2e9   : > { %2759 = vmatpush3.bf16.msra.mxu1 %v1285_v14 }
 0x2ea   : > { %2745 = vmatmul.mubr.msk.bf16.vlgmr.msra.gmra.mrb[28].mxu0 %vm788_vm2, %v1078_v62  ;;  %2760 = vmatprep.subr.bf16.mxu1 %v1287_v15 }
 0x2eb   : > { %2748 = vmatprep.mubr.msk.bf16.mxu0 %vm788_vm2, %v1080_v57  ;;  %v1289_v16 = vpop.permute.xlu1 %1288 }
 0x2ed   : > { %2761 = vmatpush3.bf16.msra.mxu1 %v1287_v15  ;;  %v2492_v15 = vunpack.c.h.bf16 %v2531_v63 }
 0x2ee   : > { %2762 = vmatprep.subr.bf16.mxu1 %v1289_v16 }
 0x2f1   : > { %2763 = vmatpush3.bf16.msra.mxu1 %v1289_v16 }
 0x2f2   : > { %2749 = vmatmul.mubr.msk.bf16.gmra.mrb[32].mxu0 %vm788_vm2, %v1082_v58  ;;  %2879 = vmatprep.subr.msk.bf16.mxu1 %vm788_vm2, %v3554_v19  ;;  %v2491_v58 = vunpack.c.l.bf16 %v2531_v63 }
 0x379   : > { %v3559_v20 = vpop.f32.mrb[20].mxu0 }
 0x37a   : > { %4046 = vst [vmem:[#allocation2_spill] sm:$0xff] %v3559_v20  ;;  %v3561_v22 = vpop.f32.mrb[21].mxu0 }
 0x37b   : > { %v3563_v23 = vpop.f32.mrb[22].mxu0 }
 0x37c   : > { %4047 = vst [vmem:[#allocation3_spill] sm:$0xff] %v3563_v23  ;;  %v3565_v28 = vpop.f32.mrb[23].mxu0 }
 0x37d   : > { %4048 = vst [vmem:[#allocation4_spill] sm:$0xff] %v3565_v28 }
 0x3b5   : > { %v3567_v29 = vpop.f32.mrb[24].mxu0 }
 0x3b6   : > { %4049 = vst [vmem:[#allocation5_spill] sm:$0xff] %v3567_v29  ;;  %v3569_v31 = vpop.f32.mrb[25].mxu0 }
 0x3b7   : > { %4050 = vst [vmem:[#allocation6_spill] sm:$0xff] %v3569_v31  ;;  %v3571_v32 = vpop.f32.mrb[26].mxu0 }
 0x3b8   : > { %4051 = vst [vmem:[#allocation7_spill] sm:$0xff] %v3571_v32  ;;  %v3574_v36 = vpop.f32.mrb[27].mxu0  ;;  %v2538_v32 = vld [vmem:[%s3445_s23 + $0x70] sm:$0xff]  }
 0x3b9   : > { %4052 = vst [vmem:[#allocation8_spill] sm:$0xff] %v3574_v36 }
 0x3bd   : > { %v2746_v21 = vpop.f32.mrb[28].mxu0 }
 0x3be   : > { %v3577_v42 = vadd.f32 %v2746_v21, %v2483_v39  ;;  %v1165_v43 = vpop.f32.mrb[29].mxu0 }
 0x3bf   : > { %v2747_v44 = vpop.f32.mrb[30].mxu0  ;;  %v1166_v45 = vadd.f32 %v2479_v40, %v1165_v43 }
 0x3c0   : > { %v1168_v47 = vpop.f32.mrb[31].mxu0  ;;  %v1202_v49 = vsel %vm884_vm3, %v3577_v42, -inf  ;;  %v1177_v53 = vadd.f32 %v2747_v44, %v2484_v46 }
 0x3c1   : > { %v1169_v50 = vadd.f32 %v2480_v41, %v1168_v47  ;;  %1203 = vmax.xlane.f32.xlu0 %v1202_v49  ;;  %v1196_v55 = vsel %vm884_vm3, %v1166_v45, -inf  ;;  %v1417_v41 = vpop.permute.xlu0 %1416 }
 0x3c2   : > { %v1205_v62 = vsel %vm884_vm3, %v1177_v53, -inf }
 0x3c3   : > { %v1199_v52 = vsel %vm884_vm3, %v1169_v50, -inf }
 0x3c4   : > { %1200 = vmax.xlane.f32.xlu1 %v1199_v52 }
 0x3c5   : > { %1197 = vmax.xlane.f32.xlu0 %v1196_v55  ;;  %v2750_v54 = vpop.f32.mrb[32].mxu0 }
 0x3c6   : > { %v1181_v61 = vpop.f32.mrb[33].mxu0  ;;  %v3590_v10 = vadd.f32 %v2750_v54, %v2491_v58  ;;  %v1442_v58 = vsel %vm788_vm2, %v1417_v41, 0 }
 0x3c7   : > { %v2751_v57 = vpop.f32.mrb[34].mxu0  ;;  %v3592_v14 = vadd.f32 %v2487_v11, %v1181_v61 }
 0x3c8   : > { %v1184_v59 = vpop.f32.mrb[35].mxu0  ;;  %v1214_v16 = vsel %vm884_vm3, %v3590_v10, -inf  ;;  %v3598_v37 = vadd.f32 %v2751_v57, %v2492_v15 }
 0x3c9   : > { %1206 = vmax.xlane.f32.xlu0 %v1205_v62  ;;  %v3596_v34 = vadd.f32 %v2488_v13, %v1184_v59  ;;  %v1208_v39 = vsel %vm884_vm3, %v3592_v14, -inf }
 0x3ca   : > { %v1217_v21 = vsel %vm884_vm3, %v3598_v37, -inf }
 0x3cb   : > { %v1211_v40 = vsel %vm884_vm3, %v3596_v34, -inf }
 0x3d5   : > { %1418 = vrot.lane.b32.xlu1 %v3378_v38, %s3167_s14 }
 0x3df   : > { %1420 = vrot.lane.b32.xlu0 %v3376_v35, %s3167_s14 }
 0x3f9   : > { %1215 = vmax.xlane.f32.xlu1 %v1214_v16 }
 0x3fd   : > { %1209 = vmax.xlane.f32.xlu1 %v1208_v39 }
 0x3fe   : > { %1212 = vmax.xlane.f32.xlu0 %v1211_v40 }
 0x401   : > { %1218 = vmax.xlane.f32.xlu1 %v1217_v21 }
 0x412   : > { %1424 = vrot.lane.b32.xlu1 %v3393_v56, %s3167_s14 }
 0x414   : > { %1422 = vrot.lane.b32.xlu0 %v3396_v60, %s3167_s14 }
 0x416   : > { %1408 = vrot.lane.b32.xlu1 %v3343_v4, %s3167_s14 }
 0x418   : > { %1406 = vrot.lane.b32.xlu0 %v3347_v7, %s3167_s14 }
 0x41a   : > { %1412 = vrot.lane.b32.xlu1 %v3368_v30, %s3167_s14 }
 0x41c   : > { %1410 = vrot.lane.b32.xlu0 %v3374_v33, %s3167_s14 }
 0x41e   : > { %1599 = vrot.lane.b32.xlu1 %v3383_v48, %s3167_s14 }
 0x420   : > { %1597 = vrot.lane.b32.xlu0 %v3388_v51, %s3167_s14 }
 0x422   : > { %1601 = vrot.lane.b32.xlu1 %v3406_v3, %s3167_s14 }
 0x424   : > { %1605 = vrot.lane.b32.xlu0 %v3418_v18, %s3167_s14 }
 0x426   : > { %1603 = vrot.lane.b32.xlu1 %v3401_v2, %s3167_s14 }
 0x428   : > { %1733 = vrot.lane.b32.xlu0 %v3351_v12, %s3168_s21 }
 0x42a   : > { %1607 = vrot.lane.b32.xlu1 %v3413_v17, %s3167_s14 }
 0x42c   : > { %1735 = vrot.lane.b32.xlu0 %v3349_v9, %s3168_s21 }
 0x44e   : > { %v1204_v43 = vpop.xlane.xlu0 %1203 }
 0x44f   : > { %v1222_v46 = vsub.f32 %v3577_v42, %v1204_v43 }
 0x451   : > { %v1201_v44 = vpop.xlane.xlu1 %1200  ;;  %v1232_v61 = vmul.f32 1.442695, %v1222_v46 }
 0x452   : > { %v1221_v47 = vsub.f32 %v1169_v50, %v1201_v44  ;;  %v1198_v49 = vpop.xlane.xlu0 %1197 }
 0x453   : > { %v1220_v52 = vsub.f32 %v1166_v45, %v1198_v49 }
 0x454   : > { %v1230_v55 = vmul.f32 1.442695, %v1221_v47 }
 0x455   : > { %v1228_v54 = vmul.f32 1.442695, %v1220_v52  ;;  %v1419_v8 = vpop.permute.xlu1 %1418 }
 0x456   : > { %3014 = vpow2.f32 %v1230_v55  ;;  %v1207_v57 = vpop.xlane.xlu0 %1206  ;;  %v1445_v11 = vsel %vm788_vm2, %v1419_v8, 0 }
 0x457   : > { %3016 = vpow2.f32 %v1228_v54  ;;  %v1223_v12 = vsub.f32 %v1177_v53, %v1207_v57  ;;  %v1439_v53 = vsel %vm788_vm2, %v3554_v19, 0 }
 0x458   : > { %3018 = vpow2.f32 %v1232_v61 }
 0x459   : > { %v1234_v59 = vmul.f32 1.442695, %v1223_v12 }
 0x45a   : > { %v1421_v13 = vpop.permute.xlu0 %1420 }
 0x45b   : > { %3020 = vpow2.f32 %v1234_v59  ;;  %v1448_v15 = vsel %vm788_vm2, %v1421_v13, 0 }
 0x460   : > { %v3635_v62 = vpop.eup %3014 }
 0x461   : > { %v3637_v9 = vpop.eup %3016 }
 0x462   : > { %v1268_v42 = vpack.c.bf16 %v3635_v62, %v3637_v9  ;;  %v3641_v50 = vpop.eup %3018 }
 0x464   : > { %2764 = vmatprep.mubr.msk.bf16.mxu1 %vm884_vm3, %v1268_v42 }
 0x465   : > { %v3644_v45 = vpop.eup %3020 }
 0x466   : > { %v1269_v63 = vpack.c.bf16 %v3644_v45, %v3641_v50 }
 0x468   : > { %2765 = vmatmul.mubr.msk.bf16.vlgmr.msra.gmra.mrb[20].mxu1 %vm884_vm3, %v1269_v63 }
 0x469   : > { %2773 = vmatpush3.bf16.xpose.msra.mxu1 %v1439_v53 }
 0x46a   : > { %2880 = vmatprep.subr.msk.bf16.mxu1 %vm788_vm2, %v1417_v41 }
 0x471   : > { %2775 = vmatpush3.bf16.xpose.msra.mxu1 %v1442_v58 }
 0x472   : > { %2881 = vmatprep.subr.msk.bf16.mxu1 %vm788_vm2, %v1419_v8 }
 0x479   : > { %2777 = vmatpush3.bf16.xpose.msra.mxu1 %v1445_v11 }
 0x47a   : > { %2882 = vmatprep.subr.msk.bf16.mxu1 %vm788_vm2, %v1421_v13 }
 0x481   : > { %2779 = vmatpush3.bf16.xpose.msra.mxu1 %v1448_v15 }
 0x486   : > { %v1216_v16 = vpop.xlane.xlu1 %1215 }
 0x487   : > { %v1226_v19 = vsub.f32 %v3590_v10, %v1216_v16 }
 0x489   : > { %v1240_v44 = vmul.f32 1.442695, %v1226_v19 }
 0x48a   : > { %v1210_v39 = vpop.xlane.xlu1 %1209 }
 0x48b   : > { %v1224_v40 = vsub.f32 %v3592_v14, %v1210_v39  ;;  %v1213_v21 = vpop.xlane.xlu0 %1212 }
 0x48c   : > { %v1225_v41 = vsub.f32 %v3596_v34, %v1213_v21 }
 0x48d   : > { %v1236_v43 = vmul.f32 1.442695, %v1224_v40 }
 0x48e   : > { %v1238_v46 = vmul.f32 1.442695, %v1225_v41  ;;  %v1219_v47 = vpop.xlane.xlu1 %1218 }
 0x48f   : > { %3022 = vpow2.f32 %v1236_v43  ;;  %v1227_v49 = vsub.f32 %v3598_v37, %v1219_v47  ;;  %v1423_v52 = vpop.permute.xlu0 %1422 }
 0x490   : > { %3024 = vpow2.f32 %v1238_v46  ;;  %v1451_v55 = vsel %vm788_vm2, %v1423_v52, 0  ;;  %2883 = vmatprep.subr.msk.bf16.mxu1 %vm788_vm2, %v1423_v52 }
 0x491   : > { %v1242_v10 = vmul.f32 1.442695, %v1227_v49  ;;  %2781 = vmatpush3.bf16.xpose.msra.mxu1 %v1451_v55  ;;  %3026 = vpow2.f32 %v1240_v44  ;;  %v2533_v49 = vld [vmem:[%s3445_s23 + $0x48] sm:$0xff]   ;;  %v2532_v55 = vld [vmem:[%s3445_s23 + $0x40] sm:$0xff]  }
 0x492   : > { %v1425_v14 = vpop.permute.xlu1 %1424 }
 0x493   : > { %3028 = vpow2.f32 %v1242_v10  ;;  %2884 = vmatprep.subr.msk.bf16.mxu1 %vm788_vm2, %v1425_v14  ;;  %v1407_v34 = vpop.permute.xlu0 %1406  ;;  %v1454_v57 = vsel %vm788_vm2, %v1425_v14, 0  ;;  %v2499_v10 = vunpack.c.l.bf16 %v2533_v49  ;;  %v2495_v14 = vunpack.c.l.bf16 %v2532_v55 }
 0x496   : > { %v1409_v54 = vpop.permute.xlu1 %1408 }
 0x497   : > { %v1411_v61 = vpop.permute.xlu0 %1410 }
 0x499   : > { %v3665_v12 = vpop.eup %3022  ;;  %2783 = vmatpush3.bf16.xpose.msra.mxu1 %v1454_v57 }
 0x49a   : > { %v3667_v37 = vpop.eup %3024  ;;  %v1413_v59 = vpop.permute.xlu1 %1412 }
 0x49b   : > { %v1598_v42 = vpop.permute.xlu0 %1597  ;;  %v1270_v63 = vpack.c.bf16 %v3667_v37, %v3665_v12  ;;  %v3671_v53 = vpop.eup %3026 }
 0x49c   : > { %2792 = vmatprep.subr.bf16.mxu0 %v1598_v42 }
 0x49d   : > { %v3673_v58 = vpop.eup %3028  ;;  %2768 = vmatprep.mubr.msk.bf16.mxu1 %vm884_vm3, %v1270_v63  ;;  %2793 = vmatpush3.bf16.msra.mxu0 %v1598_v42  ;;  %v2500_v63 = vunpack.c.h.bf16 %v2533_v49 }
 0x49e   : > { %v1600_v8 = vpop.permute.xlu1 %1599  ;;  %v1271_v11 = vpack.c.bf16 %v3673_v58, %v3671_v53 }
 0x49f   : > { %2794 = vmatprep.subr.bf16.mxu0 %v1600_v8  ;;  %v1606_v16 = vpop.permute.xlu0 %1605 }
 0x4a0   : > { %2769 = vmatmul.mubr.msk.bf16.gmra.mrb[24].mxu1 %vm884_vm3, %v1271_v11 }
 0x4a1   : > { %2784 = vmatprep.mubr.msk.bf16.mxu1 %vm788_vm2, %v1407_v34  ;;  %2795 = vmatpush3.bf16.msra.mxu0 %v1600_v8 }
 0x4a2   : > { %v1602_v13 = vpop.permute.xlu1 %1601 }
 0x4a3   : > { %2796 = vmatprep.subr.bf16.mxu0 %v1602_v13  ;;  %v3683_v39 = vpop.permute.xlu0 %1733 }
 0x4a5   : > { %2797 = vmatpush3.bf16.msra.mxu0 %v1602_v13 }
 0x4a6   : > { %v1604_v15 = vpop.permute.xlu1 %1603 }
 0x4a7   : > { %2798 = vmatprep.subr.bf16.mxu0 %v1604_v15 }
 0x4a8   : > { %2785 = vmatmul.mubr.msk.bf16.vlgmr.msra.gmra.mrb[28].mxu1 %vm788_vm2, %v1409_v54  ;;  %v2496_v54 = vunpack.c.h.bf16 %v2532_v55 }
 0x4a9   : > { %2788 = vmatprep.mubr.msk.bf16.mxu1 %vm788_vm2, %v1411_v61  ;;  %2799 = vmatpush3.bf16.msra.mxu0 %v1604_v15 }
 0x4aa   : > { %2800 = vmatprep.subr.bf16.mxu0 %v1606_v16  ;;  %v1608_v19 = vpop.permute.xlu1 %1607 }
 0x4ad   : > { %2801 = vmatpush3.bf16.msra.mxu0 %v1606_v16 }
 0x4ae   : > { %2802 = vmatprep.subr.bf16.mxu0 %v1608_v19 }
 0x4b0   : > { %2789 = vmatmul.mubr.msk.bf16.gmra.mrb[32].mxu1 %vm788_vm2, %v1413_v59 }
 0x4b1   : > { %2803 = vmatpush3.bf16.msra.mxu0 %v1608_v19 }
 0x4b2   : > { %2885 = vmatprep.subr.msk.bf16.mxu0 %vm788_vm2, %v3683_v39 }
 0x53b   : > { %v3687_v40 = vpop.f32.mrb[20].mxu1 }
 0x53c   : > { %v3689_v21 = vpop.f32.mrb[21].mxu1 }
 0x53d   : > { %v3691_v41 = vpop.f32.mrb[22].mxu1 }
 0x53e   : > { %v3693_v43 = vpop.f32.mrb[23].mxu1 }
 0x573   : > { %v3695_v44 = vpop.f32.mrb[24].mxu1 }
 0x574   : > { %v3697_v46 = vpop.f32.mrb[25].mxu1 }
 0x575   : > { %v3699_v47 = vpop.f32.mrb[26].mxu1 }
 0x576   : > { %v3702_v52 = vpop.f32.mrb[27].mxu1 }
 0x57b   : > { %v2786_v34 = vpop.f32.mrb[28].mxu1 }
 0x57c   : > { %v1499_v61 = vadd.f32 %v2786_v34, %v2499_v10  ;;  %v1490_v57 = vpop.f32.mrb[29].mxu1 }
 0x57d   : > { %v2787_v59 = vpop.f32.mrb[30].mxu1  ;;  %v1491_v42 = vadd.f32 %v2495_v14, %v1490_v57  ;;  %v2535_v14 = vld [vmem:[%s3445_s23 + $0x58] sm:$0xff]   ;;  %v2534_v57 = vld [vmem:[%s3445_s23 + $0x50] sm:$0xff]  }
 0x57e   : > { %v1493_v8 = vpop.f32.mrb[31].mxu1  ;;  %v1527_v11 = vsel %vm884_vm3, %v1499_v61, -inf  ;;  %v1502_v16 = vadd.f32 %v2787_v59, %v2500_v63  ;;  %v2503_v63 = vunpack.c.l.bf16 %v2534_v57 }
 0x57f   : > { %v1494_v13 = vadd.f32 %v2496_v54, %v1493_v8  ;;  %1528 = vmax.xlane.f32.xlu0 %v1527_v11  ;;  %v1521_v19 = vsel %vm884_vm3, %v1491_v42, -inf  ;;  %v2507_v54 = vunpack.c.l.bf16 %v2535_v14  ;;  %v2504_v8 = vunpack.c.h.bf16 %v2534_v57 }
 0x580   : > { %v1530_v49 = vsel %vm884_vm3, %v1502_v16, -inf }
 0x581   : > { %v1524_v15 = vsel %vm884_vm3, %v1494_v13, -inf }
 0x582   : > { %1525 = vmax.xlane.f32.xlu1 %v1524_v15  ;;  %v2508_v15 = vunpack.c.h.bf16 %v2535_v14 }
 0x583   : > { %1522 = vmax.xlane.f32.xlu0 %v1521_v19  ;;  %v2790_v55 = vpop.f32.mrb[32].mxu1 }
 0x584   : > { %v1506_v10 = vpop.f32.mrb[33].mxu1  ;;  %v3715_v59 = vadd.f32 %v2790_v55, %v2507_v54 }
 0x585   : > { %v2791_v34 = vpop.f32.mrb[34].mxu1  ;;  %v3717_v11 = vadd.f32 %v2503_v63, %v1506_v10 }
 0x586   : > { %v1509_v29 = vpop.f32.mrb[35].mxu1  ;;  %v1539_v19 = vsel %vm884_vm3, %v3715_v59, -inf }
 0x587   : > { %1531 = vmax.xlane.f32.xlu0 %v1530_v49  ;;  %v3721_v49 = vadd.f32 %v2504_v8, %v1509_v29 }
 0x589   : > { %v1536_v55 = vsel %vm884_vm3, %v3721_v49, -inf }
 0x593   : > { %1737 = vrot.lane.b32.xlu1 %v3378_v38, %s3168_s21  ;;  %v3723_v38 = vadd.f32 %v2791_v34, %v2508_v15 }
 0x595   : > { %v1542_v10 = vsel %vm884_vm3, %v3723_v38, -inf }
 0x59d   : > { %1739 = vrot.lane.b32.xlu0 %v3376_v35, %s3168_s21  ;;  %v1533_v35 = vsel %vm884_vm3, %v3717_v11, -inf }
 0x5b7   : > { %1540 = vmax.xlane.f32.xlu1 %v1539_v19 }
 0x5bb   : > { %1534 = vmax.xlane.f32.xlu1 %v1533_v35 }
 0x5bc   : > { %1537 = vmax.xlane.f32.xlu0 %v1536_v55 }
 0x5bf   : > { %1543 = vmax.xlane.f32.xlu1 %v1542_v10 }
 0x5d0   : > { %1743 = vrot.lane.b32.xlu1 %v3393_v56, %s3168_s21 }
 0x5d2   : > { %1741 = vrot.lane.b32.xlu0 %v3396_v60, %s3168_s21 }
 0x5d4   : > { %1727 = vrot.lane.b32.xlu1 %v3343_v4, %s3168_s21  ;;  %v1736_v4 = vpop.permute.xlu0 %1735 }
 0x5d5   : > { %v1761_v8 = vsel %vm788_vm2, %v1736_v4, 0 }
 0x5d6   : > { %1725 = vrot.lane.b32.xlu0 %v3347_v7, %s3168_s21 }
 0x5d8   : > { %1731 = vrot.lane.b32.xlu1 %v3368_v30, %s3168_s21 }
 0x5da   : > { %1729 = vrot.lane.b32.xlu0 %v3374_v33, %s3168_s21 }
 0x5dc   : > { %1918 = vrot.lane.b32.xlu1 %v3383_v48, %s3168_s21 }
 0x5de   : > { %1916 = vrot.lane.b32.xlu0 %v3388_v51, %s3168_s21 }
 0x5e0   : > { %1922 = vrot.lane.b32.xlu1 %v3401_v2, %s3168_s21 }
 0x5e2   : > { %1920 = vrot.lane.b32.xlu0 %v3406_v3, %s3168_s21 }
 0x60c   : > { %v1529_v7 = vpop.xlane.xlu0 %1528 }
 0x60d   : > { %v1547_v60 = vsub.f32 %v1499_v61, %v1529_v7 }
 0x60f   : > { %v1526_v56 = vpop.xlane.xlu1 %1525  ;;  %v1557_v54 = vmul.f32 1.442695, %v1547_v60 }
 0x610   : > { %v1546_v30 = vsub.f32 %v1494_v13, %v1526_v56  ;;  %v1523_v29 = vpop.xlane.xlu0 %1522 }
 0x611   : > { %v1545_v34 = vsub.f32 %v1491_v42, %v1523_v29 }
 0x612   : > { %v1555_v33 = vmul.f32 1.442695, %v1546_v30 }
 0x613   : > { %v1553_v14 = vmul.f32 1.442695, %v1545_v34  ;;  %v1738_v15 = vpop.permute.xlu1 %1737 }
 0x614   : > { %3030 = vpow2.f32 %v1555_v33  ;;  %v1532_v48 = vpop.xlane.xlu0 %1531  ;;  %v1764_v19 = vsel %vm788_vm2, %v1738_v15, 0 }
 0x615   : > { %3032 = vpow2.f32 %v1553_v14  ;;  %v1548_v51 = vsub.f32 %v1502_v16, %v1532_v48  ;;  %v1758_v16 = vsel %vm788_vm2, %v3683_v39, 0 }
 0x616   : > { %3034 = vpow2.f32 %v1557_v54 }
 0x617   : > { %v1559_v57 = vmul.f32 1.442695, %v1548_v51 }
 0x618   : > { %v1740_v35 = vpop.permute.xlu0 %1739 }
 0x619   : > { %3036 = vpow2.f32 %v1559_v57  ;;  %v1767_v55 = vsel %vm788_vm2, %v1740_v35, 0 }
 0x61e   : > { %v3751_v2 = vpop.eup %3030 }
 0x61f   : > { %v3753_v3 = vpop.eup %3032 }
 0x620   : > { %v1593_v61 = vpack.c.bf16 %v3751_v2, %v3753_v3  ;;  %v3757_v13 = vpop.eup %3034 }
 0x622   : > { %2804 = vmatprep.mubr.msk.bf16.mxu0 %vm884_vm3, %v1593_v61 }
 0x623   : > { %v3760_v42 = vpop.eup %3036 }
 0x624   : > { %v1594_v63 = vpack.c.bf16 %v3760_v42, %v3757_v13 }
 0x626   : > { %2805 = vmatmul.mubr.msk.bf16.vlgmr.msra.gmra.mrb[36].mxu0 %vm884_vm3, %v1594_v63 }
 0x627   : > { %2813 = vmatpush3.bf16.xpose.msra.mxu0 %v1758_v16 }
 0x628   : > { %2886 = vmatprep.subr.msk.bf16.mxu0 %vm788_vm2, %v1736_v4 }
 0x62f   : > { %2815 = vmatpush3.bf16.xpose.msra.mxu0 %v1761_v8 }
 0x630   : > { %2887 = vmatprep.subr.msk.bf16.mxu0 %vm788_vm2, %v1738_v15 }
 0x637   : > { %2817 = vmatpush3.bf16.xpose.msra.mxu0 %v1764_v19 }
 0x638   : > { %2888 = vmatprep.subr.msk.bf16.mxu0 %vm788_vm2, %v1740_v35 }
 0x63f   : > { %2819 = vmatpush3.bf16.xpose.msra.mxu0 %v1767_v55 }
 0x644   : > { %v1541_v39 = vpop.xlane.xlu1 %1540 }
 0x645   : > { %v1551_v10 = vsub.f32 %v3715_v59, %v1541_v39 }
 0x647   : > { %v1565_v29 = vmul.f32 1.442695, %v1551_v10 }
 0x648   : > { %v1535_v7 = vpop.xlane.xlu1 %1534 }
 0x649   : > { %v1549_v56 = vsub.f32 %v3717_v11, %v1535_v7  ;;  %v1538_v4 = vpop.xlane.xlu0 %1537 }
 0x64a   : > { %v1550_v60 = vsub.f32 %v3721_v49, %v1538_v4 }
 0x64b   : > { %v1561_v30 = vmul.f32 1.442695, %v1549_v56 }
 0x64c   : > { %v1563_v34 = vmul.f32 1.442695, %v1550_v60  ;;  %v1544_v33 = vpop.xlane.xlu1 %1543 }
 0x64d   : > { %3038 = vpow2.f32 %v1561_v30  ;;  %v1552_v14 = vsub.f32 %v3723_v38, %v1544_v33  ;;  %v1742_v54 = vpop.permute.xlu0 %1741 }
 0x64e   : > { %3040 = vpow2.f32 %v1563_v34  ;;  %v1770_v48 = vsel %vm788_vm2, %v1742_v54, 0  ;;  %2889 = vmatprep.subr.msk.bf16.mxu0 %vm788_vm2, %v1742_v54 }
 0x64f   : > { %v1567_v59 = vmul.f32 1.442695, %v1552_v14  ;;  %2821 = vmatpush3.bf16.xpose.msra.mxu0 %v1770_v48  ;;  %3042 = vpow2.f32 %v1565_v29  ;;  %v2537_v14 = vld [vmem:[%s3445_s23 + $0x68] sm:$0xff]   ;;  %v2536_v48 = vld [vmem:[%s3445_s23 + $0x60] sm:$0xff]  }
 0x650   : > { %v1744_v11 = vpop.permute.xlu1 %1743 }
 0x651   : > { %3044 = vpow2.f32 %v1567_v59  ;;  %2890 = vmatprep.subr.msk.bf16.mxu0 %vm788_vm2, %v1744_v11  ;;  %v1726_v49 = vpop.permute.xlu0 %1725  ;;  %v1773_v61 = vsel %vm788_vm2, %v1744_v11, 0  ;;  %v2515_v59 = vunpack.c.l.bf16 %v2537_v14  ;;  %v2511_v11 = vunpack.c.l.bf16 %v2536_v48 }
 0x654   : > { %v1728_v51 = vpop.permute.xlu1 %1727 }
 0x655   : > { %v1730_v57 = vpop.permute.xlu0 %1729 }
 0x657   : > { %v3781_v63 = vpop.eup %3038  ;;  %2823 = vmatpush3.bf16.xpose.msra.mxu0 %v1773_v61 }
 0x658   : > { %v3783_v38 = vpop.eup %3040  ;;  %v1732_v16 = vpop.permute.xlu1 %1731 }
 0x659   : > { %v1917_v8 = vpop.permute.xlu0 %1916  ;;  %v1595_v15 = vpack.c.bf16 %v3783_v38, %v3781_v63  ;;  %v3787_v19 = vpop.eup %3042 }
 0x65a   : > { %2832 = vmatprep.subr.bf16.mxu1 %v1917_v8 }
 0x65b   : > { %v3789_v35 = vpop.eup %3044  ;;  %2808 = vmatprep.mubr.msk.bf16.mxu0 %vm884_vm3, %v1595_v15  ;;  %2833 = vmatpush3.bf16.msra.mxu1 %v1917_v8  ;;  %v2539_v8 = vld [vmem:[%s3445_s23 + $0x78] sm:$0xff]   ;;  %s399_s23 = sadd.s32 %s2363_s22, %s4079_s26 }
 0x65c   : > { %v1919_v55 = vpop.permute.xlu1 %1918  ;;  %v1596_v39 = vpack.c.bf16 %v3789_v35, %v3787_v19  ;;  %v2523_v36 = vunpack.c.l.bf16 %v2539_v8  ;;  %s2364_s14 = sshll.u32 %s399_s23, 3 }
 0x65d   : > { %2834 = vmatprep.subr.bf16.mxu1 %v1919_v55  ;;  %v1921_v10 = vpop.permute.xlu0 %1920  ;;  %s401_s28 = scalar_lea.vmem %s4045_s10, %s2364_s14 }
 0x65e   : > { %2809 = vmatmul.mubr.msk.bf16.gmra.mrb[40].mxu0 %vm884_vm3, %v1596_v39 }
 0x65f   : > { %2824 = vmatprep.mubr.msk.bf16.mxu0 %vm788_vm2, %v1726_v49  ;;  %2835 = vmatpush3.bf16.msra.mxu1 %v1919_v55  ;;  %v2516_v55 = vunpack.c.h.bf16 %v2537_v14  ;;  %v2524_v14 = vunpack.c.h.bf16 %v2539_v8 }
 0x660   : > { %2836 = vmatprep.subr.bf16.mxu1 %v1921_v10  ;;  %v1923_v7 = vpop.permute.xlu1 %1922 }
 0x663   : > { %2837 = vmatpush3.bf16.msra.mxu1 %v1921_v10 }
 0x664   : > { %2838 = vmatprep.subr.bf16.mxu1 %v1923_v7 }
 0x666   : > { %2825 = vmatmul.mubr.msk.bf16.vlgmr.msra.gmra.mrb[44].mxu0 %vm788_vm2, %v1728_v51  ;;  %v2512_v51 = vunpack.c.h.bf16 %v2536_v48 }
 0x667   : > { %2828 = vmatprep.mubr.msk.bf16.mxu0 %vm788_vm2, %v1730_v57  ;;  %2839 = vmatpush3.bf16.msra.mxu1 %v1923_v7 }
 0x66e   : > { %2829 = vmatmul.mubr.msk.bf16.gmra.mrb[48].mxu0 %vm788_vm2, %v1732_v16 }
 0x6f9   : > { %v3799_v56 = vpop.f32.mrb[36].mxu0 }
 0x6fa   : > { %v3801_v4 = vpop.f32.mrb[37].mxu0 }
 0x6fb   : > { %v3803_v60 = vpop.f32.mrb[38].mxu0 }
 0x6fc   : > { %v3805_v30 = vpop.f32.mrb[39].mxu0 }
 0x731   : > { %v3807_v29 = vpop.f32.mrb[40].mxu0 }
 0x732   : > { %v3809_v34 = vpop.f32.mrb[41].mxu0 }
 0x733   : > { %v3811_v33 = vpop.f32.mrb[42].mxu0 }
 0x734   : > { %v3814_v54 = vpop.f32.mrb[43].mxu0 }
 0x739   : > { %v2826_v49 = vpop.f32.mrb[44].mxu0 }
 0x73a   : > { %v3817_v57 = vadd.f32 %v2826_v49, %v2515_v59  ;;  %v1809_v61 = vpop.f32.mrb[45].mxu0  ;;  %v2519_v49 = vunpack.c.l.bf16 %v2538_v32 }
 0x73b   : > { %v2827_v16 = vpop.f32.mrb[46].mxu0  ;;  %v3820_v15 = vadd.f32 %v2511_v11, %v1809_v61 }
 0x73c   : > { %v1812_v39 = vpop.f32.mrb[47].mxu0  ;;  %v1846_v10 = vsel %vm884_vm3, %v3817_v57, -inf  ;;  %v3829_v59 = vadd.f32 %v2827_v16, %v2516_v55 }
 0x73d   : > { %v3824_v7 = vadd.f32 %v2512_v51, %v1812_v39  ;;  %1847 = vmax.xlane.f32.xlu0 %v1846_v10  ;;  %v1840_v11 = vsel %vm884_vm3, %v3820_v15, -inf  ;;  %v2520_v10 = vunpack.c.h.bf16 %v2538_v32 }
 0x73e   : > { %v1849_v16 = vsel %vm884_vm3, %v3829_v59, -inf }
 0x73f   : > { %v1843_v48 = vsel %vm884_vm3, %v3824_v7, -inf }
 0x740   : > { %1844 = vmax.xlane.f32.xlu1 %v1843_v48 }
 0x741   : > { %1841 = vmax.xlane.f32.xlu0 %v1840_v11  ;;  %v2830_v61 = vpop.f32.mrb[48].mxu0  ;;  %v1247_v11 = vsel %vm884_vm3, %v3635_v62, 0.0  ;;  %v1259_v62 = vsel %vm884_vm3, %v3667_v37, 0.0  ;;  %v1581_v37 = vsel %vm884_vm3, %v3781_v63, 0.0 }
 0x742   : > { %v3833_v31 = vadd.f32 %v2830_v61, %v2523_v36  ;;  %v1825_v51 = vpop.f32.mrb[49].mxu0 }
 0x743   : > { %v2831_v39 = vpop.f32.mrb[50].mxu0  ;;  %v3835_v20 = vadd.f32 %v2519_v49, %v1825_v51  ;;  %v1250_v49 = vsel %vm884_vm3, %v3641_v50, 0.0  ;;  %v1575_v50 = vsel %vm884_vm3, %v3757_v13, 0.0 }
 0x744   : > { %v3837_v23 = vadd.f32 %v2831_v39, %v2524_v14  ;;  %v1828_v28 = vpop.f32.mrb[51].mxu0  ;;  %v1858_v55 = vsel %vm884_vm3, %v3833_v31, -inf  ;;  %v1572_v14 = vsel %vm884_vm3, %v3751_v2, 0.0  ;;  %v1256_v2 = vsel %vm884_vm3, %v3665_v12, 0.0 }
 0x745   : > { %1850 = vmax.xlane.f32.xlu0 %v1849_v16  ;;  %1859 = vmax.xlane.f32.xlu1 %v1858_v55  ;;  %v3843_v8 = vadd.f32 %v2520_v10, %v1828_v28  ;;  %v1852_v32 = vsel %vm884_vm3, %v3835_v20, -inf  ;;  %v1244_v28 = vsel %vm884_vm3, %v3637_v9, 0.0  ;;  %v1569_v9 = vsel %vm884_vm3, %v3753_v3, 0.0 }
 0x746   : > { %v1861_v36 = vsel %vm884_vm3, %v3837_v23, -inf  ;;  %v1584_v3 = vsel %vm884_vm3, %v3783_v38, 0.0 }
 0x747   : > { %v1855_v48 = vsel %vm884_vm3, %v3843_v8, -inf }
 0x749   : > { %1862 = vmax.xlane.f32.xlu1 %v1861_v36  ;;  %1853 = vmax.xlane.f32.xlu0 %v1852_v32 }
 0x74d   : > { %1856 = vmax.xlane.f32.xlu1 %v1855_v48 }
 0x75e   : > { %1926 = vrot.lane.b32.xlu1 %v3413_v17, %s3168_s21  ;;  %v1253_v17 = vsel %vm884_vm3, %v3644_v45, 0.0  ;;  %v1265_v45 = vsel %vm884_vm3, %v3673_v58, 0.0 }
 0x75f   : > { %1924 = vrot.lane.b32.xlu0 %v3418_v18, %s3168_s21  ;;  %v1578_v18 = vsel %vm884_vm3, %v3760_v42, 0.0  ;;  %v1262_v42 = vsel %vm884_vm3, %v3671_v53, 0.0 }
 0x77e   : > { %1245 = vadd.xlane.f32.xlu0 %v1244_v28 }
 0x782   : > { %1248 = vadd.xlane.f32.xlu1 %v1247_v11  ;;  %1251 = vadd.xlane.f32.xlu0 %v1250_v49 }
 0x786   : > { %1573 = vadd.xlane.f32.xlu1 %v1572_v14  ;;  %1254 = vadd.xlane.f32.xlu0 %v1253_v17 }
 0x78a   : > { %1579 = vadd.xlane.f32.xlu1 %v1578_v18  ;;  %1570 = vadd.xlane.f32.xlu0 %v1569_v9 }
 0x78e   : > { %1260 = vadd.xlane.f32.xlu1 %v1259_v62  ;;  %1576 = vadd.xlane.f32.xlu0 %v1575_v50 }
 0x792   : > { %1266 = vadd.xlane.f32.xlu1 %v1265_v45  ;;  %1257 = vadd.xlane.f32.xlu0 %v1256_v2  ;;  %v1587_v2 = vsel %vm884_vm3, %v3787_v19, 0.0  ;;  %v1590_v19 = vsel %vm884_vm3, %v3789_v35, 0.0  ;;  %v939_v35 = vsel %vm884_vm3, %v3513_v27, 0.0  ;;  %v948_v27 = vsel %vm884_vm3, %v3541_v5, 0.0 }
 0x796   : > { %1585 = vadd.xlane.f32.xlu1 %v1584_v3  ;;  %1263 = vadd.xlane.f32.xlu0 %v1262_v42 }
 0x79a   : > { %1582 = vadd.xlane.f32.xlu0 %v1581_v37 }
 0x7ca   : > { %v1848_v13 = vpop.xlane.xlu0 %1847 }
 0x7cb   : > { %v1866_v58 = vsub.f32 %v3817_v57, %v1848_v13 }
 0x7cd   : > { %v1876_v61 = vmul.f32 1.442695, %v1866_v58  ;;  %v1845_v51 = vpop.xlane.xlu1 %1844 }
 0x7ce   : > { %v1865_v12 = vsub.f32 %v3824_v7, %v1845_v51  ;;  %v1842_v39 = vpop.xlane.xlu0 %1841 }
 0x7cf   : > { %3046 = vpow2.f32 %v1876_v61  ;;  %v1864_v38 = vsub.f32 %v3820_v15, %v1842_v39 }
 0x7d0   : > { %v1874_v10 = vmul.f32 1.442695, %v1865_v12 }
 0x7d1   : > { %v1872_v16 = vmul.f32 1.442695, %v1864_v38 }
 0x7d2   : > { %3048 = vpow2.f32 %v1874_v10  ;;  %v1860_v53 = vpop.xlane.xlu1 %1859  ;;  %v1851_v55 = vpop.xlane.xlu0 %1850 }
 0x7d3   : > { %3050 = vpow2.f32 %v1872_v16  ;;  %v1867_v63 = vsub.f32 %v3829_v59, %v1851_v55  ;;  %v1870_v36 = vsub.f32 %v3833_v31, %v1860_v53  ;;  %v933_v53 = vsel %vm884_vm3, %v3507_v24, 0.0 }
 0x7d4   : > { %v942_v24 = vsel %vm884_vm3, %v3509_v25, 0.0 }
 0x7d5   : > { %v1878_v32 = vmul.f32 1.442695, %v1867_v63  ;;  %v1884_v15 = vmul.f32 1.442695, %v1870_v36  ;;  %v936_v63 = vsel %vm884_vm3, %v3511_v26, 0.0  ;;  %v945_v36 = vsel %vm884_vm3, %v3537_v0, 0.0 }
 0x7d6   : > { %v1863_v57 = vpop.xlane.xlu1 %1862  ;;  %v1854_v48 = vpop.xlane.xlu0 %1853  ;;  %v954_v26 = vsel %vm884_vm3, %v3539_v1, 0.0 }
 0x7d7   : > { %v1871_v28 = vsub.f32 %v3837_v23, %v1863_v57  ;;  %v1868_v7 = vsub.f32 %v3835_v20, %v1854_v48  ;;  %3052 = vpow2.f32 %v1878_v32  ;;  %v951_v32 = vsel %vm884_vm3, %v3543_v6, 0.0 }
 0x7d9   : > { %v3047_v11 = vpop.eup %3046  ;;  %v1880_v49 = vmul.f32 1.442695, %v1868_v7  ;;  %v1886_v14 = vmul.f32 1.442695, %v1871_v28 }
 0x7da   : > { %v1857_v17 = vpop.xlane.xlu1 %1856  ;;  %v1925_v18 = vpop.permute.xlu0 %1924  ;;  %v1894_v9 = vsel %vm884_vm3, %v3047_v11, 0.0 }
 0x7db   : > { %v1869_v59 = vsub.f32 %v3843_v8, %v1857_v17  ;;  %1895 = vadd.xlane.f32.xlu0 %v1894_v9  ;;  %2840 = vmatprep.subr.bf16.mxu1 %v1925_v18  ;;  %3054 = vpow2.f32 %v1880_v49 }
 0x7dc   : > { %v3049_v31 = vpop.eup %3048  ;;  %2841 = vmatpush3.bf16.msra.mxu1 %v1925_v18  ;;  %3056 = vpow2.f32 %v1884_v15 }
 0x7dd   : > { %v3051_v62 = vpop.eup %3050  ;;  %v1882_v23 = vmul.f32 1.442695, %v1869_v59  ;;  %3058 = vpow2.f32 %v1886_v14  ;;  %v1891_v58 = vsel %vm884_vm3, %v3049_v31, 0.0 }
 0x7de   : > { %v1927_v20 = vpop.permute.xlu1 %1926  ;;  %v1888_v50 = vsel %vm884_vm3, %v3051_v62, 0.0  ;;  %v1912_v45 = vpack.c.bf16 %v3049_v31, %v3051_v62 }
 0x7df   : > { %3060 = vpow2.f32 %v1882_v23  ;;  %1889 = vadd.xlane.f32.xlu0 %v1888_v50  ;;  %2842 = vmatprep.subr.bf16.mxu1 %v1927_v20 }
 0x7e0   : > { %2843 = vmatpush3.bf16.msra.mxu1 %v1927_v20  ;;  %2844 = vmatprep.mubr.msk.bf16.mxu1 %vm884_vm3, %v1912_v45 }
 0x7e1   : > { %v3053_v8 = vpop.eup %3052 }
 0x7e2   : > { %v1913_v3 = vpack.c.bf16 %v3053_v8, %v3047_v11  ;;  %v1897_v42 = vsel %vm884_vm3, %v3053_v8, 0.0 }
 0x7e3   : > { %1588 = vadd.xlane.f32.xlu0 %v1587_v2  ;;  %1898 = vadd.xlane.f32.xlu1 %v1897_v42 }
 0x7e4   : > { %2845 = vmatmul.mubr.msk.bf16.vlgmr.msra.gmra.mrb[36].mxu1 %vm884_vm3, %v1913_v3 }
 0x7e5   : > { %v3055_v37 = vpop.eup %3054 }
 0x7e6   : > { %v3057_v13 = vpop.eup %3056  ;;  %v1900_v61 = vsel %vm884_vm3, %v3055_v37, 0.0 }
 0x7e7   : > { %v3059_v51 = vpop.eup %3058  ;;  %1892 = vadd.xlane.f32.xlu1 %v1891_v58  ;;  %1901 = vadd.xlane.f32.xlu0 %v1900_v61  ;;  %v1906_v38 = vsel %vm884_vm3, %v3057_v13, 0.0 }
 0x7e8   : > { %v1915_v10 = vpack.c.bf16 %v3059_v51, %v3057_v13  ;;  %v1909_v55 = vsel %vm884_vm3, %v3059_v51, 0.0 }
 0x7e9   : > { %v3061_v12 = vpop.eup %3060 }
 0x7ea   : > { %v1914_v39 = vpack.c.bf16 %v3061_v12, %v3055_v37  ;;  %v1903_v16 = vsel %vm884_vm3, %v3061_v12, 0.0 }
 0x7eb   : > { %1591 = vadd.xlane.f32.xlu1 %v1590_v19  ;;  %1907 = vadd.xlane.f32.xlu0 %v1906_v38 }
 0x7ec   : > { %2848 = vmatprep.mubr.msk.bf16.mxu1 %vm884_vm3, %v1914_v39 }
 0x7ed   : > { %2849 = vmatmul.mubr.msk.bf16.gmra.mrb[40].mxu1 %vm884_vm3, %v1915_v10 }
 0x7ef   : > { %1904 = vadd.xlane.f32.xlu1 %v1903_v16  ;;  %934 = vadd.xlane.f32.xlu0 %v933_v53 }
 0x7f3   : > { %1910 = vadd.xlane.f32.xlu1 %v1909_v55  ;;  %940 = vadd.xlane.f32.xlu0 %v939_v35 }
 0x7f7   : > { %937 = vadd.xlane.f32.xlu1 %v936_v63  ;;  %946 = vadd.xlane.f32.xlu0 %v945_v36 }
 0x7fb   : > { %943 = vadd.xlane.f32.xlu1 %v942_v24  ;;  %952 = vadd.xlane.f32.xlu0 %v951_v32 }
 0x7ff   : > { %949 = vadd.xlane.f32.xlu1 %v948_v27 }
 0x803   : > { %955 = vadd.xlane.f32.xlu1 %v954_v26 }
 0x80b   : > { %v1246_v57 = vpop.xlane.xlu0 %1245 }
 0x80c   : > { %3062 = vrcp.f32 %v1246_v57 }
 0x80f   : > { %v1249_v0 = vpop.xlane.xlu1 %1248  ;;  %v1252_v48 = vpop.xlane.xlu0 %1251 }
 0x810   : > { %3064 = vrcp.f32 %v1249_v0 }
 0x811   : > { %3066 = vrcp.f32 %v1252_v48 }
 0x813   : > { %v1574_v25 = vpop.xlane.xlu1 %1573  ;;  %v1255_v28 = vpop.xlane.xlu0 %1254 }
 0x814   : > { %3068 = vrcp.f32 %v1255_v28 }
 0x815   : > { %3070 = vrcp.f32 %v1574_v25 }
 0x816   : > { %v3063_v11 = vpop.eup %3062 }
 0x817   : > { %v1580_v6 = vpop.xlane.xlu1 %1579  ;;  %v1571_v7 = vpop.xlane.xlu0 %1570  ;;  %v1381_v1 = vmul.f32 %v3063_v11, %v3689_v21 }
 0x818   : > { %3072 = vrcp.f32 %v1571_v7 }
 0x819   : > { %3074 = vrcp.f32 %v1580_v6 }
 0x81a   : > { %v3065_v5 = vpop.eup %3064 }
 0x81b   : > { %v1261_v15 = vpop.xlane.xlu1 %1260  ;;  %v1577_v49 = vpop.xlane.xlu0 %1576  ;;  %v1382_v14 = vmul.f32 %v3065_v5, %v3693_v43 }
 0x81c   : > { %v3067_v17 = vpop.eup %3066  ;;  %3076 = vrcp.f32 %v1577_v49 }
 0x81d   : > { %v2938_v18 = vpack.i.bf16 %v1382_v14, %v1381_v1  ;;  %3078 = vrcp.f32 %v1261_v15  ;;  %v1383_v62 = vmul.f32 %v3067_v17, %v3687_v40 }
 0x81e   : > { %v3069_v9 = vpop.eup %3068 }
 0x81f   : > { %v1267_v59 = vpop.xlane.xlu1 %1266  ;;  %2939 = vrot.lane.b32.xlu0 %v2938_v18, %s3169_s27  ;;  %v1258_v31 = vpop.xlane.xlu0 %1257  ;;  %v1384_v23 = vmul.f32 %v3069_v9, %v3691_v41 }
 0x820   : > { %v3071_v20 = vpop.eup %3070  ;;  %3080 = vrcp.f32 %v1258_v31 }
 0x821   : > { %v2943_v50 = vpack.i.bf16 %v1384_v23, %v1383_v62  ;;  %3082 = vrcp.f32 %v1267_v59  ;;  %v1701_v2 = vmul.f32 %v3071_v20, %v3805_v30 }
 0x822   : > { %v3073_v21 = vpop.eup %3072 }
 0x823   : > { %v1586_v43 = vpop.xlane.xlu1 %1585  ;;  %v1264_v45 = vpop.xlane.xlu0 %1263  ;;  %2944 = vrot.lane.b32.xlu1 %v2943_v50, %s3169_s27  ;;  %v1700_v8 = vmul.f32 %v3073_v21, %v3801_v4 }
 0x824   : > { %v3075_v3 = vpop.eup %3074  ;;  %3084 = vrcp.f32 %v1264_v45 }
 0x825   : > { %3086 = vrcp.f32 %v1586_v43  ;;  %v2948_v42 = vpack.i.bf16 %v1701_v2, %v1700_v8  ;;  %v1703_v13 = vmul.f32 %v3075_v3, %v3803_v60 }
 0x826   : > { %v3077_v40 = vpop.eup %3076 }
 0x827   : > { %v1583_v37 = vpop.xlane.xlu0 %1582  ;;  %2949 = vrot.lane.b32.xlu1 %v2948_v42, %s3170_s24  ;;  %v1702_v41 = vmul.f32 %v3077_v40, %v3799_v56  ;;  %v3079_v58 = vpop.eup %3078 }
 0x828   : > { %3088 = vrcp.f32 %v1583_v37  ;;  %v1386_v30 = vmul.f32 %v3079_v58, %v3702_v52  ;;  %v2153_v52 = vld [vmem:[%s4042_s7] sm:$0xff] }
 0x829   : > { %v2953_v61 = vpack.i.bf16 %v1703_v13, %v1702_v41 }
 0x82a   : > { %v3081_v51 = vpop.eup %3080 }
 0x82b   : > { %2954 = vrot.lane.b32.xlu1 %v2953_v61, %s3170_s24  ;;  %v1385_v4 = vmul.f32 %v3081_v51, %v3697_v46  ;;  %v3083_v12 = vpop.eup %3082 }
 0x82c   : > { %v1388_v56 = vmul.f32 %v3083_v12, %v3699_v47  ;;  %v2155_v47 = vld [vmem:[%s4042_s7 + $0x10] sm:$0xff] }
 0x82d   : > { %v2958_v39 = vpack.i.bf16 %v1386_v30, %v1385_v4 }
 0x82e   : > { %v3085_v19 = vpop.eup %3084 }
 0x82f   : > { %v3087_v38 = vpop.eup %3086  ;;  %2959 = vrot.lane.b32.xlu0 %v2958_v39, %s3169_s27  ;;  %v1387_v10 = vmul.f32 %v3085_v19, %v3695_v44  ;;  %v2154_v44 = vld [vmem:[%s4042_s7 + $0x8] sm:$0xff] }
 0x830   : > { %v3944_v55 = vmul.f32 %v3087_v38, %v3814_v54  ;;  %v2157_v54 = vpack.c.bf16 %v2155_v47, %v2155_v47 }
 0x831   : > { %v2963_v16 = vpack.i.bf16 %v1388_v56, %v1387_v10 }
 0x832   : > { %v3089_v60 = vpop.eup %3088  ;;  %v2178_v11 = vsel %vm469_vm0, %v2157_v54, 0 }
 0x833   : > { %v3941_v53 = vmul.f32 %v3089_v60, %v3809_v34  ;;  %2964 = vrot.lane.b32.xlu1 %v2963_v16, %s3169_s27  ;;  %v2156_v34 = vpack.c.bf16 %v2154_v44, %v2153_v52 }
 0x835   : > { %v2978_v46 = vpack.i.bf16 %v3944_v55, %v3941_v53  ;;  %2852 = vmatprep.subr.bf16.mxu1 %v2156_v34 }
 0x836   : > { %2853 = vmatpush3.bf16.msra.mxu1 %v2156_v34 }
 0x837   : > { %2891 = vmatprep.subr.msk.bf16.mxu1 %vm469_vm0, %v2157_v54 }
 0x83a   : > { %2855 = vmatpush3.bf16.msra.mxu1 %v2178_v11 }
 0x868   : > { %v1896_v35 = vpop.xlane.xlu0 %1895 }
 0x86c   : > { %v1890_v63 = vpop.xlane.xlu0 %1889 }
 0x870   : > { %v1899_v36 = vpop.xlane.xlu1 %1898  ;;  %v1589_v24 = vpop.xlane.xlu0 %1588 }
 0x871   : > { %3090 = vrcp.f32 %v1589_v24 }
 0x874   : > { %v1893_v32 = vpop.xlane.xlu1 %1892  ;;  %v1902_v28 = vpop.xlane.xlu0 %1901 }
 0x878   : > { %v1592_v27 = vpop.xlane.xlu1 %1591  ;;  %v1908_v7 = vpop.xlane.xlu0 %1907 }
 0x879   : > { %3092 = vrcp.f32 %v1592_v27 }
 0x87a   : > { %3094 = vrcp.f32 %v1896_v35 }
 0x87b   : > { %v3091_v26 = vpop.eup %3090  ;;  %3096 = vrcp.f32 %v1890_v63 }
 0x87c   : > { %v1706_v0 = vmul.f32 %v3091_v26, %v3807_v29  ;;  %3098 = vrcp.f32 %v1899_v36  ;;  %v1905_v6 = vpop.xlane.xlu1 %1904  ;;  %v935_v12 = vpop.xlane.xlu0 %934 }
 0x87d   : > { %3100 = vrcp.f32 %v1893_v32  ;;  %v4053_v32 = vld [vmem:[#allocation4_spill] sm:$0xff] }
 0x87e   : > { %3102 = vrcp.f32 %v1902_v28 }
 0x87f   : > { %3104 = vrcp.f32 %v1908_v7 }
 0x880   : > { %v1911_v5 = vpop.xlane.xlu1 %1910  ;;  %v941_v19 = vpop.xlane.xlu0 %940 }
 0x881   : > { %3106 = vrcp.f32 %v1911_v5 }
 0x882   : > { %3108 = vrcp.f32 %v1905_v6 }
 0x883   : > { %v3093_v57 = vpop.eup %3092  ;;  %3110 = vrcp.f32 %v935_v12 }
 0x884   : > { %v1707_v48 = vmul.f32 %v3093_v57, %v3811_v33  ;;  %v3095_v15 = vpop.eup %3094  ;;  %v938_v51 = vpop.xlane.xlu1 %937  ;;  %3112 = vrcp.f32 %v941_v19  ;;  %v4058_v19 = vld [vmem:[#allocation7_spill] sm:$0xff] }
 0x885   : > { %v3097_v1 = vpop.eup %3096  ;;  %v947_v10 = vpop.xlane.xlu0 %946  ;;  %3114 = vrcp.f32 %v938_v51 }
 0x886   : > { %v2983_v25 = vpack.i.bf16 %v1707_v48, %v1706_v0  ;;  %v3099_v33 = vpop.eup %3098  ;;  %v4054_v0 = vld [vmem:[#allocation3_spill] sm:$0xff] }
 0x887   : > { %v3101_v17 = vpop.eup %3100 }
 0x888   : > { %v3103_v50 = vpop.eup %3102  ;;  %v944_v4 = vpop.xlane.xlu1 %943 }
 0x889   : > { %v3105_v43 = vpop.eup %3104  ;;  %3116 = vrcp.f32 %v944_v4  ;;  %v953_v60 = vpop.xlane.xlu0 %952  ;;  %v4057_v4 = vld [vmem:[#allocation8_spill] sm:$0xff] }
 0x88a   : > { %3118 = vrcp.f32 %v947_v10  ;;  %v4059_v10 = vld [vmem:[#allocation5_spill] sm:$0xff] }
 0x88b   : > { %v3107_v8 = vpop.eup %3106  ;;  %3120 = vrcp.f32 %v953_v60 }
 0x88c   : > { %v3109_v3 = vpop.eup %3108  ;;  %v950_v30 = vpop.xlane.xlu1 %949 }
 0x88d   : > { %v3111_v53 = vpop.eup %3110  ;;  %3122 = vrcp.f32 %v950_v30 }
 0x88e   : > { %v1046_v24 = vmul.f32 %v3111_v53, %v3561_v22 }
 0x890   : > { %v956_v39 = vpop.xlane.xlu1 %955 }
 0x891   : > { %v2940_v55 = vpop.permute.xlu0 %2939  ;;  %3124 = vrcp.f32 %v956_v39 }
 0x892   : > { %v2942_v47 = vunpack.i.h.bf16 %v2940_v55  ;;  %v2941_v34 = vunpack.i.l.bf16 %v2940_v55 }
 0x894   : > { %v2123_v5 = vsel %vm788_vm2, %v1046_v24, %v2941_v34 }
 0x895   : > { %v2945_v38 = vpop.permute.xlu1 %2944 }
 0x896   : > { %v2947_v35 = vunpack.i.h.bf16 %v2945_v38  ;;  %v2946_v63 = vunpack.i.l.bf16 %v2945_v38 }
 0x899   : > { %v2950_v56 = vpop.permute.xlu1 %2949 }
 0x89a   : > { %v2952_v6 = vunpack.i.h.bf16 %v2950_v56  ;;  %v2951_v7 = vunpack.i.l.bf16 %v2950_v56 }
 0x89d   : > { %v2955_v16 = vpop.permute.xlu1 %2954 }
 0x89e   : > { %v2957_v26 = vunpack.i.h.bf16 %v2955_v16  ;;  %v2956_v57 = vunpack.i.l.bf16 %v2955_v16 }
 0x8a1   : > { %v2960_v36 = vpop.permute.xlu0 %2959 }
 0x8a5   : > { %v2965_v54 = vpop.permute.xlu1 %2964 }
 0x8b7   : > { %v2846_v49 = vpop.f32.mrb[36].mxu1 }
 0x8b8   : > { %v1980_v29 = vpop.f32.mrb[37].mxu1  ;;  %v2021_v18 = vmul.f32 %v3095_v15, %v2846_v49 }
 0x8b9   : > { %v2847_v14 = vpop.f32.mrb[38].mxu1  ;;  %v2019_v31 = vmul.f32 %v3097_v1, %v1980_v29 }
 0x8ba   : > { %v2022_v9 = vmul.f32 %v3099_v33, %v2847_v14  ;;  %v1983_v59 = vpop.f32.mrb[39].mxu1 }
 0x8bb   : > { %v2020_v62 = vmul.f32 %v3101_v17, %v1983_v59 }
 0x8bc   : > { %v2968_v23 = vpack.i.bf16 %v2022_v9, %v2021_v18 }
 0x8bd   : > { %v2973_v20 = vpack.i.bf16 %v2020_v62, %v2019_v31  ;;  %v2132_v62 = vsel %vm2131_vm4, %v2123_v5, %v2951_v7 }
 0x8be   : > { %2969 = vrot.lane.b32.xlu1 %v2968_v23, %s3171_s20 }
 0x8bf   : > { %2974 = vrot.lane.b32.xlu0 %v2973_v20, %s3171_s20 }
 0x8c0   : > { %v2850_v21 = vpop.f32.mrb[40].mxu1 }
 0x8c1   : > { %v1996_v45 = vpop.f32.mrb[41].mxu1  ;;  %v2025_v42 = vmul.f32 %v3105_v43, %v2850_v21 }
 0x8c2   : > { %v2851_v2 = vpop.f32.mrb[42].mxu1  ;;  %2984 = vrot.lane.b32.xlu1 %v2983_v25, %s3170_s24  ;;  %v2023_v41 = vmul.f32 %v3103_v50, %v1996_v45  ;;  %v4055_v25 = vld [vmem:[#allocation2_spill] sm:$0xff] }
 0x8c3   : > { %v2026_v40 = vmul.f32 %v3107_v8, %v2851_v2  ;;  %v1999_v37 = vpop.f32.mrb[43].mxu1  ;;  %2979 = vrot.lane.b32.xlu0 %v2978_v46, %s3170_s24  ;;  %v3113_v46 = vpop.eup %3112 }
 0x8c4   : > { %v2024_v13 = vmul.f32 %v3109_v3, %v1999_v37  ;;  %v3115_v52 = vpop.eup %3114  ;;  %v1048_v28 = vmul.f32 %v3113_v46, %v4055_v25 }
 0x8c5   : > { %v2993_v58 = vpack.i.bf16 %v2026_v40, %v2025_v42  ;;  %v3117_v44 = vpop.eup %3116  ;;  %v1047_v27 = vmul.f32 %v3115_v52, %v4053_v32  ;;  %v2962_v42 = vunpack.i.h.bf16 %v2960_v36  ;;  %v2961_v40 = vunpack.i.l.bf16 %v2960_v36 }
 0x8c6   : > { %v2988_v61 = vpack.i.bf16 %v2024_v13, %v2023_v41  ;;  %v1049_v48 = vmul.f32 %v3117_v44, %v4054_v0  ;;  %v2125_v22 = vsel %vm788_vm2, %v1048_v28, %v2946_v63  ;;  %v3119_v14 = vpop.eup %3118  ;;  %v2967_v13 = vunpack.i.h.bf16 %v2965_v54 }
 0x8c7   : > { %2994 = vrot.lane.b32.xlu1 %v2993_v58, %s3171_s20  ;;  %v2124_v11 = vsel %vm788_vm2, %v1047_v27, %v2942_v47  ;;  %v2134_v18 = vsel %vm2131_vm4, %v2125_v22, %v2956_v57  ;;  %v3121_v31 = vpop.eup %3120  ;;  %v2966_v58 = vunpack.i.l.bf16 %v2965_v54 }
 0x8c8   : > { %2989 = vrot.lane.b32.xlu0 %v2988_v61, %s3171_s20  ;;  %v2126_v49 = vsel %vm788_vm2, %v1049_v48, %v2947_v35  ;;  %v2133_v23 = vsel %vm2131_vm4, %v2124_v11, %v2952_v6  ;;  %v3123_v21 = vpop.eup %3122  ;;  %v4056_v61 = vld [vmem:[#allocation6_spill] sm:$0xff]  ;;  %v1052_v56 = vmul.f32 %v3121_v31, %v4059_v10 }
 0x8c9   : > { %v2135_v17 = vsel %vm2131_vm4, %v2126_v49, %v2957_v26  ;;  %v3125_v3 = vpop.eup %3124  ;;  %v1050_v51 = vmul.f32 %v3119_v14, %v4056_v61  ;;  %v1051_v30 = vmul.f32 %v3123_v21, %v4057_v4  ;;  %v2449_v6 = vld [vmem:[%s4043_s8] ss:$0 sm:$0xff] }
 0x8ca   : > { %v1053_v38 = vmul.f32 %v3125_v3, %v4058_v19  ;;  %v2129_v44 = vsel %vm788_vm2, %v1052_v56, %v2966_v58 }
 0x8cb   : > { %v2128_v53 = vsel %vm788_vm2, %v1051_v30, %v2962_v42  ;;  %v2127_v55 = vsel %vm788_vm2, %v1050_v51, %v2961_v40 }
 0x8cc   : > { %v2130_v52 = vsel %vm788_vm2, %v1053_v38, %v2967_v13 }
 0x930   : > { %v2970_v15 = vpop.permute.xlu1 %2969 }
 0x931   : > { %v2972_v1 = vunpack.i.h.bf16 %v2970_v15  ;;  %v2971_v29 = vunpack.i.l.bf16 %v2970_v15  ;;  %v2975_v33 = vpop.permute.xlu0 %2974 }
 0x932   : > { %v2977_v9 = vunpack.i.h.bf16 %v2975_v33  ;;  %v2976_v59 = vunpack.i.l.bf16 %v2975_v33 }
 0x933   : > { %v2144_v20 = vsel %vm2140_vm5, %v2135_v17, %v2972_v1  ;;  %v2143_v50 = vsel %vm2140_vm5, %v2134_v18, %v2971_v29 }
 0x934   : > { %v2150_v43 = vpack.c.bf16 %v2144_v20, %v2143_v50  ;;  %v2141_v45 = vsel %vm2140_vm5, %v2132_v62, %v2976_v59  ;;  %v2142_v8 = vsel %vm2140_vm5, %v2133_v23, %v2977_v9  ;;  %v2985_v2 = vpop.permute.xlu1 %2984 }
 0x935   : > { %v2149_v37 = vpack.c.bf16 %v2142_v8, %v2141_v45  ;;  %v2980_v41 = vpop.permute.xlu0 %2979  ;;  %v2987_v12 = vunpack.i.h.bf16 %v2985_v2  ;;  %v2986_v39 = vunpack.i.l.bf16 %v2985_v2 }
 0x936   : > { %v2982_v60 = vunpack.i.h.bf16 %v2980_v41  ;;  %v2981_v16 = vunpack.i.l.bf16 %v2980_v41 }
 0x937   : > { %2856 = vmatprep.mubr.msk.bf16.mxu1 %vm456_vm1, %v2149_v37  ;;  %v2139_v35 = vsel %vm2131_vm4, %v2130_v52, %v2987_v12  ;;  %v2138_v63 = vsel %vm2131_vm4, %v2129_v44, %v2986_v39 }
 0x938   : > { %2857 = vmatmul.mubr.msk.bf16.vlgmr.msra.gmra.mrb[44].mxu1 %vm456_vm1, %v2150_v43  ;;  %v2136_v32 = vsel %vm2131_vm4, %v2127_v55, %v2981_v16  ;;  %v2137_v27 = vsel %vm2131_vm4, %v2128_v53, %v2982_v60 }
 0x939   : > { %v2995_v46 = vpop.permute.xlu1 %2994 }
 0x93a   : > { %v2997_v47 = vunpack.i.h.bf16 %v2995_v46  ;;  %v2996_v34 = vunpack.i.l.bf16 %v2995_v46  ;;  %v2990_v54 = vpop.permute.xlu0 %2989 }
 0x93b   : > { %v2992_v36 = vunpack.i.h.bf16 %v2990_v54  ;;  %v2991_v24 = vunpack.i.l.bf16 %v2990_v54 }
 0x93c   : > { %v2148_v26 = vsel %vm2140_vm5, %v2139_v35, %v2997_v47  ;;  %v2147_v57 = vsel %vm2140_vm5, %v2138_v63, %v2996_v34 }
 0x93d   : > { %v2152_v0 = vpack.c.bf16 %v2148_v26, %v2147_v57  ;;  %v2145_v48 = vsel %vm2140_vm5, %v2136_v32, %v2991_v24  ;;  %v2146_v25 = vsel %vm2140_vm5, %v2137_v27, %v2992_v36 }
 0x93e   : > { %v2151_v28 = vpack.c.bf16 %v2146_v25, %v2145_v48 }
 0x940   : > { %2860 = vmatprep.mubr.msk.bf16.mxu1 %vm456_vm1, %v2151_v28 }
 0x941   : > { %2861 = vmatmul.mubr.msk.bf16.gmra.mrb[48].mxu1 %vm456_vm1, %v2152_v0 }
 0xa0b   : > { %v2858_v7 = vpop.f32.mrb[44].mxu1 }
 0xa0c   : > { %v2223_v11 = vadd.f32 %v2858_v7, %v2449_v6  ;;  %v2214_v5 = vpop.f32.mrb[45].mxu1 }
 0xa0d   : > { %v2215_v15 = vadd.f32 %v2449_v6, %v2214_v5  ;;  %v2859_v49 = vpop.f32.mrb[46].mxu1 }
 0xa0e   : > { %2247 = vst.msk [vmem:[%s401_s28 + $0x10] sm:$0xff] %vm456_vm1, %v2223_v11  ;;  %v2226_v22 = vadd.f32 %v2859_v49, %v2449_v6  ;;  %v2217_v1 = vpop.f32.mrb[47].mxu1 }
 0xa0f   : > { %2245 = vst.msk [vmem:[%s401_s28] sm:$0xff] %vm456_vm1, %v2215_v15  ;;  %v2218_v29 = vadd.f32 %v2449_v6, %v2217_v1 }
 0xa10   : > { %2248 = vst.msk [vmem:[%s401_s28 + $0x18] sm:$0xff] %vm456_vm1, %v2226_v22 }
 0xa11   : > { %2246 = vst.msk [vmem:[%s401_s28 + $0x8] sm:$0xff] %vm456_vm1, %v2218_v29 }
 0xa14   : > { %v2862_v33 = vpop.f32.mrb[48].mxu1 }
 0xa15   : > { %v2239_v14 = vadd.f32 %v2862_v33, %v2449_v6  ;;  %v2230_v17 = vpop.f32.mrb[49].mxu1 }
 0xa16   : > { %v2231_v18 = vadd.f32 %v2449_v6, %v2230_v17  ;;  %v2863_v9 = vpop.f32.mrb[50].mxu1 }
 0xa17   : > { %2251 = vst.msk [vmem:[%s401_s28 + $0x30] sm:$0xff] %vm456_vm1, %v2239_v14  ;;  %v2242_v59 = vadd.f32 %v2863_v9, %v2449_v6  ;;  %v2233_v31 = vpop.f32.mrb[51].mxu1 }
 0xa18   : > { %2249 = vst.msk [vmem:[%s401_s28 + $0x20] sm:$0xff] %vm456_vm1, %v2231_v18  ;;  %v2234_v62 = vadd.f32 %v2449_v6, %v2233_v31 }
 0xa19   : > { %2252 = vst.msk [vmem:[%s401_s28 + $0x38] sm:$0xff] %vm456_vm1, %v2242_v59 }
 0xa1a   : > { %2250 = vst.msk [vmem:[%s401_s28 + $0x28] sm:$0xff] %vm456_vm1, %v2234_v62 }
 0xa1b PF: > { %s20_s17 = sadd.s32 1, %s3164_s17   ;;  %s4060_s13 = smov %s3156_s15 }
 0xa1c   : > { %p17_p10 = scmp.ge.s32.totalorder %s20_s17, 6   ;;  %s4061_s14 = smov %s3160_s16 }
 0xa1d   : > { %s4062_s15 = smov %s4065_s18  ;;  %s4063_s16 = smov %s4069_s19 }
 0xa1e   :  { %19 = sbr.rel (!%p17_p10) target bundleno = 3 (0x3), region = 98 }

// kernel: natten_forward.5
= control target key start
LH: loop header
LB: loop body
LE: loop exit
PB: predicated region body
PF: predicated region fallthrough
CT: control target
= control target key end

     0   :  { %s4210_s0 = inlined_call_operand.vmem [shape: f32[2,16,8,24], index: 0, kind: input, shape index: {}]   ;;  %s4211_s1 = inlined_call_operand.vmem [shape: f32[24,24], index: 1, kind: input, shape index: {}]   ;;  %s4212_s2 = inlined_call_operand.vmem [shape: f32[1,24], index: 2, kind: input, shape index: {}]   ;;  %s4213_s3 = inlined_call_operand.vmem [shape: f32[24,24], index: 3, kind: input, shape index: {}]   ;;  %s4214_s4 = inlined_call_operand.vmem [shape: f32[1,24], index: 4, kind: input, shape index: {}]   ;;  %s4215_s5 = inlined_call_operand.vmem [shape: f32[24,24], index: 5, kind: input, shape index: {}]   ;;  %s4216_s6 = inlined_call_operand.vmem [shape: f32[1,24], index: 6, kind: input, shape index: {}]   ;;  %s4217_s7 = inlined_call_operand.vmem [shape: f32[24,24], index: 7, kind: input, shape index: {}]   ;;  %s4218_s8 = inlined_call_operand.vmem [shape: f32[1,24], index: 8, kind: input, shape index: {}]   ;;  %s4219_s9 = inlined_call_operand.vmem [shape: bf16[2,4,64,96], index: 9, kind: input, shape index: {}]   ;;  %s4220_s10 = inlined_call_operand.hbm [shape: f32[2,16,8,24], index: 10, kind: output, shape index: {}]  }
   0x1   :  { %4225 = sst [smem:[#allocation15_spill]] %s4213_s3 }
   0x2   :  { %15 = vsyncpa [#allocation3], 0 }
   0x3   :  { %17 = vsyncpa [#allocation3 + $0x1], 0  ;;  %s3319_s13 = smov 0   ;;  %s3321_s14 = smov 0  }
   0x4   :  { %s3323_s15 = smov 0   ;;  %s3325_s16 = smov 0  }
   0x5   :  { %s3327_s17 = smov 0   ;;  %s3329_s18 = smov 0  }
   0x6   :  { %s3331_s19 = smov 0   ;;  %s3333_s20 = smov 0  }
   0x7 LB: > { %4226 = sst [smem:[#allocation5_spill]] %s3249_s19  ;;  %s2351_s21 = sadd.s32 4294967295, %s3253_s20   ;;  %s3253_s20 = sphi %s3333_s20, %s23_s20   ;;  %s3249_s19 = sphi %s3331_s19, %s4249_s19   ;;  %s3245_s18 = sphi %s3329_s18, %s4254_s18   ;;  %s3241_s17 = sphi %s3327_s17, %s4247_s17   ;;  %s3237_s16 = sphi %s3325_s16, %s4253_s16   ;;  %s3233_s15 = sphi %s3323_s15, %s4252_s15   ;;  %s3229_s14 = sphi %s3321_s14, %s4251_s14   ;;  %s3225_s13 = sphi %s3319_s13, %s4250_s13  }
   0x8   : > { %s2352_s22 = sadd.s32 4294967294, %s3253_s20   ;;  %s32_s23 = sadd.s32 1, %s3245_s18 }
   0x9   : > { %p33_p0 = scmp.ge.s32.totalorder %s32_s23, 2  ;;  %s35_s24 = sadd.s32 1, %s3249_s19 }
   0xa   : > { %p274_p1 = scmp.ne.s32.totalorder %s3233_s15, %s3229_s14  ;;  %p275_p2 = scmp.eq.s32.totalorder %s2351_s21, 3 }
   0xb   : > { %s4256_s23 = smov (%p33_p0, %s32_s23), 0  ;;  %s4258_s24 = smov (!%p33_p0, %s35_s24), %s3249_s19 }
   0xc   : > { %4227 = sst [smem:[#allocation6_spill]] %s4256_s23  ;;  %s259_s25 = ssub.s32 %s3245_s18, %s4256_s23 }
   0xd   : > { %p3370_p3 = por %p275_p2, %p274_p1  ;;  %p37_p4 = scmp.ge.s32.totalorder %s4258_s24, 2 }
   0xe   : > { %p280_p5 = scmp.ne.s32.totalorder %s3229_s14, %s3225_s13  ;;  %p281_p6 = scmp.eq.s32.totalorder %s2352_s22, 3 }
   0xf   : > { %p2355_p7 = scmp.ge.s32.totalorder %s3253_s20, 1  ;;  %s4260_s24 = smov (%p37_p4, %s4258_s24), 0 }
  0x10   : > { %4229 = sst [smem:[#allocation7_spill]] %s4260_s24  ;;  %p3379_p8 = por %p281_p6, %p280_p5 }
  0x11   : > { %p339_p9 = scmp.lt.s32.totalorder %s3253_s20, 5  ;;  %s260_s28 = ssub.s32 %s3249_s19, %s4260_s24 }
  0x12   : > { %s264_s29 = sadd.s32 1, %s3233_s15  ;;  %s261_s30 = sor.u32 %s260_s28, %s259_s25 }
  0x13   : > { %p340_p10 = pnand %p2355_p7, %p339_p9  ;;  %p262_p11 = scmp.eq.s32.totalorder %s261_s30, 0 }
  0x15   : > { %s3388_s11 = scalar_select %p262_p11, %s3233_s15, %s264_s29  }
  0x16   : > { %343 = sbr.rel (%p340_p10) target bundleno = 2616 (0xa38), region = 60 }
  0x1d   : > { %s4231_s3 = sld [smem:[#allocation15_spill]]  ;;  %p382_p12 = scmp.lt.s32.totalorder %s3237_s16, 1  ;;  %v434_v5 = vld [vmem:[%s4211_s1] sm:$0xff]  ;;  %v435_v6 = vld [vmem:[%s4211_s1 + $0x8] sm:$0xff]  ;;  %v436_v7 = vld [vmem:[%s4211_s1 + $0x10] sm:$0xff]  ;;  %vm459_vm0 = vcmask 1043456  }
  0x1e   : > { %s4224_s25 = sshll.u32 %s3241_s17, 3  ;;  %v437_v8 = vpack.c.bf16 %v435_v6, %v434_v5  ;;  %v438_v9 = vpack.c.bf16 %v436_v7, %v436_v7  ;;  %s2460_s24 = sshll.u32 %s3241_s17, 6  ;;  %v642_v10 = vld [vmem:[%s4215_s5] sm:$0xff]  ;;  %v643_v11 = vld [vmem:[%s4215_s5 + $0x8] sm:$0xff]  ;;  %v644_v15 = vld [vmem:[%s4215_s5 + $0x10] sm:$0xff]  ;;  %vm446_vm1 = vcmask 195584  }
  0x1f   : > { %s2362_s28 = sadd.s32 4294967294, %s4224_s25  ;;  %v645_v14 = vpack.c.bf16 %v643_v11, %v642_v10  ;;  %v646_v25 = vpack.c.bf16 %v644_v15, %v644_v15  ;;  %v2370_v48 = vld [vmem:[%s4212_s2] ss:$0 sm:$0xff]  ;;  %vm778_vm2 = vcmask 48128   ;;  %s3255_s23 = smov 122   ;;  %vm874_vm3 = vcmask 785408  }
  0x20   : > { %s383_s19 = scalar_select %p382_p12, %s3237_s16, 1  ;;  %2648 = vmatprep.subr.bf16.mxu0 %v437_v8  ;;  %v461_v13 = vsel %vm459_vm0, %v438_v9, 0  ;;  %v3468_v58 = vld [vmem:[%s4214_s4] ss:$0 sm:$0xff]  ;;  %vm2121_vm4 = vcmask 97280   ;;  %vm2130_vm5 = vcmask 146432  }
  0x21   : > { %p396_p13 = scmp.gt.s32.totalorder %s2362_s28, 0  ;;  %p2363_p0 = scmp.lt.s32.totalorder %s2362_s28, 4  ;;  %2649 = vmatpush3.bf16.msra.mxu0 %v437_v8  ;;  %v655_v37 = vsel %vm459_vm0, %v646_v25, 0 }
  0x22   : > { %s2456_s12 = sshll.u32 %s383_s19, 7  ;;  %2864 = vmatprep.subr.msk.bf16.mxu0 %vm459_vm0, %v438_v9  ;;  %p387_p1 = scmp.lt.s32.totalorder %s3241_s17, 1 }
  0x23   : > { %v528_v0 = vld [vmem:[%s4231_s3] sm:$0xff]  ;;  %v529_v1 = vld [vmem:[%s4231_s3 + $0x8] sm:$0xff]  ;;  %v530_v2 = vld [vmem:[%s4231_s3 + $0x10] sm:$0xff]  ;;  %s386_s22 = scalar_lea.vmem %s4210_s0, %s2456_s12  ;;  %s4262_s28 = smov (!%p396_p13, %s2362_s28), 0 }
  0x24   : > { %v531_v3 = vpack.c.bf16 %v529_v1, %v528_v0  ;;  %v532_v4 = vpack.c.bf16 %v530_v2, %v530_v2  ;;  %s401_s3 = scalar_lea.vmem %s386_s22, %s2460_s24  ;;  %s4264_s28 = smov (!%p2363_p0, %s4262_s28), 4 }
  0x25   : > { %v402_v16 = vld [vmem:[%s401_s3] sm:$0xff]  ;;  %v403_v17 = vld [vmem:[%s401_s3 + $0x8] sm:$0xff]  ;;  %v404_v18 = vld [vmem:[%s401_s3 + $0x10] sm:$0xff]  ;;  %2651 = vmatpush3.bf16.msra.mxu0 %v461_v13  ;;  %s2369_s29 = sshll.u32 %s4264_s28, 3  ;;  %s3256_s30 = smov 116  }
  0x26   : > { %2660 = vmatprep.subr.bf16.mxu1 %v531_v3  ;;  %v559_v12 = vsel %vm459_vm0, %v532_v4, 0  ;;  %v410_v19 = vpack.c.bf16 %v403_v17, %v402_v16  ;;  %v405_v20 = vld [vmem:[%s401_s3 + $0x18] sm:$0xff]  ;;  %v406_v21 = vld [vmem:[%s401_s3 + $0x20] sm:$0xff]  ;;  %v407_v22 = vld [vmem:[%s401_s3 + $0x28] sm:$0xff]  ;;  %2676 = vmatprep.subr.bf16.mxu0 %v645_v14  ;;  %s3430_s24 = scalar_lea.vmem %s386_s22, %s2369_s29  ;;  %s3257_s12 = smov 110  }
  0x27   : > { %2661 = vmatpush3.bf16.msra.mxu1 %v531_v3  ;;  %v411_v23 = vpack.c.bf16 %v405_v20, %v404_v18  ;;  %v412_v24 = vpack.c.bf16 %v407_v22, %v406_v21  ;;  %v408_v26 = vld [vmem:[%s401_s3 + $0x30] sm:$0xff]  ;;  %v409_v27 = vld [vmem:[%s401_s3 + $0x38] sm:$0xff]  ;;  %v416_v28 = vld [vmem:[%s3430_s24] sm:$0xff]  ;;  %s388_s25 = scalar_select %p387_p1, %s3241_s17, 1 }
  0x28   : > { %2865 = vmatprep.subr.msk.bf16.mxu1 %vm459_vm0, %v532_v4  ;;  %2652 = vmatprep.mubr.msk.bf16.mxu0 %vm446_vm1, %v410_v19  ;;  %v417_v29 = vld [vmem:[%s3430_s24 + $0x8] sm:$0xff]  ;;  %v418_v30 = vld [vmem:[%s3430_s24 + $0x10] sm:$0xff]  ;;  %v419_v32 = vld [vmem:[%s3430_s24 + $0x18] sm:$0xff]  ;;  %v413_v38 = vpack.c.bf16 %v409_v27, %v408_v26  ;;  %s3258_s21 = smov 6   ;;  %s2452_s3 = sshll.u32 %s3237_s16, 4 }
  0x29   : > { %2653 = vmatmul.mubr.msk.bf16.vlgmr.msra.gmra.mrb[0].mxu0 %vm446_vm1, %v411_v23  ;;  %v428_v31 = vpack.c.bf16 %v417_v29, %v416_v28  ;;  %v420_v33 = vld [vmem:[%s3430_s24 + $0x20] sm:$0xff]  ;;  %v421_v34 = vld [vmem:[%s3430_s24 + $0x28] sm:$0xff]  ;;  %v429_v35 = vpack.c.bf16 %v419_v32, %v418_v30  ;;  %v422_v39 = vld [vmem:[%s3430_s24 + $0x30] sm:$0xff]  ;;  %s2457_s19 = sshll.u32 %s388_s25, 7  ;;  %s4246_s25 = sshll.u32 %s3241_s17, 3 }
  0x2a   : > { %2656 = vmatprep.mubr.msk.bf16.mxu0 %vm446_vm1, %v412_v24  ;;  %2677 = vmatpush3.bf16.msra.mxu0 %v645_v14  ;;  %v430_v36 = vpack.c.bf16 %v421_v34, %v420_v33  ;;  %v423_v40 = vld [vmem:[%s3430_s24 + $0x38] sm:$0xff]  ;;  %v424_v41 = vld [vmem:[%s3430_s24 + $0x40] sm:$0xff]  ;;  %v425_v42 = vld [vmem:[%s3430_s24 + $0x48] sm:$0xff]  ;;  %s3574_s28 = scalar_lea.vmem %s4219_s9, %s2457_s19  ;;  %s2256_s19 = sadd.s32 %s2452_s3, %s4246_s25 }
  0x2b   : > { %2663 = vmatpush3.bf16.msra.mxu1 %v559_v12  ;;  %2866 = vmatprep.subr.msk.bf16.mxu0 %vm459_vm0, %v646_v25  ;;  %v431_v43 = vpack.c.bf16 %v423_v40, %v422_v39  ;;  %v432_v44 = vpack.c.bf16 %v425_v42, %v424_v41  ;;  %v426_v45 = vld [vmem:[%s3430_s24 + $0x50] sm:$0xff]  ;;  %v427_v46 = vld [vmem:[%s3430_s24 + $0x58] sm:$0xff]  ;;  %s2453_s29 = sshll.u32 %s2256_s19, 7 }
  0x2c   : > { %2664 = vmatprep.mubr.msk.bf16.mxu1 %vm446_vm1, %v428_v31  ;;  %v433_v47 = vpack.c.bf16 %v427_v46, %v426_v45 }
  0x2e   : > { %2665 = vmatmul.mubr.msk.bf16.vlgmr.msra.gmra.mrb[0].mxu1 %vm446_vm1, %v429_v35  ;;  %2679 = vmatpush3.bf16.msra.mxu0 %v655_v37 }
  0x2f   : > { %2668 = vmatprep.mubr.msk.bf16.mxu1 %vm446_vm1, %v430_v36 }
  0x31   : > { %2657 = vmatmul.mubr.msk.bf16.gmra.mrb[4].mxu0 %vm446_vm1, %v413_v38 }
  0x32   : > { %2680 = vmatprep.mubr.msk.bf16.mxu0 %vm446_vm1, %v428_v31  ;;  %v2382_v31 = vld [vmem:[%s4216_s6] ss:$0 sm:$0xff] }
  0x36   : > { %2669 = vmatmul.mubr.msk.bf16.gmra.mrb[4].mxu1 %vm446_vm1, %v431_v43 }
  0x37   : > { %2672 = vmatprep.mubr.msk.bf16.mxu1 %vm446_vm1, %v432_v44 }
  0x39   : > { %2681 = vmatmul.mubr.msk.bf16.vlgmr.msra.gmra.mrb[8].mxu0 %vm446_vm1, %v429_v35 }
  0x3a   : > { %2684 = vmatprep.mubr.msk.bf16.mxu0 %vm446_vm1, %v430_v36 }
  0x3e   : > { %2673 = vmatmul.mubr.msk.bf16.gmra.mrb[8].mxu1 %vm446_vm1, %v433_v47 }
  0x41   : > { %2685 = vmatmul.mubr.msk.bf16.gmra.mrb[12].mxu0 %vm446_vm1, %v431_v43 }
  0x42   : > { %2688 = vmatprep.mubr.msk.bf16.mxu0 %vm446_vm1, %v432_v44 }
  0x49   : > { %2689 = vmatmul.mubr.msk.bf16.gmra.mrb[16].mxu0 %vm446_vm1, %v433_v47 }
  0xfc   : > { %v2654_v49 = vpop.f32.mrb[0].mxu0 }
  0xfd   : > { %v506_v50 = vadd.f32 %v2654_v49, %v2370_v48  ;;  %v497_v51 = vpop.f32.mrb[1].mxu0 }
  0xfe   : > { %v498_v52 = vadd.f32 %v2370_v48, %v497_v51  ;;  %v2655_v53 = vpop.f32.mrb[2].mxu0 }
  0xff   : > { %v740_v54 = vmul.f32 0.4082483, %v506_v50  ;;  %v509_v55 = vadd.f32 %v2655_v53, %v2370_v48  ;;  %v500_v56 = vpop.f32.mrb[3].mxu0 }
 0x100   : > { %v738_v59 = vmul.f32 0.4082483, %v498_v52  ;;  %v501_v60 = vadd.f32 %v2370_v48, %v500_v56 }
 0x101   : > { %v2666_v57 = vpop.f32.mrb[0].mxu1  ;;  %v741_v62 = vmul.f32 0.4082483, %v509_v55 }
 0x102   : > { %v595_v61 = vpop.f32.mrb[1].mxu1  ;;  %v739_v0 = vmul.f32 0.4082483, %v501_v60  ;;  %v604_v1 = vadd.f32 %v2666_v57, %v3468_v58 }
 0x103   : > { %v2667_v63 = vpop.f32.mrb[2].mxu1  ;;  %v3472_v4 = vpack.c.bf16 %v741_v62, %v740_v54  ;;  %v596_v5 = vadd.f32 %v3468_v58, %v595_v61 }
 0x104   : > { %v607_v2 = vadd.f32 %v2667_v63, %v3468_v58  ;;  %v598_v3 = vpop.f32.mrb[3].mxu1  ;;  %v3476_v7 = vpack.c.bf16 %v739_v0, %v738_v59  ;;  %v2658_v8 = vpop.f32.mrb[4].mxu0 }
 0x105   : > { %v599_v6 = vadd.f32 %v3468_v58, %v598_v3  ;;  %v522_v10 = vadd.f32 %v2658_v8, %v2370_v48  ;;  %v513_v11 = vpop.f32.mrb[5].mxu0 }
 0x106   : > { %v3478_v9 = vpack.c.bf16 %v607_v2, %v604_v1  ;;  %2704 = vmatprep.mubr.msk.bf16.mxu1 %vm778_vm2, %v3476_v7  ;;  %v514_v13 = vadd.f32 %v2370_v48, %v513_v11  ;;  %v2659_v14 = vpop.f32.mrb[6].mxu0 }
 0x107   : > { %v3480_v12 = vpack.c.bf16 %v599_v6, %v596_v5  ;;  %v744_v15 = vmul.f32 0.4082483, %v522_v10  ;;  %v525_v16 = vadd.f32 %v2659_v14, %v2370_v48  ;;  %v516_v17 = vpop.f32.mrb[7].mxu0 }
 0x108   : > { %1081 = vrot.lane.b32.xlu1 %v3478_v9, %s3255_s23  ;;  %v742_v20 = vmul.f32 0.4082483, %v514_v13  ;;  %v517_v21 = vadd.f32 %v2370_v48, %v516_v17  ;;  %v795_v43 = vsel %vm778_vm2, %v3478_v9, 0 }
 0x109   : > { %1079 = vrot.lane.b32.xlu0 %v3480_v12, %s3255_s23  ;;  %2867 = vmatprep.subr.msk.bf16.mxu1 %vm778_vm2, %v3480_v12  ;;  %v792_v18 = vsel %vm778_vm2, %v3480_v12, 0  ;;  %v2670_v19 = vpop.f32.mrb[4].mxu1  ;;  %v745_v24 = vmul.f32 0.4082483, %v525_v16 }
 0x10a   : > { %2693 = vmatpush3.bf16.xpose.msra.mxu1 %v792_v18  ;;  %v620_v22 = vadd.f32 %v2670_v19, %v3468_v58  ;;  %v611_v23 = vpop.f32.mrb[5].mxu1  ;;  %v743_v27 = vmul.f32 0.4082483, %v517_v21 }
 0x10b   : > { %2868 = vmatprep.subr.msk.bf16.mxu1 %vm778_vm2, %v3478_v9  ;;  %v612_v25 = vadd.f32 %v3468_v58, %v611_v23  ;;  %v2671_v26 = vpop.f32.mrb[6].mxu1  ;;  %v3497_v30 = vpack.c.bf16 %v745_v24, %v744_v15  ;;  %v2462_v23 = vld [vmem:[%s3574_s28] sm:$0xff]  }
 0x10c   : > { %v623_v28 = vadd.f32 %v2671_v26, %v3468_v58  ;;  %v614_v29 = vpop.f32.mrb[7].mxu1  ;;  %v3503_v33 = vpack.c.bf16 %v743_v27, %v742_v20  ;;  %v2682_v34 = vpop.f32.mrb[8].mxu0 }
 0x10d   : > { %v615_v32 = vadd.f32 %v3468_v58, %v614_v29  ;;  %v700_v36 = vadd.f32 %v2682_v34, %v2382_v31  ;;  %v691_v37 = vpop.f32.mrb[9].mxu0 }
 0x10e   : > { %v3505_v35 = vpack.c.bf16 %v623_v28, %v620_v22  ;;  %v692_v39 = vadd.f32 %v2382_v31, %v691_v37  ;;  %v2683_v40 = vpop.f32.mrb[10].mxu0  ;;  %v2525_v22 = vld [vmem:[%s3574_s28 + $0x8] sm:$0xff]   ;;  %v2464_v28 = vunpack.c.h.bf16 %v2462_v23 }
 0x10f   : > { %v3507_v38 = vpack.c.bf16 %v615_v32, %v612_v25  ;;  %v703_v41 = vadd.f32 %v2683_v40, %v2382_v31  ;;  %v694_v42 = vpop.f32.mrb[11].mxu0  ;;  %v2467_v24 = vunpack.c.l.bf16 %v2525_v22  ;;  %v2463_v25 = vunpack.c.l.bf16 %v2462_v23 }
 0x110   : > { %v695_v45 = vadd.f32 %v2382_v31, %v694_v42  ;;  %v801_v15 = vsel %vm778_vm2, %v3505_v35, 0  ;;  %v2468_v26 = vunpack.c.h.bf16 %v2525_v22 }
 0x111   : > { %v2674_v44 = vpop.f32.mrb[8].mxu1  ;;  %v3512_v48 = vpack.c.bf16 %v703_v41, %v700_v36 }
 0x112   : > { %2695 = vmatpush3.bf16.xpose.msra.mxu1 %v795_v43  ;;  %v636_v46 = vadd.f32 %v2674_v44, %v3468_v58  ;;  %v627_v47 = vpop.f32.mrb[9].mxu1  ;;  %v3517_v51 = vpack.c.bf16 %v695_v45, %v692_v39 }
 0x113   : > { %2869 = vmatprep.subr.msk.bf16.mxu1 %vm778_vm2, %v3507_v38  ;;  %v628_v49 = vadd.f32 %v3468_v58, %v627_v47  ;;  %v2675_v50 = vpop.f32.mrb[10].mxu1 }
 0x114   : > { %v639_v52 = vadd.f32 %v2675_v50, %v3468_v58  ;;  %v630_v53 = vpop.f32.mrb[11].mxu1  ;;  %v2686_v55 = vpop.f32.mrb[12].mxu0  ;;  %2712 = vmatprep.subr.bf16.mxu0 %v3517_v51  ;;  %v2527_v50 = vld [vmem:[%s3574_s28 + $0x18] sm:$0xff]  }
 0x115   : > { %v631_v54 = vadd.f32 %v3468_v58, %v630_v53  ;;  %v716_v57 = vadd.f32 %v2686_v55, %v2382_v31  ;;  %v707_v59 = vpop.f32.mrb[13].mxu0  ;;  %2713 = vmatpush3.bf16.msra.mxu0 %v3517_v51  ;;  %v798_v58 = vsel %vm778_vm2, %v3507_v38, 0  ;;  %v2475_v53 = vunpack.c.l.bf16 %v2527_v50 }
 0x116   : > { %v3522_v56 = vpack.c.bf16 %v639_v52, %v636_v46  ;;  %v708_v61 = vadd.f32 %v2382_v31, %v707_v59  ;;  %v2687_v62 = vpop.f32.mrb[14].mxu0  ;;  %2714 = vmatprep.subr.bf16.mxu0 %v3512_v48  ;;  %v2476_v55 = vunpack.c.h.bf16 %v2527_v50 }
 0x117   : > { %v3525_v60 = vpack.c.bf16 %v631_v54, %v628_v49  ;;  %v719_v63 = vadd.f32 %v2687_v62, %v2382_v31  ;;  %v710_v0 = vpop.f32.mrb[15].mxu0  ;;  %v2526_v49 = vld [vmem:[%s3574_s28 + $0x10] sm:$0xff]  }
 0x118   : > { %v711_v1 = vadd.f32 %v2382_v31, %v710_v0  ;;  %v807_v20 = vsel %vm778_vm2, %v3522_v56, 0  ;;  %v2471_v52 = vunpack.c.l.bf16 %v2526_v49 }
 0x119   : > { %v3530_v2 = vpack.c.bf16 %v719_v63, %v716_v57  ;;  %2715 = vmatpush3.bf16.msra.mxu0 %v3512_v48  ;;  %v804_v19 = vsel %vm778_vm2, %v3525_v60, 0 }
 0x11a   : > { %2697 = vmatpush3.bf16.xpose.msra.mxu1 %v798_v58  ;;  %v3535_v3 = vpack.c.bf16 %v711_v1, %v708_v61  ;;  %v2472_v61 = vunpack.c.h.bf16 %v2526_v49 }
 0x11b   : > { %2870 = vmatprep.subr.msk.bf16.mxu1 %vm778_vm2, %v3505_v35 }
 0x11c   : > { %v2690_v5 = vpop.f32.mrb[16].mxu0  ;;  %2716 = vmatprep.subr.bf16.mxu0 %v3535_v3 }
 0x11d   : > { %v732_v6 = vadd.f32 %v2690_v5, %v2382_v31  ;;  %v723_v8 = vpop.f32.mrb[17].mxu0  ;;  %2717 = vmatpush3.bf16.msra.mxu0 %v3535_v3 }
 0x11e   : > { %v724_v10 = vadd.f32 %v2382_v31, %v723_v8  ;;  %v2691_v11 = vpop.f32.mrb[18].mxu0  ;;  %2718 = vmatprep.subr.bf16.mxu0 %v3530_v2 }
 0x11f   : > { %v735_v13 = vadd.f32 %v2691_v11, %v2382_v31  ;;  %v726_v14 = vpop.f32.mrb[19].mxu0 }
 0x120   : > { %v727_v16 = vadd.f32 %v2382_v31, %v726_v14 }
 0x121   : > { %v3542_v17 = vpack.c.bf16 %v735_v13, %v732_v6  ;;  %2719 = vmatpush3.bf16.msra.mxu0 %v3530_v2 }
 0x122   : > { %2699 = vmatpush3.bf16.xpose.msra.mxu1 %v801_v15  ;;  %v3547_v18 = vpack.c.bf16 %v727_v16, %v724_v10 }
 0x123   : > { %2871 = vmatprep.subr.msk.bf16.mxu1 %vm778_vm2, %v3525_v60 }
 0x124   : > { %2720 = vmatprep.subr.bf16.mxu0 %v3547_v18 }
 0x125   : > { %2721 = vmatpush3.bf16.msra.mxu0 %v3547_v18 }
 0x126   : > { %2722 = vmatprep.subr.bf16.mxu0 %v3542_v17 }
 0x129   : > { %2723 = vmatpush3.bf16.msra.mxu0 %v3542_v17 }
 0x12a   : > { %2701 = vmatpush3.bf16.xpose.msra.mxu1 %v804_v19 }
 0x12b   : > { %2872 = vmatprep.subr.msk.bf16.mxu1 %vm778_vm2, %v3522_v56 }
 0x132   : > { %2703 = vmatpush3.bf16.xpose.msra.mxu1 %v807_v20 }
 0x139   : > { %2705 = vmatmul.mubr.msk.bf16.vlgmr.msra.gmra.mrb[12].mxu1 %vm778_vm2, %v3472_v4 }
 0x13a   : > { %2708 = vmatprep.mubr.msk.bf16.mxu1 %vm778_vm2, %v3503_v33 }
 0x141   : > { %2709 = vmatmul.mubr.msk.bf16.gmra.mrb[16].mxu1 %vm778_vm2, %v3497_v30 }
 0x17a   : > { %v1082_v5 = vpop.permute.xlu1 %1081 }
 0x17b   : > { %v3565_v21 = vpop.permute.xlu0 %1079 }
 0x17c   : > { %2873 = vmatprep.subr.msk.bf16.mxu0 %vm778_vm2, %v3565_v21 }
 0x20c   : > { %v2706_v27 = vpop.f32.mrb[12].mxu1 }
 0x20d   : > { %v3578_v29 = vadd.f32 %v2706_v27, %v2467_v24  ;;  %v843_v31 = vpop.f32.mrb[13].mxu1 }
 0x20e   : > { %v844_v32 = vadd.f32 %v2463_v25, %v843_v31  ;;  %v2707_v34 = vpop.f32.mrb[14].mxu1  ;;  %v1104_v31 = vsel %vm778_vm2, %v3565_v21, 0 }
 0x20f   : > { %v855_v36 = vadd.f32 %v2707_v34, %v2468_v26  ;;  %v846_v37 = vpop.f32.mrb[15].mxu1  ;;  %v881_v39 = vsel %vm874_vm3, %v3578_v29, -inf }
 0x210   : > { %v847_v40 = vadd.f32 %v2464_v28, %v846_v37  ;;  %882 = vmax.xlane.f32.xlu1 %v881_v39  ;;  %v875_v41 = vsel %vm874_vm3, %v844_v32, -inf }
 0x211   : > { %876 = vmax.xlane.f32.xlu0 %v875_v41  ;;  %v884_v42 = vsel %vm874_vm3, %v855_v36, -inf }
 0x212   : > { %v878_v43 = vsel %vm874_vm3, %v847_v40, -inf }
 0x214   : > { %885 = vmax.xlane.f32.xlu1 %v884_v42  ;;  %v2710_v44 = vpop.f32.mrb[16].mxu1 }
 0x215   : > { %879 = vmax.xlane.f32.xlu0 %v878_v43  ;;  %v859_v45 = vpop.f32.mrb[17].mxu1  ;;  %v3593_v57 = vadd.f32 %v2710_v44, %v2475_v53 }
 0x216   : > { %v2711_v46 = vpop.f32.mrb[18].mxu1  ;;  %v3591_v54 = vadd.f32 %v2471_v52, %v859_v45 }
 0x217   : > { %v862_v47 = vpop.f32.mrb[19].mxu1  ;;  %v3595_v59 = vadd.f32 %v2711_v46, %v2476_v55  ;;  %v893_v63 = vsel %vm874_vm3, %v3593_v57, -inf }
 0x218   : > { %v887_v62 = vsel %vm874_vm3, %v3591_v54, -inf  ;;  %v3601_v0 = vadd.f32 %v2472_v61, %v862_v47 }
 0x219   : > { %v896_v58 = vsel %vm874_vm3, %v3595_v59, -inf }
 0x21a   : > { %v890_v1 = vsel %vm874_vm3, %v3601_v0, -inf }
 0x225   : > { %1085 = vrot.lane.b32.xlu1 %v3505_v35, %s3255_s23 }
 0x22b   : > { %1083 = vrot.lane.b32.xlu0 %v3507_v38, %s3255_s23 }
 0x249   : > { %888 = vmax.xlane.f32.xlu1 %v887_v62 }
 0x24a   : > { %894 = vmax.xlane.f32.xlu0 %v893_v63 }
 0x24d   : > { %897 = vmax.xlane.f32.xlu1 %v896_v58 }
 0x251   : > { %891 = vmax.xlane.f32.xlu1 %v890_v1 }
 0x260   : > { %1087 = vrot.lane.b32.xlu0 %v3525_v60, %s3255_s23 }
 0x262   : > { %1089 = vrot.lane.b32.xlu1 %v3522_v56, %s3255_s23 }
 0x264   : > { %1065 = vrot.lane.b32.xlu0 %v3476_v7, %s3255_s23 }
 0x266   : > { %1067 = vrot.lane.b32.xlu1 %v3472_v4, %s3255_s23 }
 0x268   : > { %1069 = vrot.lane.b32.xlu0 %v3503_v33, %s3255_s23 }
 0x26a   : > { %1071 = vrot.lane.b32.xlu1 %v3497_v30, %s3255_s23 }
 0x26c   : > { %1268 = vrot.lane.b32.xlu0 %v3517_v51, %s3255_s23 }
 0x26e   : > { %1270 = vrot.lane.b32.xlu1 %v3512_v48, %s3255_s23 }
 0x270   : > { %1276 = vrot.lane.b32.xlu0 %v3547_v18, %s3255_s23 }
 0x272   : > { %1272 = vrot.lane.b32.xlu1 %v3535_v3, %s3255_s23 }
 0x274   : > { %1404 = vrot.lane.b32.xlu0 %v3480_v12, %s3256_s30 }
 0x276   : > { %1274 = vrot.lane.b32.xlu1 %v3530_v2, %s3255_s23 }
 0x278   : > { %1406 = vrot.lane.b32.xlu0 %v3478_v9, %s3256_s30 }
 0x27a   : > { %1278 = vrot.lane.b32.xlu1 %v3542_v17, %s3255_s23  ;;  %s3259_s23 = smov 12  }
 0x29d   : > { %v883_v6 = vpop.xlane.xlu1 %882 }
 0x29e   : > { %v877_v8 = vpop.xlane.xlu0 %876  ;;  %v901_v11 = vsub.f32 %v3578_v29, %v883_v6 }
 0x29f   : > { %v899_v10 = vsub.f32 %v844_v32, %v877_v8  ;;  %v1107_v32 = vsel %vm778_vm2, %v1082_v5, 0 }
 0x2a0   : > { %v911_v20 = vmul.f32 1.442695, %v901_v11 }
 0x2a1   : > { %v907_v13 = vmul.f32 1.442695, %v899_v10  ;;  %v886_v14 = vpop.xlane.xlu1 %885 }
 0x2a2   : > { %v902_v15 = vsub.f32 %v855_v36, %v886_v14  ;;  %v880_v16 = vpop.xlane.xlu0 %879 }
 0x2a3   : > { %v900_v19 = vsub.f32 %v847_v40, %v880_v16  ;;  %3031 = vpow2.f32 %v907_v13 }
 0x2a4   : > { %v913_v22 = vmul.f32 1.442695, %v902_v15 }
 0x2a5   : > { %v909_v23 = vmul.f32 1.442695, %v900_v19  ;;  %v1086_v37 = vpop.permute.xlu1 %1085 }
 0x2a6   : > { %3033 = vpow2.f32 %v913_v22  ;;  %v1084_v34 = vpop.permute.xlu0 %1083  ;;  %v1113_v39 = vsel %vm778_vm2, %v1086_v37, 0 }
 0x2a7   : > { %3035 = vpow2.f32 %v909_v23  ;;  %v1110_v36 = vsel %vm778_vm2, %v1084_v34, 0 }
 0x2a8   : > { %3037 = vpow2.f32 %v911_v20 }
 0x2ad   : > { %v3636_v24 = vpop.eup %3031 }
 0x2b0   : > { %v3638_v25 = vpop.eup %3033 }
 0x2b1   : > { %v3640_v26 = vpop.eup %3035 }
 0x2b2   : > { %v3642_v27 = vpop.eup %3037  ;;  %v947_v28 = vpack.c.bf16 %v3640_v26, %v3636_v24 }
 0x2b3   : > { %v948_v29 = vpack.c.bf16 %v3638_v25, %v3642_v27 }
 0x2b4   : > { %2724 = vmatprep.mubr.msk.bf16.mxu0 %vm874_vm3, %v947_v28 }
 0x2b5   : > { %2725 = vmatmul.mubr.msk.bf16.vlgmr.msra.gmra.mrb[20].mxu0 %vm874_vm3, %v948_v29 }
 0x2b6   : > { %2733 = vmatpush3.bf16.xpose.msra.mxu0 %v1104_v31 }
 0x2b7   : > { %2874 = vmatprep.subr.msk.bf16.mxu0 %vm778_vm2, %v1082_v5 }
 0x2be   : > { %2735 = vmatpush3.bf16.xpose.msra.mxu0 %v1107_v32 }
 0x2bf   : > { %2875 = vmatprep.subr.msk.bf16.mxu0 %vm778_vm2, %v1084_v34  ;;  %v2529_v34 = vld [vmem:[%s3574_s28 + $0x28] sm:$0xff]  }
 0x2c6   : > { %2737 = vmatpush3.bf16.xpose.msra.mxu0 %v1110_v36 }
 0x2c7   : > { %2876 = vmatprep.subr.msk.bf16.mxu0 %vm778_vm2, %v1086_v37  ;;  %v2528_v37 = vld [vmem:[%s3574_s28 + $0x20] sm:$0xff]  }
 0x2ce   : > { %2739 = vmatpush3.bf16.xpose.msra.mxu0 %v1113_v39  ;;  %v2483_v39 = vunpack.c.l.bf16 %v2529_v34 }
 0x2d6   : > { %v889_v40 = vpop.xlane.xlu1 %888 }
 0x2d7   : > { %v895_v21 = vpop.xlane.xlu0 %894  ;;  %v903_v41 = vsub.f32 %v3591_v54, %v889_v40  ;;  %v2479_v40 = vunpack.c.l.bf16 %v2528_v37 }
 0x2d8   : > { %v905_v45 = vsub.f32 %v3593_v57, %v895_v21 }
 0x2d9   : > { %v915_v47 = vmul.f32 1.442695, %v903_v41  ;;  %v2480_v41 = vunpack.c.h.bf16 %v2528_v37 }
 0x2da   : > { %v898_v42 = vpop.xlane.xlu1 %897  ;;  %v919_v55 = vmul.f32 1.442695, %v905_v45 }
 0x2db   : > { %v906_v43 = vsub.f32 %v3595_v59, %v898_v42  ;;  %v1088_v44 = vpop.permute.xlu0 %1087  ;;  %3039 = vpow2.f32 %v915_v47 }
 0x2dc   : > { %2877 = vmatprep.subr.msk.bf16.mxu0 %vm778_vm2, %v1088_v44  ;;  %v1116_v46 = vsel %vm778_vm2, %v1088_v44, 0 }
 0x2dd   : > { %2741 = vmatpush3.bf16.xpose.msra.mxu0 %v1116_v46  ;;  %v921_v49 = vmul.f32 1.442695, %v906_v43  ;;  %v2484_v46 = vunpack.c.h.bf16 %v2529_v34 }
 0x2de   : > { %v892_v50 = vpop.xlane.xlu1 %891 }
 0x2df   : > { %v904_v52 = vsub.f32 %v3601_v0, %v892_v50  ;;  %v1066_v53 = vpop.permute.xlu0 %1065  ;;  %3041 = vpow2.f32 %v921_v49 }
 0x2e1   : > { %v917_v54 = vmul.f32 1.442695, %v904_v52 }
 0x2e2   : > { %v1090_v61 = vpop.permute.xlu1 %1089 }
 0x2e3   : > { %3043 = vpow2.f32 %v917_v54  ;;  %2878 = vmatprep.subr.msk.bf16.mxu0 %vm778_vm2, %v1090_v61  ;;  %v1070_v57 = vpop.permute.xlu0 %1069  ;;  %v1119_v59 = vsel %vm778_vm2, %v1090_v61, 0 }
 0x2e4   : > { %3045 = vpow2.f32 %v919_v55 }
 0x2e5   : > { %2743 = vmatpush3.bf16.xpose.msra.mxu0 %v1119_v59  ;;  %v3666_v0 = vpop.eup %3039 }
 0x2e6   : > { %v1068_v62 = vpop.permute.xlu1 %1067 }
 0x2e7   : > { %v1269_v63 = vpop.permute.xlu0 %1268 }
 0x2e8   : > { %2752 = vmatprep.subr.bf16.mxu1 %v1269_v63 }
 0x2e9   : > { %2753 = vmatpush3.bf16.msra.mxu1 %v1269_v63  ;;  %v3668_v1 = vpop.eup %3041  ;;  %v2531_v63 = vld [vmem:[%s3574_s28 + $0x38] sm:$0xff]  }
 0x2ea   : > { %v1072_v58 = vpop.permute.xlu1 %1071 }
 0x2eb   : > { %v1277_v15 = vpop.permute.xlu0 %1276 }
 0x2ed   : > { %v3670_v5 = vpop.eup %3043 }
 0x2ee   : > { %v3672_v6 = vpop.eup %3045  ;;  %v1271_v8 = vpop.permute.xlu1 %1270  ;;  %v949_v10 = vpack.c.bf16 %v3670_v5, %v3666_v0 }
 0x2ef   : > { %2754 = vmatprep.subr.bf16.mxu1 %v1271_v8  ;;  %v950_v11 = vpack.c.bf16 %v3668_v1, %v3672_v6  ;;  %v3683_v19 = vpop.permute.xlu0 %1404 }
 0x2f0   : > { %2728 = vmatprep.mubr.msk.bf16.mxu0 %vm874_vm3, %v949_v10  ;;  %2755 = vmatpush3.bf16.msra.mxu1 %v1271_v8  ;;  %v2530_v8 = vld [vmem:[%s3574_s28 + $0x30] sm:$0xff]  }
 0x2f1   : > { %2729 = vmatmul.mubr.msk.bf16.gmra.mrb[24].mxu0 %vm874_vm3, %v950_v11  ;;  %v2487_v11 = vunpack.c.l.bf16 %v2530_v8 }
 0x2f2   : > { %v1273_v13 = vpop.permute.xlu1 %1272  ;;  %2744 = vmatprep.mubr.msk.bf16.mxu0 %vm778_vm2, %v1066_v53 }
 0x2f3   : > { %2756 = vmatprep.subr.bf16.mxu1 %v1273_v13 }
 0x2f4   : > { %2757 = vmatpush3.bf16.msra.mxu1 %v1273_v13  ;;  %v2488_v13 = vunpack.c.h.bf16 %v2530_v8 }
 0x2f6   : > { %v1275_v14 = vpop.permute.xlu1 %1274 }
 0x2f7   : > { %2758 = vmatprep.subr.bf16.mxu1 %v1275_v14 }
 0x2f8   : > { %2759 = vmatpush3.bf16.msra.mxu1 %v1275_v14 }
 0x2f9   : > { %2745 = vmatmul.mubr.msk.bf16.vlgmr.msra.gmra.mrb[28].mxu0 %vm778_vm2, %v1068_v62  ;;  %2760 = vmatprep.subr.bf16.mxu1 %v1277_v15 }
 0x2fa   : > { %2748 = vmatprep.mubr.msk.bf16.mxu0 %vm778_vm2, %v1070_v57  ;;  %v1279_v16 = vpop.permute.xlu1 %1278 }
 0x2fc   : > { %2761 = vmatpush3.bf16.msra.mxu1 %v1277_v15  ;;  %v2492_v15 = vunpack.c.h.bf16 %v2531_v63 }
 0x2fd   : > { %2762 = vmatprep.subr.bf16.mxu1 %v1279_v16 }
 0x300   : > { %2763 = vmatpush3.bf16.msra.mxu1 %v1279_v16 }
 0x301   : > { %2749 = vmatmul.mubr.msk.bf16.gmra.mrb[32].mxu0 %vm778_vm2, %v1072_v58  ;;  %2879 = vmatprep.subr.msk.bf16.mxu1 %vm778_vm2, %v3683_v19  ;;  %v2491_v58 = vunpack.c.l.bf16 %v2531_v63 }
 0x388   : > { %v3688_v20 = vpop.f32.mrb[20].mxu0 }
 0x389   : > { %4232 = vst [vmem:[#allocation8_spill] sm:$0xff] %v3688_v20  ;;  %v3690_v22 = vpop.f32.mrb[21].mxu0 }
 0x38a   : > { %v3692_v23 = vpop.f32.mrb[22].mxu0 }
 0x38b   : > { %4233 = vst [vmem:[#allocation9_spill] sm:$0xff] %v3692_v23  ;;  %v3694_v28 = vpop.f32.mrb[23].mxu0 }
 0x38c   : > { %4234 = vst [vmem:[#allocation10_spill] sm:$0xff] %v3694_v28 }
 0x3c4   : > { %v3696_v29 = vpop.f32.mrb[24].mxu0 }
 0x3c5   : > { %4235 = vst [vmem:[#allocation11_spill] sm:$0xff] %v3696_v29  ;;  %v3698_v31 = vpop.f32.mrb[25].mxu0 }
 0x3c6   : > { %4236 = vst [vmem:[#allocation12_spill] sm:$0xff] %v3698_v31  ;;  %v3700_v32 = vpop.f32.mrb[26].mxu0 }
 0x3c7   : > { %4237 = vst [vmem:[#allocation13_spill] sm:$0xff] %v3700_v32  ;;  %v3703_v36 = vpop.f32.mrb[27].mxu0  ;;  %v2538_v32 = vld [vmem:[%s3574_s28 + $0x70] sm:$0xff]  }
 0x3c8   : > { %4238 = vst [vmem:[#allocation14_spill] sm:$0xff] %v3703_v36 }
 0x3cc   : > { %v2746_v21 = vpop.f32.mrb[28].mxu0 }
 0x3cd   : > { %v3706_v42 = vadd.f32 %v2746_v21, %v2483_v39  ;;  %v1155_v43 = vpop.f32.mrb[29].mxu0 }
 0x3ce   : > { %v2747_v44 = vpop.f32.mrb[30].mxu0  ;;  %v1156_v45 = vadd.f32 %v2479_v40, %v1155_v43 }
 0x3cf   : > { %v1158_v47 = vpop.f32.mrb[31].mxu0  ;;  %v1192_v49 = vsel %vm874_vm3, %v3706_v42, -inf  ;;  %v1167_v53 = vadd.f32 %v2747_v44, %v2484_v46 }
 0x3d0   : > { %v1159_v50 = vadd.f32 %v2480_v41, %v1158_v47  ;;  %1193 = vmax.xlane.f32.xlu0 %v1192_v49  ;;  %v1186_v55 = vsel %vm874_vm3, %v1156_v45, -inf  ;;  %v1407_v41 = vpop.permute.xlu0 %1406 }
 0x3d1   : > { %v1195_v62 = vsel %vm874_vm3, %v1167_v53, -inf }
 0x3d2   : > { %v1189_v52 = vsel %vm874_vm3, %v1159_v50, -inf }
 0x3d3   : > { %1190 = vmax.xlane.f32.xlu1 %v1189_v52 }
 0x3d4   : > { %1187 = vmax.xlane.f32.xlu0 %v1186_v55  ;;  %v2750_v54 = vpop.f32.mrb[32].mxu0 }
 0x3d5   : > { %v1171_v61 = vpop.f32.mrb[33].mxu0  ;;  %v3719_v10 = vadd.f32 %v2750_v54, %v2491_v58  ;;  %v1432_v58 = vsel %vm778_vm2, %v1407_v41, 0 }
 0x3d6   : > { %v2751_v57 = vpop.f32.mrb[34].mxu0  ;;  %v3721_v14 = vadd.f32 %v2487_v11, %v1171_v61 }
 0x3d7   : > { %v1174_v59 = vpop.f32.mrb[35].mxu0  ;;  %v1204_v16 = vsel %vm874_vm3, %v3719_v10, -inf  ;;  %v3727_v37 = vadd.f32 %v2751_v57, %v2492_v15 }
 0x3d8   : > { %1196 = vmax.xlane.f32.xlu0 %v1195_v62  ;;  %v3725_v34 = vadd.f32 %v2488_v13, %v1174_v59  ;;  %v1198_v39 = vsel %vm874_vm3, %v3721_v14, -inf }
 0x3d9   : > { %v1207_v21 = vsel %vm874_vm3, %v3727_v37, -inf }
 0x3da   : > { %v1201_v40 = vsel %vm874_vm3, %v3725_v34, -inf }
 0x3e4   : > { %1408 = vrot.lane.b32.xlu1 %v3507_v38, %s3256_s30 }
 0x3ee   : > { %1410 = vrot.lane.b32.xlu0 %v3505_v35, %s3256_s30 }
 0x408   : > { %1205 = vmax.xlane.f32.xlu1 %v1204_v16 }
 0x40c   : > { %1199 = vmax.xlane.f32.xlu1 %v1198_v39 }
 0x40d   : > { %1202 = vmax.xlane.f32.xlu0 %v1201_v40 }
 0x410   : > { %1208 = vmax.xlane.f32.xlu1 %v1207_v21 }
 0x421   : > { %1414 = vrot.lane.b32.xlu1 %v3522_v56, %s3256_s30 }
 0x423   : > { %1412 = vrot.lane.b32.xlu0 %v3525_v60, %s3256_s30 }
 0x425   : > { %1398 = vrot.lane.b32.xlu1 %v3472_v4, %s3256_s30 }
 0x427   : > { %1396 = vrot.lane.b32.xlu0 %v3476_v7, %s3256_s30 }
 0x429   : > { %1402 = vrot.lane.b32.xlu1 %v3497_v30, %s3256_s30 }
 0x42b   : > { %1400 = vrot.lane.b32.xlu0 %v3503_v33, %s3256_s30 }
 0x42d   : > { %1589 = vrot.lane.b32.xlu1 %v3512_v48, %s3256_s30 }
 0x42f   : > { %1587 = vrot.lane.b32.xlu0 %v3517_v51, %s3256_s30 }
 0x431   : > { %1591 = vrot.lane.b32.xlu1 %v3535_v3, %s3256_s30 }
 0x433   : > { %1595 = vrot.lane.b32.xlu0 %v3547_v18, %s3256_s30 }
 0x435   : > { %1593 = vrot.lane.b32.xlu1 %v3530_v2, %s3256_s30 }
 0x437   : > { %1723 = vrot.lane.b32.xlu0 %v3480_v12, %s3257_s12 }
 0x439   : > { %1597 = vrot.lane.b32.xlu1 %v3542_v17, %s3256_s30  ;;  %s379_s30 = sand.u32 1, %s3229_s14  }
 0x43a   : > { %s4158_s17 = scalar_lea.sflag [#allocation3], %s379_s30 }
 0x43b   : > { %1725 = vrot.lane.b32.xlu0 %v3478_v9, %s3257_s12 }
 0x45d   : > { %v1194_v43 = vpop.xlane.xlu0 %1193 }
 0x45e   : > { %v1212_v46 = vsub.f32 %v3706_v42, %v1194_v43 }
 0x460   : > { %v1191_v44 = vpop.xlane.xlu1 %1190  ;;  %v1222_v61 = vmul.f32 1.442695, %v1212_v46 }
 0x461   : > { %v1211_v47 = vsub.f32 %v1159_v50, %v1191_v44  ;;  %v1188_v49 = vpop.xlane.xlu0 %1187 }
 0x462   : > { %v1210_v52 = vsub.f32 %v1156_v45, %v1188_v49 }
 0x463   : > { %v1220_v55 = vmul.f32 1.442695, %v1211_v47 }
 0x464   : > { %v1218_v54 = vmul.f32 1.442695, %v1210_v52  ;;  %v1409_v8 = vpop.permute.xlu1 %1408 }
 0x465   : > { %3047 = vpow2.f32 %v1220_v55  ;;  %v1197_v57 = vpop.xlane.xlu0 %1196  ;;  %v1435_v11 = vsel %vm778_vm2, %v1409_v8, 0 }
 0x466   : > { %3049 = vpow2.f32 %v1218_v54  ;;  %v1213_v12 = vsub.f32 %v1167_v53, %v1197_v57  ;;  %v1429_v53 = vsel %vm778_vm2, %v3683_v19, 0 }
 0x467   : > { %3051 = vpow2.f32 %v1222_v61 }
 0x468   : > { %v1224_v59 = vmul.f32 1.442695, %v1213_v12 }
 0x469   : > { %v1411_v13 = vpop.permute.xlu0 %1410 }
 0x46a   : > { %3053 = vpow2.f32 %v1224_v59  ;;  %v1438_v15 = vsel %vm778_vm2, %v1411_v13, 0 }
 0x46f   : > { %v3764_v62 = vpop.eup %3047 }
 0x470   : > { %v3766_v9 = vpop.eup %3049 }
 0x471   : > { %v1258_v42 = vpack.c.bf16 %v3764_v62, %v3766_v9  ;;  %v3770_v50 = vpop.eup %3051 }
 0x473   : > { %2764 = vmatprep.mubr.msk.bf16.mxu1 %vm874_vm3, %v1258_v42 }
 0x474   : > { %v3773_v45 = vpop.eup %3053 }
 0x475   : > { %v1259_v63 = vpack.c.bf16 %v3773_v45, %v3770_v50 }
 0x477   : > { %2765 = vmatmul.mubr.msk.bf16.vlgmr.msra.gmra.mrb[20].mxu1 %vm874_vm3, %v1259_v63 }
 0x478   : > { %2773 = vmatpush3.bf16.xpose.msra.mxu1 %v1429_v53 }
 0x479   : > { %2880 = vmatprep.subr.msk.bf16.mxu1 %vm778_vm2, %v1407_v41 }
 0x480   : > { %2775 = vmatpush3.bf16.xpose.msra.mxu1 %v1432_v58 }
 0x481   : > { %2881 = vmatprep.subr.msk.bf16.mxu1 %vm778_vm2, %v1409_v8 }
 0x488   : > { %2777 = vmatpush3.bf16.xpose.msra.mxu1 %v1435_v11 }
 0x489   : > { %2882 = vmatprep.subr.msk.bf16.mxu1 %vm778_vm2, %v1411_v13 }
 0x490   : > { %2779 = vmatpush3.bf16.xpose.msra.mxu1 %v1438_v15 }
 0x495   : > { %v1206_v16 = vpop.xlane.xlu1 %1205 }
 0x496   : > { %v1216_v19 = vsub.f32 %v3719_v10, %v1206_v16 }
 0x498   : > { %v1230_v44 = vmul.f32 1.442695, %v1216_v19 }
 0x499   : > { %v1200_v39 = vpop.xlane.xlu1 %1199 }
 0x49a   : > { %v1214_v40 = vsub.f32 %v3721_v14, %v1200_v39  ;;  %v1203_v21 = vpop.xlane.xlu0 %1202 }
 0x49b   : > { %v1215_v41 = vsub.f32 %v3725_v34, %v1203_v21 }
 0x49c   : > { %v1226_v43 = vmul.f32 1.442695, %v1214_v40 }
 0x49d   : > { %v1228_v46 = vmul.f32 1.442695, %v1215_v41  ;;  %v1209_v47 = vpop.xlane.xlu1 %1208 }
 0x49e   : > { %3055 = vpow2.f32 %v1226_v43  ;;  %v1217_v49 = vsub.f32 %v3727_v37, %v1209_v47  ;;  %v1413_v52 = vpop.permute.xlu0 %1412 }
 0x49f   : > { %3057 = vpow2.f32 %v1228_v46  ;;  %v1441_v55 = vsel %vm778_vm2, %v1413_v52, 0  ;;  %2883 = vmatprep.subr.msk.bf16.mxu1 %vm778_vm2, %v1413_v52 }
 0x4a0   : > { %v1232_v10 = vmul.f32 1.442695, %v1217_v49  ;;  %2781 = vmatpush3.bf16.xpose.msra.mxu1 %v1441_v55  ;;  %3059 = vpow2.f32 %v1230_v44  ;;  %v2533_v49 = vld [vmem:[%s3574_s28 + $0x48] sm:$0xff]   ;;  %v2532_v55 = vld [vmem:[%s3574_s28 + $0x40] sm:$0xff]  }
 0x4a1   : > { %v1415_v14 = vpop.permute.xlu1 %1414 }
 0x4a2   : > { %3061 = vpow2.f32 %v1232_v10  ;;  %2884 = vmatprep.subr.msk.bf16.mxu1 %vm778_vm2, %v1415_v14  ;;  %v1397_v34 = vpop.permute.xlu0 %1396  ;;  %v1444_v57 = vsel %vm778_vm2, %v1415_v14, 0  ;;  %v2499_v10 = vunpack.c.l.bf16 %v2533_v49  ;;  %v2495_v14 = vunpack.c.l.bf16 %v2532_v55 }
 0x4a5   : > { %v1399_v54 = vpop.permute.xlu1 %1398 }
 0x4a6   : > { %v1401_v61 = vpop.permute.xlu0 %1400 }
 0x4a8   : > { %v3794_v12 = vpop.eup %3055  ;;  %2783 = vmatpush3.bf16.xpose.msra.mxu1 %v1444_v57 }
 0x4a9   : > { %v3796_v37 = vpop.eup %3057  ;;  %v1403_v59 = vpop.permute.xlu1 %1402 }
 0x4aa   : > { %v1588_v42 = vpop.permute.xlu0 %1587  ;;  %v1260_v63 = vpack.c.bf16 %v3796_v37, %v3794_v12  ;;  %v3800_v53 = vpop.eup %3059 }
 0x4ab   : > { %2792 = vmatprep.subr.bf16.mxu0 %v1588_v42 }
 0x4ac   : > { %v3802_v58 = vpop.eup %3061  ;;  %2768 = vmatprep.mubr.msk.bf16.mxu1 %vm874_vm3, %v1260_v63  ;;  %2793 = vmatpush3.bf16.msra.mxu0 %v1588_v42  ;;  %v2500_v63 = vunpack.c.h.bf16 %v2533_v49 }
 0x4ad   : > { %v1590_v8 = vpop.permute.xlu1 %1589  ;;  %v1261_v11 = vpack.c.bf16 %v3802_v58, %v3800_v53 }
 0x4ae   : > { %2794 = vmatprep.subr.bf16.mxu0 %v1590_v8  ;;  %v1596_v16 = vpop.permute.xlu0 %1595 }
 0x4af   : > { %2769 = vmatmul.mubr.msk.bf16.gmra.mrb[24].mxu1 %vm874_vm3, %v1261_v11 }
 0x4b0   : > { %2784 = vmatprep.mubr.msk.bf16.mxu1 %vm778_vm2, %v1397_v34  ;;  %2795 = vmatpush3.bf16.msra.mxu0 %v1590_v8 }
 0x4b1   : > { %v1592_v13 = vpop.permute.xlu1 %1591 }
 0x4b2   : > { %2796 = vmatprep.subr.bf16.mxu0 %v1592_v13  ;;  %v3812_v39 = vpop.permute.xlu0 %1723 }
 0x4b4   : > { %2797 = vmatpush3.bf16.msra.mxu0 %v1592_v13 }
 0x4b5   : > { %v1594_v15 = vpop.permute.xlu1 %1593 }
 0x4b6   : > { %2798 = vmatprep.subr.bf16.mxu0 %v1594_v15 }
 0x4b7   : > { %2785 = vmatmul.mubr.msk.bf16.vlgmr.msra.gmra.mrb[28].mxu1 %vm778_vm2, %v1399_v54  ;;  %v2496_v54 = vunpack.c.h.bf16 %v2532_v55 }
 0x4b8   : > { %2788 = vmatprep.mubr.msk.bf16.mxu1 %vm778_vm2, %v1401_v61  ;;  %2799 = vmatpush3.bf16.msra.mxu0 %v1594_v15 }
 0x4b9   : > { %2800 = vmatprep.subr.bf16.mxu0 %v1596_v16  ;;  %v1598_v19 = vpop.permute.xlu1 %1597 }
 0x4bc   : > { %2801 = vmatpush3.bf16.msra.mxu0 %v1596_v16 }
 0x4bd   : > { %2802 = vmatprep.subr.bf16.mxu0 %v1598_v19 }
 0x4bf   : > { %2789 = vmatmul.mubr.msk.bf16.gmra.mrb[32].mxu1 %vm778_vm2, %v1403_v59 }
 0x4c0   : > { %2803 = vmatpush3.bf16.msra.mxu0 %v1598_v19 }
 0x4c1   : > { %2885 = vmatprep.subr.msk.bf16.mxu0 %vm778_vm2, %v3812_v39 }
 0x54a   : > { %v3816_v40 = vpop.f32.mrb[20].mxu1 }
 0x54b   : > { %v3818_v21 = vpop.f32.mrb[21].mxu1 }
 0x54c   : > { %v3820_v41 = vpop.f32.mrb[22].mxu1 }
 0x54d   : > { %v3822_v43 = vpop.f32.mrb[23].mxu1 }
 0x582   : > { %v3824_v44 = vpop.f32.mrb[24].mxu1 }
 0x583   : > { %v3826_v46 = vpop.f32.mrb[25].mxu1 }
 0x584   : > { %v3828_v47 = vpop.f32.mrb[26].mxu1 }
 0x585   : > { %v3831_v52 = vpop.f32.mrb[27].mxu1 }
 0x58a   : > { %v2786_v34 = vpop.f32.mrb[28].mxu1 }
 0x58b   : > { %v1489_v61 = vadd.f32 %v2786_v34, %v2499_v10  ;;  %v1480_v57 = vpop.f32.mrb[29].mxu1 }
 0x58c   : > { %v2787_v59 = vpop.f32.mrb[30].mxu1  ;;  %v1481_v42 = vadd.f32 %v2495_v14, %v1480_v57  ;;  %v2535_v14 = vld [vmem:[%s3574_s28 + $0x58] sm:$0xff]   ;;  %v2534_v57 = vld [vmem:[%s3574_s28 + $0x50] sm:$0xff]  }
 0x58d   : > { %v1483_v8 = vpop.f32.mrb[31].mxu1  ;;  %v1517_v11 = vsel %vm874_vm3, %v1489_v61, -inf  ;;  %v1492_v16 = vadd.f32 %v2787_v59, %v2500_v63  ;;  %v2503_v63 = vunpack.c.l.bf16 %v2534_v57 }
 0x58e   : > { %v1484_v13 = vadd.f32 %v2496_v54, %v1483_v8  ;;  %1518 = vmax.xlane.f32.xlu0 %v1517_v11  ;;  %v1511_v19 = vsel %vm874_vm3, %v1481_v42, -inf  ;;  %v2507_v54 = vunpack.c.l.bf16 %v2535_v14  ;;  %v2504_v8 = vunpack.c.h.bf16 %v2534_v57 }
 0x58f   : > { %v1520_v49 = vsel %vm874_vm3, %v1492_v16, -inf }
 0x590   : > { %v1514_v15 = vsel %vm874_vm3, %v1484_v13, -inf }
 0x591   : > { %1515 = vmax.xlane.f32.xlu1 %v1514_v15  ;;  %v2508_v15 = vunpack.c.h.bf16 %v2535_v14 }
 0x592   : > { %1512 = vmax.xlane.f32.xlu0 %v1511_v19  ;;  %v2790_v55 = vpop.f32.mrb[32].mxu1 }
 0x593   : > { %v1496_v10 = vpop.f32.mrb[33].mxu1  ;;  %v3844_v59 = vadd.f32 %v2790_v55, %v2507_v54 }
 0x594   : > { %v2791_v34 = vpop.f32.mrb[34].mxu1  ;;  %v3846_v11 = vadd.f32 %v2503_v63, %v1496_v10 }
 0x595   : > { %v1499_v29 = vpop.f32.mrb[35].mxu1  ;;  %v1529_v19 = vsel %vm874_vm3, %v3844_v59, -inf }
 0x596   : > { %1521 = vmax.xlane.f32.xlu0 %v1520_v49  ;;  %v3850_v49 = vadd.f32 %v2504_v8, %v1499_v29 }
 0x598   : > { %v1526_v55 = vsel %vm874_vm3, %v3850_v49, -inf }
 0x5a2   : > { %1727 = vrot.lane.b32.xlu1 %v3507_v38, %s3257_s12  ;;  %v3852_v38 = vadd.f32 %v2791_v34, %v2508_v15 }
 0x5a4   : > { %v1532_v10 = vsel %vm874_vm3, %v3852_v38, -inf }
 0x5ac   : > { %1729 = vrot.lane.b32.xlu0 %v3505_v35, %s3257_s12  ;;  %v1523_v35 = vsel %vm874_vm3, %v3846_v11, -inf }
 0x5c6   : > { %1530 = vmax.xlane.f32.xlu1 %v1529_v19 }
 0x5ca   : > { %1524 = vmax.xlane.f32.xlu1 %v1523_v35 }
 0x5cb   : > { %1527 = vmax.xlane.f32.xlu0 %v1526_v55 }
 0x5ce   : > { %1533 = vmax.xlane.f32.xlu1 %v1532_v10 }
 0x5df   : > { %1733 = vrot.lane.b32.xlu1 %v3522_v56, %s3257_s12 }
 0x5e1   : > { %1731 = vrot.lane.b32.xlu0 %v3525_v60, %s3257_s12 }
 0x5e3   : > { %1717 = vrot.lane.b32.xlu1 %v3472_v4, %s3257_s12  ;;  %v1726_v4 = vpop.permute.xlu0 %1725 }
 0x5e4   : > { %v1751_v8 = vsel %vm778_vm2, %v1726_v4, 0 }
 0x5e5   : > { %1715 = vrot.lane.b32.xlu0 %v3476_v7, %s3257_s12 }
 0x5e7   : > { %1721 = vrot.lane.b32.xlu1 %v3497_v30, %s3257_s12 }
 0x5e9   : > { %1719 = vrot.lane.b32.xlu0 %v3503_v33, %s3257_s12 }
 0x5eb   : > { %1908 = vrot.lane.b32.xlu1 %v3512_v48, %s3257_s12 }
 0x5ed   : > { %1906 = vrot.lane.b32.xlu0 %v3517_v51, %s3257_s12 }
 0x5ef   : > { %1912 = vrot.lane.b32.xlu1 %v3530_v2, %s3257_s12 }
 0x5f1   : > { %1910 = vrot.lane.b32.xlu0 %v3535_v3, %s3257_s12 }
 0x61b   : > { %v1519_v7 = vpop.xlane.xlu0 %1518 }
 0x61c   : > { %v1537_v60 = vsub.f32 %v1489_v61, %v1519_v7 }
 0x61e   : > { %v1516_v56 = vpop.xlane.xlu1 %1515  ;;  %v1547_v54 = vmul.f32 1.442695, %v1537_v60 }
 0x61f   : > { %v1536_v30 = vsub.f32 %v1484_v13, %v1516_v56  ;;  %v1513_v29 = vpop.xlane.xlu0 %1512 }
 0x620   : > { %v1535_v34 = vsub.f32 %v1481_v42, %v1513_v29 }
 0x621   : > { %v1545_v33 = vmul.f32 1.442695, %v1536_v30 }
 0x622   : > { %v1543_v14 = vmul.f32 1.442695, %v1535_v34  ;;  %v1728_v15 = vpop.permute.xlu1 %1727 }
 0x623   : > { %3063 = vpow2.f32 %v1545_v33  ;;  %v1522_v48 = vpop.xlane.xlu0 %1521  ;;  %v1754_v19 = vsel %vm778_vm2, %v1728_v15, 0 }
 0x624   : > { %3065 = vpow2.f32 %v1543_v14  ;;  %v1538_v51 = vsub.f32 %v1492_v16, %v1522_v48  ;;  %v1748_v16 = vsel %vm778_vm2, %v3812_v39, 0 }
 0x625   : > { %3067 = vpow2.f32 %v1547_v54 }
 0x626   : > { %v1549_v57 = vmul.f32 1.442695, %v1538_v51 }
 0x627   : > { %v1730_v35 = vpop.permute.xlu0 %1729 }
 0x628   : > { %3069 = vpow2.f32 %v1549_v57  ;;  %v1757_v55 = vsel %vm778_vm2, %v1730_v35, 0 }
 0x62d   : > { %v3880_v2 = vpop.eup %3063 }
 0x62e   : > { %v3882_v3 = vpop.eup %3065 }
 0x62f   : > { %v1583_v61 = vpack.c.bf16 %v3880_v2, %v3882_v3  ;;  %v3886_v13 = vpop.eup %3067 }
 0x631   : > { %2804 = vmatprep.mubr.msk.bf16.mxu0 %vm874_vm3, %v1583_v61 }
 0x632   : > { %v3889_v42 = vpop.eup %3069 }
 0x633   : > { %v1584_v63 = vpack.c.bf16 %v3889_v42, %v3886_v13 }
 0x635   : > { %2805 = vmatmul.mubr.msk.bf16.vlgmr.msra.gmra.mrb[36].mxu0 %vm874_vm3, %v1584_v63 }
 0x636   : > { %2813 = vmatpush3.bf16.xpose.msra.mxu0 %v1748_v16 }
 0x637   : > { %2886 = vmatprep.subr.msk.bf16.mxu0 %vm778_vm2, %v1726_v4 }
 0x63e   : > { %2815 = vmatpush3.bf16.xpose.msra.mxu0 %v1751_v8 }
 0x63f   : > { %2887 = vmatprep.subr.msk.bf16.mxu0 %vm778_vm2, %v1728_v15 }
 0x646   : > { %2817 = vmatpush3.bf16.xpose.msra.mxu0 %v1754_v19 }
 0x647   : > { %2888 = vmatprep.subr.msk.bf16.mxu0 %vm778_vm2, %v1730_v35 }
 0x64e   : > { %2819 = vmatpush3.bf16.xpose.msra.mxu0 %v1757_v55 }
 0x653   : > { %v1531_v39 = vpop.xlane.xlu1 %1530 }
 0x654   : > { %v1541_v10 = vsub.f32 %v3844_v59, %v1531_v39 }
 0x656   : > { %v1555_v29 = vmul.f32 1.442695, %v1541_v10 }
 0x657   : > { %v1525_v7 = vpop.xlane.xlu1 %1524 }
 0x658   : > { %v1539_v56 = vsub.f32 %v3846_v11, %v1525_v7  ;;  %v1528_v4 = vpop.xlane.xlu0 %1527 }
 0x659   : > { %v1540_v60 = vsub.f32 %v3850_v49, %v1528_v4 }
 0x65a   : > { %v1551_v30 = vmul.f32 1.442695, %v1539_v56 }
 0x65b   : > { %v1553_v34 = vmul.f32 1.442695, %v1540_v60  ;;  %v1534_v33 = vpop.xlane.xlu1 %1533 }
 0x65c   : > { %3071 = vpow2.f32 %v1551_v30  ;;  %v1542_v14 = vsub.f32 %v3852_v38, %v1534_v33  ;;  %v1732_v54 = vpop.permute.xlu0 %1731 }
 0x65d   : > { %3073 = vpow2.f32 %v1553_v34  ;;  %v1760_v48 = vsel %vm778_vm2, %v1732_v54, 0  ;;  %2889 = vmatprep.subr.msk.bf16.mxu0 %vm778_vm2, %v1732_v54 }
 0x65e   : > { %v1557_v59 = vmul.f32 1.442695, %v1542_v14  ;;  %2821 = vmatpush3.bf16.xpose.msra.mxu0 %v1760_v48  ;;  %3075 = vpow2.f32 %v1555_v29  ;;  %v2537_v14 = vld [vmem:[%s3574_s28 + $0x68] sm:$0xff]   ;;  %v2536_v48 = vld [vmem:[%s3574_s28 + $0x60] sm:$0xff]  }
 0x65f   : > { %v1734_v11 = vpop.permute.xlu1 %1733 }
 0x660   : > { %3077 = vpow2.f32 %v1557_v59  ;;  %2890 = vmatprep.subr.msk.bf16.mxu0 %vm778_vm2, %v1734_v11  ;;  %v1716_v49 = vpop.permute.xlu0 %1715  ;;  %v1763_v61 = vsel %vm778_vm2, %v1734_v11, 0  ;;  %v2515_v59 = vunpack.c.l.bf16 %v2537_v14  ;;  %v2511_v11 = vunpack.c.l.bf16 %v2536_v48 }
 0x663   : > { %v1718_v51 = vpop.permute.xlu1 %1717 }
 0x664   : > { %v1720_v57 = vpop.permute.xlu0 %1719 }
 0x666   : > { %v3910_v63 = vpop.eup %3071  ;;  %2823 = vmatpush3.bf16.xpose.msra.mxu0 %v1763_v61 }
 0x667   : > { %v3912_v38 = vpop.eup %3073  ;;  %v1722_v16 = vpop.permute.xlu1 %1721 }
 0x668   : > { %v1907_v8 = vpop.permute.xlu0 %1906  ;;  %v1585_v15 = vpack.c.bf16 %v3912_v38, %v3910_v63  ;;  %v3916_v19 = vpop.eup %3075 }
 0x669   : > { %2832 = vmatprep.subr.bf16.mxu1 %v1907_v8 }
 0x66a   : > { %v3918_v35 = vpop.eup %3077  ;;  %2808 = vmatprep.mubr.msk.bf16.mxu0 %vm874_vm3, %v1585_v15  ;;  %2833 = vmatpush3.bf16.msra.mxu1 %v1907_v8  ;;  %v2539_v8 = vld [vmem:[%s3574_s28 + $0x78] sm:$0xff]   ;;  %s3260_s28 = smov 18  }
 0x66b   : > { %v1909_v55 = vpop.permute.xlu1 %1908  ;;  %v1586_v39 = vpack.c.bf16 %v3918_v35, %v3916_v19  ;;  %v2523_v36 = vunpack.c.l.bf16 %v2539_v8 }
 0x66c   : > { %2834 = vmatprep.subr.bf16.mxu1 %v1909_v55  ;;  %v1911_v10 = vpop.permute.xlu0 %1910 }
 0x66d   : > { %2809 = vmatmul.mubr.msk.bf16.gmra.mrb[40].mxu0 %vm874_vm3, %v1586_v39 }
 0x66e   : > { %2824 = vmatprep.mubr.msk.bf16.mxu0 %vm778_vm2, %v1716_v49  ;;  %2835 = vmatpush3.bf16.msra.mxu1 %v1909_v55  ;;  %v2516_v55 = vunpack.c.h.bf16 %v2537_v14  ;;  %v2524_v14 = vunpack.c.h.bf16 %v2539_v8 }
 0x66f   : > { %2836 = vmatprep.subr.bf16.mxu1 %v1911_v10  ;;  %v1913_v7 = vpop.permute.xlu1 %1912 }
 0x672   : > { %2837 = vmatpush3.bf16.msra.mxu1 %v1911_v10 }
 0x673   : > { %2838 = vmatprep.subr.bf16.mxu1 %v1913_v7 }
 0x675   : > { %2825 = vmatmul.mubr.msk.bf16.vlgmr.msra.gmra.mrb[44].mxu0 %vm778_vm2, %v1718_v51  ;;  %v2512_v51 = vunpack.c.h.bf16 %v2536_v48 }
 0x676   : > { %2828 = vmatprep.mubr.msk.bf16.mxu0 %vm778_vm2, %v1720_v57  ;;  %2839 = vmatpush3.bf16.msra.mxu1 %v1913_v7 }
 0x67d   : > { %2829 = vmatmul.mubr.msk.bf16.gmra.mrb[48].mxu0 %vm778_vm2, %v1722_v16 }
 0x708   : > { %v3928_v56 = vpop.f32.mrb[36].mxu0 }
 0x709   : > { %v3930_v4 = vpop.f32.mrb[37].mxu0 }
 0x70a   : > { %v3932_v60 = vpop.f32.mrb[38].mxu0 }
 0x70b   : > { %v3934_v30 = vpop.f32.mrb[39].mxu0 }
 0x740   : > { %v3936_v29 = vpop.f32.mrb[40].mxu0 }
 0x741   : > { %v3938_v34 = vpop.f32.mrb[41].mxu0 }
 0x742   : > { %v3940_v33 = vpop.f32.mrb[42].mxu0 }
 0x743   : > { %v3943_v54 = vpop.f32.mrb[43].mxu0 }
 0x748   : > { %v2826_v49 = vpop.f32.mrb[44].mxu0 }
 0x749   : > { %v3946_v57 = vadd.f32 %v2826_v49, %v2515_v59  ;;  %v1799_v61 = vpop.f32.mrb[45].mxu0  ;;  %v2519_v49 = vunpack.c.l.bf16 %v2538_v32 }
 0x74a   : > { %v2827_v16 = vpop.f32.mrb[46].mxu0  ;;  %v3949_v15 = vadd.f32 %v2511_v11, %v1799_v61 }
 0x74b   : > { %v1802_v39 = vpop.f32.mrb[47].mxu0  ;;  %v1836_v10 = vsel %vm874_vm3, %v3946_v57, -inf  ;;  %v3958_v59 = vadd.f32 %v2827_v16, %v2516_v55 }
 0x74c   : > { %v3953_v7 = vadd.f32 %v2512_v51, %v1802_v39  ;;  %1837 = vmax.xlane.f32.xlu0 %v1836_v10  ;;  %v1830_v11 = vsel %vm874_vm3, %v3949_v15, -inf  ;;  %v2520_v10 = vunpack.c.h.bf16 %v2538_v32 }
 0x74d   : > { %v1839_v16 = vsel %vm874_vm3, %v3958_v59, -inf }
 0x74e   : > { %v1833_v48 = vsel %vm874_vm3, %v3953_v7, -inf }
 0x74f   : > { %1834 = vmax.xlane.f32.xlu1 %v1833_v48 }
 0x750   : > { %1831 = vmax.xlane.f32.xlu0 %v1830_v11  ;;  %v2830_v61 = vpop.f32.mrb[48].mxu0  ;;  %v1237_v11 = vsel %vm874_vm3, %v3764_v62, 0.0  ;;  %v1249_v62 = vsel %vm874_vm3, %v3796_v37, 0.0  ;;  %v1571_v37 = vsel %vm874_vm3, %v3910_v63, 0.0 }
 0x751   : > { %v3962_v31 = vadd.f32 %v2830_v61, %v2523_v36  ;;  %v1815_v51 = vpop.f32.mrb[49].mxu0 }
 0x752   : > { %v2831_v39 = vpop.f32.mrb[50].mxu0  ;;  %v3964_v20 = vadd.f32 %v2519_v49, %v1815_v51  ;;  %v1240_v49 = vsel %vm874_vm3, %v3770_v50, 0.0  ;;  %v1565_v50 = vsel %vm874_vm3, %v3886_v13, 0.0 }
 0x753   : > { %v3966_v23 = vadd.f32 %v2831_v39, %v2524_v14  ;;  %v1818_v28 = vpop.f32.mrb[51].mxu0  ;;  %v1848_v55 = vsel %vm874_vm3, %v3962_v31, -inf  ;;  %v1562_v14 = vsel %vm874_vm3, %v3880_v2, 0.0  ;;  %v1246_v2 = vsel %vm874_vm3, %v3794_v12, 0.0 }
 0x754   : > { %1840 = vmax.xlane.f32.xlu0 %v1839_v16  ;;  %1849 = vmax.xlane.f32.xlu1 %v1848_v55  ;;  %v3972_v8 = vadd.f32 %v2520_v10, %v1818_v28  ;;  %v1842_v32 = vsel %vm874_vm3, %v3964_v20, -inf  ;;  %v1234_v28 = vsel %vm874_vm3, %v3766_v9, 0.0  ;;  %v1559_v9 = vsel %vm874_vm3, %v3882_v3, 0.0 }
 0x755   : > { %v1851_v36 = vsel %vm874_vm3, %v3966_v23, -inf  ;;  %v1574_v3 = vsel %vm874_vm3, %v3912_v38, 0.0 }
 0x756   : > { %v1845_v48 = vsel %vm874_vm3, %v3972_v8, -inf }
 0x758   : > { %1852 = vmax.xlane.f32.xlu1 %v1851_v36  ;;  %1843 = vmax.xlane.f32.xlu0 %v1842_v32 }
 0x75c   : > { %1846 = vmax.xlane.f32.xlu1 %v1845_v48 }
 0x76d   : > { %1916 = vrot.lane.b32.xlu1 %v3542_v17, %s3257_s12  ;;  %v1243_v17 = vsel %vm874_vm3, %v3773_v45, 0.0  ;;  %v1255_v45 = vsel %vm874_vm3, %v3802_v58, 0.0 }
 0x76e   : > { %1914 = vrot.lane.b32.xlu0 %v3547_v18, %s3257_s12  ;;  %v1568_v18 = vsel %vm874_vm3, %v3889_v42, 0.0  ;;  %v1252_v42 = vsel %vm874_vm3, %v3800_v53, 0.0  ;;  %s2356_s12 = sshll.u32 %s379_s30, 6 }
 0x76f   : > { %s381_s22 = scalar_lea.vmem [#allocation2], %s2356_s12  ;;  %s4149_s12 = scalar_lea.hbm %s4220_s10, %s2453_s29 }
 0x770   : > { %s2259_s24 = sshll.u32 %s381_s22, 4  ;;  %s4151_s24 = int_to_ptr.vmem [resolvable:$true] %s2259_s24 }
 0x78d   : > { %1235 = vadd.xlane.f32.xlu0 %v1234_v28 }
 0x791   : > { %1238 = vadd.xlane.f32.xlu1 %v1237_v11  ;;  %1241 = vadd.xlane.f32.xlu0 %v1240_v49 }
 0x795   : > { %1563 = vadd.xlane.f32.xlu1 %v1562_v14  ;;  %1244 = vadd.xlane.f32.xlu0 %v1243_v17 }
 0x799   : > { %1569 = vadd.xlane.f32.xlu1 %v1568_v18  ;;  %1560 = vadd.xlane.f32.xlu0 %v1559_v9 }
 0x79d   : > { %1250 = vadd.xlane.f32.xlu1 %v1249_v62  ;;  %1566 = vadd.xlane.f32.xlu0 %v1565_v50 }
 0x7a1   : > { %1256 = vadd.xlane.f32.xlu1 %v1255_v45  ;;  %1247 = vadd.xlane.f32.xlu0 %v1246_v2  ;;  %v1577_v2 = vsel %vm874_vm3, %v3916_v19, 0.0  ;;  %v1580_v19 = vsel %vm874_vm3, %v3918_v35, 0.0  ;;  %v929_v35 = vsel %vm874_vm3, %v3642_v27, 0.0  ;;  %v938_v27 = vsel %vm874_vm3, %v3670_v5, 0.0 }
 0x7a5   : > { %1575 = vadd.xlane.f32.xlu1 %v1574_v3  ;;  %1253 = vadd.xlane.f32.xlu0 %v1252_v42 }
 0x7a9   : > { %1572 = vadd.xlane.f32.xlu0 %v1571_v37 }
 0x7d9   : > { %v1838_v13 = vpop.xlane.xlu0 %1837 }
 0x7da   : > { %v1856_v58 = vsub.f32 %v3946_v57, %v1838_v13 }
 0x7dc   : > { %v1866_v61 = vmul.f32 1.442695, %v1856_v58  ;;  %v1835_v51 = vpop.xlane.xlu1 %1834 }
 0x7dd   : > { %v1855_v12 = vsub.f32 %v3953_v7, %v1835_v51  ;;  %v1832_v39 = vpop.xlane.xlu0 %1831 }
 0x7de   : > { %3079 = vpow2.f32 %v1866_v61  ;;  %v1854_v38 = vsub.f32 %v3949_v15, %v1832_v39 }
 0x7df   : > { %v1864_v10 = vmul.f32 1.442695, %v1855_v12 }
 0x7e0   : > { %v1862_v16 = vmul.f32 1.442695, %v1854_v38 }
 0x7e1   : > { %3081 = vpow2.f32 %v1864_v10  ;;  %v1850_v53 = vpop.xlane.xlu1 %1849  ;;  %v1841_v55 = vpop.xlane.xlu0 %1840 }
 0x7e2   : > { %3083 = vpow2.f32 %v1862_v16  ;;  %v1857_v63 = vsub.f32 %v3958_v59, %v1841_v55  ;;  %v1860_v36 = vsub.f32 %v3962_v31, %v1850_v53  ;;  %v923_v53 = vsel %vm874_vm3, %v3636_v24, 0.0 }
 0x7e3   : > { %v932_v24 = vsel %vm874_vm3, %v3638_v25, 0.0 }
 0x7e4   : > { %v1868_v32 = vmul.f32 1.442695, %v1857_v63  ;;  %v1874_v15 = vmul.f32 1.442695, %v1860_v36  ;;  %v926_v63 = vsel %vm874_vm3, %v3640_v26, 0.0  ;;  %v935_v36 = vsel %vm874_vm3, %v3666_v0, 0.0 }
 0x7e5   : > { %v1853_v57 = vpop.xlane.xlu1 %1852  ;;  %v1844_v48 = vpop.xlane.xlu0 %1843  ;;  %v944_v26 = vsel %vm874_vm3, %v3668_v1, 0.0 }
 0x7e6   : > { %v1861_v28 = vsub.f32 %v3966_v23, %v1853_v57  ;;  %v1858_v7 = vsub.f32 %v3964_v20, %v1844_v48  ;;  %3085 = vpow2.f32 %v1868_v32  ;;  %v941_v32 = vsel %vm874_vm3, %v3672_v6, 0.0 }
 0x7e8   : > { %v3080_v11 = vpop.eup %3079  ;;  %v1870_v49 = vmul.f32 1.442695, %v1858_v7  ;;  %v1876_v14 = vmul.f32 1.442695, %v1861_v28 }
 0x7e9   : > { %v1847_v17 = vpop.xlane.xlu1 %1846  ;;  %v1915_v18 = vpop.permute.xlu0 %1914  ;;  %v1884_v9 = vsel %vm874_vm3, %v3080_v11, 0.0 }
 0x7ea   : > { %v1859_v59 = vsub.f32 %v3972_v8, %v1847_v17  ;;  %1885 = vadd.xlane.f32.xlu0 %v1884_v9  ;;  %2840 = vmatprep.subr.bf16.mxu1 %v1915_v18  ;;  %3087 = vpow2.f32 %v1870_v49 }
 0x7eb   : > { %v3082_v31 = vpop.eup %3081  ;;  %2841 = vmatpush3.bf16.msra.mxu1 %v1915_v18  ;;  %3089 = vpow2.f32 %v1874_v15 }
 0x7ec   : > { %v3084_v62 = vpop.eup %3083  ;;  %v1872_v23 = vmul.f32 1.442695, %v1859_v59  ;;  %3091 = vpow2.f32 %v1876_v14  ;;  %v1881_v58 = vsel %vm874_vm3, %v3082_v31, 0.0 }
 0x7ed   : > { %v1917_v20 = vpop.permute.xlu1 %1916  ;;  %v1878_v50 = vsel %vm874_vm3, %v3084_v62, 0.0  ;;  %v1902_v45 = vpack.c.bf16 %v3082_v31, %v3084_v62 }
 0x7ee   : > { %3093 = vpow2.f32 %v1872_v23  ;;  %1879 = vadd.xlane.f32.xlu0 %v1878_v50  ;;  %2842 = vmatprep.subr.bf16.mxu1 %v1917_v20 }
 0x7ef   : > { %2843 = vmatpush3.bf16.msra.mxu1 %v1917_v20  ;;  %2844 = vmatprep.mubr.msk.bf16.mxu1 %vm874_vm3, %v1902_v45 }
 0x7f0   : > { %v3086_v8 = vpop.eup %3085 }
 0x7f1   : > { %v1903_v3 = vpack.c.bf16 %v3086_v8, %v3080_v11  ;;  %v1887_v42 = vsel %vm874_vm3, %v3086_v8, 0.0 }
 0x7f2   : > { %1578 = vadd.xlane.f32.xlu0 %v1577_v2  ;;  %1888 = vadd.xlane.f32.xlu1 %v1887_v42 }
 0x7f3   : > { %2845 = vmatmul.mubr.msk.bf16.vlgmr.msra.gmra.mrb[36].mxu1 %vm874_vm3, %v1903_v3 }
 0x7f4   : > { %v3088_v37 = vpop.eup %3087 }
 0x7f5   : > { %v3090_v13 = vpop.eup %3089  ;;  %v1890_v61 = vsel %vm874_vm3, %v3088_v37, 0.0 }
 0x7f6   : > { %v3092_v51 = vpop.eup %3091  ;;  %1882 = vadd.xlane.f32.xlu1 %v1881_v58  ;;  %1891 = vadd.xlane.f32.xlu0 %v1890_v61  ;;  %v1896_v38 = vsel %vm874_vm3, %v3090_v13, 0.0 }
 0x7f7   : > { %v1905_v10 = vpack.c.bf16 %v3092_v51, %v3090_v13  ;;  %v1899_v55 = vsel %vm874_vm3, %v3092_v51, 0.0 }
 0x7f8   : > { %v3094_v12 = vpop.eup %3093 }
 0x7f9   : > { %v1904_v39 = vpack.c.bf16 %v3094_v12, %v3088_v37  ;;  %v1893_v16 = vsel %vm874_vm3, %v3094_v12, 0.0 }
 0x7fa   : > { %1581 = vadd.xlane.f32.xlu1 %v1580_v19  ;;  %1897 = vadd.xlane.f32.xlu0 %v1896_v38 }
 0x7fb   : > { %2848 = vmatprep.mubr.msk.bf16.mxu1 %vm874_vm3, %v1904_v39 }
 0x7fc   : > { %2849 = vmatmul.mubr.msk.bf16.gmra.mrb[40].mxu1 %vm874_vm3, %v1905_v10 }
 0x7fe   : > { %1894 = vadd.xlane.f32.xlu1 %v1893_v16  ;;  %924 = vadd.xlane.f32.xlu0 %v923_v53 }
 0x802   : > { %1900 = vadd.xlane.f32.xlu1 %v1899_v55  ;;  %930 = vadd.xlane.f32.xlu0 %v929_v35 }
 0x806   : > { %927 = vadd.xlane.f32.xlu1 %v926_v63  ;;  %936 = vadd.xlane.f32.xlu0 %v935_v36 }
 0x80a   : > { %933 = vadd.xlane.f32.xlu1 %v932_v24  ;;  %942 = vadd.xlane.f32.xlu0 %v941_v32 }
 0x80e   : > { %939 = vadd.xlane.f32.xlu1 %v938_v27 }
 0x812   : > { %945 = vadd.xlane.f32.xlu1 %v944_v26 }
 0x81a   : > { %v1236_v57 = vpop.xlane.xlu0 %1235 }
 0x81b   : > { %3095 = vrcp.f32 %v1236_v57 }
 0x81e   : > { %v1239_v0 = vpop.xlane.xlu1 %1238  ;;  %v1242_v48 = vpop.xlane.xlu0 %1241 }
 0x81f   : > { %3097 = vrcp.f32 %v1239_v0 }
 0x820   : > { %3099 = vrcp.f32 %v1242_v48 }
 0x822   : > { %v1564_v25 = vpop.xlane.xlu1 %1563  ;;  %v1245_v28 = vpop.xlane.xlu0 %1244 }
 0x823   : > { %3101 = vrcp.f32 %v1245_v28 }
 0x824   : > { %3103 = vrcp.f32 %v1564_v25 }
 0x825   : > { %v3096_v11 = vpop.eup %3095 }
 0x826   : > { %v1570_v6 = vpop.xlane.xlu1 %1569  ;;  %v1561_v7 = vpop.xlane.xlu0 %1560  ;;  %v1371_v1 = vmul.f32 %v3096_v11, %v3818_v21 }
 0x827   : > { %3105 = vrcp.f32 %v1561_v7 }
 0x828   : > { %3107 = vrcp.f32 %v1570_v6 }
 0x829   : > { %v3098_v5 = vpop.eup %3097 }
 0x82a   : > { %v1251_v15 = vpop.xlane.xlu1 %1250  ;;  %v1567_v49 = vpop.xlane.xlu0 %1566  ;;  %v1372_v14 = vmul.f32 %v3098_v5, %v3822_v43 }
 0x82b   : > { %v3100_v17 = vpop.eup %3099  ;;  %3109 = vrcp.f32 %v1567_v49 }
 0x82c   : > { %v2971_v18 = vpack.i.bf16 %v1372_v14, %v1371_v1  ;;  %3111 = vrcp.f32 %v1251_v15  ;;  %v1373_v62 = vmul.f32 %v3100_v17, %v3816_v40 }
 0x82d   : > { %v3102_v9 = vpop.eup %3101 }
 0x82e   : > { %v1257_v59 = vpop.xlane.xlu1 %1256  ;;  %2972 = vrot.lane.b32.xlu0 %v2971_v18, %s3258_s21  ;;  %v1248_v31 = vpop.xlane.xlu0 %1247  ;;  %v1374_v23 = vmul.f32 %v3102_v9, %v3820_v41 }
 0x82f   : > { %v3104_v20 = vpop.eup %3103  ;;  %3113 = vrcp.f32 %v1248_v31 }
 0x830   : > { %v2976_v50 = vpack.i.bf16 %v1374_v23, %v1373_v62  ;;  %3115 = vrcp.f32 %v1257_v59  ;;  %v1691_v2 = vmul.f32 %v3104_v20, %v3934_v30 }
 0x831   : > { %v3106_v21 = vpop.eup %3105 }
 0x832   : > { %v1576_v43 = vpop.xlane.xlu1 %1575  ;;  %v1254_v45 = vpop.xlane.xlu0 %1253  ;;  %2977 = vrot.lane.b32.xlu1 %v2976_v50, %s3258_s21  ;;  %v1690_v8 = vmul.f32 %v3106_v21, %v3930_v4 }
 0x833   : > { %v3108_v3 = vpop.eup %3107  ;;  %3117 = vrcp.f32 %v1254_v45 }
 0x834   : > { %3119 = vrcp.f32 %v1576_v43  ;;  %v2981_v42 = vpack.i.bf16 %v1691_v2, %v1690_v8  ;;  %v1693_v13 = vmul.f32 %v3108_v3, %v3932_v60 }
 0x835   : > { %v3110_v40 = vpop.eup %3109 }
 0x836   : > { %v1573_v37 = vpop.xlane.xlu0 %1572  ;;  %2982 = vrot.lane.b32.xlu1 %v2981_v42, %s3259_s23  ;;  %v1692_v41 = vmul.f32 %v3110_v40, %v3928_v56  ;;  %v3112_v58 = vpop.eup %3111 }
 0x837   : > { %3121 = vrcp.f32 %v1573_v37  ;;  %v1376_v30 = vmul.f32 %v3112_v58, %v3831_v52  ;;  %v2143_v52 = vld [vmem:[%s4217_s7] sm:$0xff] }
 0x838   : > { %v2986_v61 = vpack.i.bf16 %v1693_v13, %v1692_v41 }
 0x839   : > { %v3114_v51 = vpop.eup %3113 }
 0x83a   : > { %2987 = vrot.lane.b32.xlu1 %v2986_v61, %s3259_s23  ;;  %v1375_v4 = vmul.f32 %v3114_v51, %v3826_v46  ;;  %v3116_v12 = vpop.eup %3115 }
 0x83b   : > { %v1378_v56 = vmul.f32 %v3116_v12, %v3828_v47  ;;  %v2145_v47 = vld [vmem:[%s4217_s7 + $0x10] sm:$0xff] }
 0x83c   : > { %v2991_v39 = vpack.i.bf16 %v1376_v30, %v1375_v4 }
 0x83d   : > { %v3118_v19 = vpop.eup %3117 }
 0x83e   : > { %v3120_v38 = vpop.eup %3119  ;;  %2992 = vrot.lane.b32.xlu0 %v2991_v39, %s3258_s21  ;;  %v1377_v10 = vmul.f32 %v3118_v19, %v3824_v44  ;;  %v2144_v44 = vld [vmem:[%s4217_s7 + $0x8] sm:$0xff] }
 0x83f   : > { %v4073_v55 = vmul.f32 %v3120_v38, %v3943_v54  ;;  %v2147_v54 = vpack.c.bf16 %v2145_v47, %v2145_v47 }
 0x840   : > { %v2996_v16 = vpack.i.bf16 %v1378_v56, %v1377_v10 }
 0x841   : > { %v3122_v60 = vpop.eup %3121  ;;  %v2168_v11 = vsel %vm459_vm0, %v2147_v54, 0 }
 0x842   : > { %v4070_v53 = vmul.f32 %v3122_v60, %v3938_v34  ;;  %2997 = vrot.lane.b32.xlu1 %v2996_v16, %s3258_s21  ;;  %v2146_v34 = vpack.c.bf16 %v2144_v44, %v2143_v52  ;;  %s3159_s21 = scalar_lea.vmem %s4151_s24, 1024 }
 0x843   : > { %p3160_p2 = scmp.ne.s32.totalorder %s4151_s24, %s3159_s21 }
 0x844   : > { %v3011_v46 = vpack.i.bf16 %v4073_v55, %v4070_v53  ;;  %2852 = vmatprep.subr.bf16.mxu1 %v2146_v34 }
 0x845   : > { %2853 = vmatpush3.bf16.msra.mxu1 %v2146_v34  ;;  %p3161_p4 = pnand %p3160_p2, %p3370_p3 }
 0x846   : > { %2891 = vmatprep.subr.msk.bf16.mxu1 %vm459_vm0, %v2147_v54 }
 0x847   : > { %p3162_p5 = pneg %p3161_p4 }
 0x849   : > { %2855 = vmatpush3.bf16.msra.mxu1 %v2168_v11 }
 0x877   : > { %v1886_v35 = vpop.xlane.xlu0 %1885 }
 0x87b   : > { %v1880_v63 = vpop.xlane.xlu0 %1879 }
 0x87f   : > { %v1889_v36 = vpop.xlane.xlu1 %1888  ;;  %v1579_v24 = vpop.xlane.xlu0 %1578 }
 0x880   : > { %3123 = vrcp.f32 %v1579_v24 }
 0x883   : > { %v1883_v32 = vpop.xlane.xlu1 %1882  ;;  %v1892_v28 = vpop.xlane.xlu0 %1891 }
 0x887   : > { %v1582_v27 = vpop.xlane.xlu1 %1581  ;;  %v1898_v7 = vpop.xlane.xlu0 %1897 }
 0x888   : > { %3125 = vrcp.f32 %v1582_v27 }
 0x889   : > { %3127 = vrcp.f32 %v1886_v35 }
 0x88a   : > { %v3124_v26 = vpop.eup %3123  ;;  %3129 = vrcp.f32 %v1880_v63 }
 0x88b   : > { %v1696_v0 = vmul.f32 %v3124_v26, %v3936_v29  ;;  %3131 = vrcp.f32 %v1889_v36  ;;  %v1895_v6 = vpop.xlane.xlu1 %1894  ;;  %v925_v12 = vpop.xlane.xlu0 %924 }
 0x88c   : > { %3133 = vrcp.f32 %v1883_v32  ;;  %v4239_v32 = vld [vmem:[#allocation10_spill] sm:$0xff] }
 0x88d   : > { %3135 = vrcp.f32 %v1892_v28 }
 0x88e   : > { %3137 = vrcp.f32 %v1898_v7 }
 0x88f   : > { %v1901_v5 = vpop.xlane.xlu1 %1900  ;;  %v931_v19 = vpop.xlane.xlu0 %930 }
 0x890   : > { %3139 = vrcp.f32 %v1901_v5 }
 0x891   : > { %3141 = vrcp.f32 %v1895_v6 }
 0x892   : > { %v3126_v57 = vpop.eup %3125  ;;  %3143 = vrcp.f32 %v925_v12 }
 0x893   : > { %v1697_v48 = vmul.f32 %v3126_v57, %v3940_v33  ;;  %v3128_v15 = vpop.eup %3127  ;;  %v928_v51 = vpop.xlane.xlu1 %927  ;;  %3145 = vrcp.f32 %v931_v19  ;;  %v4244_v19 = vld [vmem:[#allocation13_spill] sm:$0xff] }
 0x894   : > { %v3130_v1 = vpop.eup %3129  ;;  %v937_v10 = vpop.xlane.xlu0 %936  ;;  %3147 = vrcp.f32 %v928_v51 }
 0x895   : > { %v3016_v25 = vpack.i.bf16 %v1697_v48, %v1696_v0  ;;  %v3132_v33 = vpop.eup %3131  ;;  %v4240_v0 = vld [vmem:[#allocation9_spill] sm:$0xff] }
 0x896   : > { %v3134_v17 = vpop.eup %3133 }
 0x897   : > { %v3136_v50 = vpop.eup %3135  ;;  %v934_v4 = vpop.xlane.xlu1 %933 }
 0x898   : > { %v3138_v43 = vpop.eup %3137  ;;  %3149 = vrcp.f32 %v934_v4  ;;  %v943_v60 = vpop.xlane.xlu0 %942  ;;  %v4243_v4 = vld [vmem:[#allocation14_spill] sm:$0xff] }
 0x899   : > { %3151 = vrcp.f32 %v937_v10  ;;  %v4245_v10 = vld [vmem:[#allocation11_spill] sm:$0xff] }
 0x89a   : > { %v3140_v8 = vpop.eup %3139  ;;  %3153 = vrcp.f32 %v943_v60 }
 0x89b   : > { %v3142_v3 = vpop.eup %3141  ;;  %v940_v30 = vpop.xlane.xlu1 %939 }
 0x89c   : > { %v3144_v53 = vpop.eup %3143  ;;  %3155 = vrcp.f32 %v940_v30 }
 0x89d   : > { %v1036_v24 = vmul.f32 %v3144_v53, %v3690_v22 }
 0x89f   : > { %v946_v39 = vpop.xlane.xlu1 %945 }
 0x8a0   : > { %v2973_v55 = vpop.permute.xlu0 %2972  ;;  %3157 = vrcp.f32 %v946_v39 }
 0x8a1   : > { %v2975_v47 = vunpack.i.h.bf16 %v2973_v55  ;;  %v2974_v34 = vunpack.i.l.bf16 %v2973_v55 }
 0x8a3   : > { %v2113_v5 = vsel %vm778_vm2, %v1036_v24, %v2974_v34 }
 0x8a4   : > { %v2978_v38 = vpop.permute.xlu1 %2977 }
 0x8a5   : > { %v2980_v35 = vunpack.i.h.bf16 %v2978_v38  ;;  %v2979_v63 = vunpack.i.l.bf16 %v2978_v38 }
 0x8a8   : > { %v2983_v56 = vpop.permute.xlu1 %2982 }
 0x8a9   : > { %v2985_v6 = vunpack.i.h.bf16 %v2983_v56  ;;  %v2984_v7 = vunpack.i.l.bf16 %v2983_v56 }
 0x8ac   : > { %v2988_v16 = vpop.permute.xlu1 %2987 }
 0x8ad   : > { %v2990_v26 = vunpack.i.h.bf16 %v2988_v16  ;;  %v2989_v57 = vunpack.i.l.bf16 %v2988_v16 }
 0x8b0   : > { %v2993_v36 = vpop.permute.xlu0 %2992 }
 0x8b4   : > { %v2998_v54 = vpop.permute.xlu1 %2997 }
 0x8c6   : > { %v2846_v49 = vpop.f32.mrb[36].mxu1 }
 0x8c7   : > { %v1970_v29 = vpop.f32.mrb[37].mxu1  ;;  %v2011_v18 = vmul.f32 %v3128_v15, %v2846_v49 }
 0x8c8   : > { %v2847_v14 = vpop.f32.mrb[38].mxu1  ;;  %v2009_v31 = vmul.f32 %v3130_v1, %v1970_v29 }
 0x8c9   : > { %v2012_v9 = vmul.f32 %v3132_v33, %v2847_v14  ;;  %v1973_v59 = vpop.f32.mrb[39].mxu1 }
 0x8ca   : > { %v2010_v62 = vmul.f32 %v3134_v17, %v1973_v59 }
 0x8cb   : > { %v3001_v23 = vpack.i.bf16 %v2012_v9, %v2011_v18 }
 0x8cc   : > { %v3006_v20 = vpack.i.bf16 %v2010_v62, %v2009_v31  ;;  %v2122_v62 = vsel %vm2121_vm4, %v2113_v5, %v2984_v7 }
 0x8cd   : > { %3002 = vrot.lane.b32.xlu1 %v3001_v23, %s3260_s28 }
 0x8ce   : > { %3007 = vrot.lane.b32.xlu0 %v3006_v20, %s3260_s28 }
 0x8cf   : > { %v2850_v21 = vpop.f32.mrb[40].mxu1 }
 0x8d0   : > { %v1986_v45 = vpop.f32.mrb[41].mxu1  ;;  %v2015_v42 = vmul.f32 %v3138_v43, %v2850_v21 }
 0x8d1   : > { %v2851_v2 = vpop.f32.mrb[42].mxu1  ;;  %3017 = vrot.lane.b32.xlu1 %v3016_v25, %s3259_s23  ;;  %v2013_v41 = vmul.f32 %v3136_v50, %v1986_v45  ;;  %v4241_v25 = vld [vmem:[#allocation8_spill] sm:$0xff] }
 0x8d2   : > { %v2016_v40 = vmul.f32 %v3140_v8, %v2851_v2  ;;  %v1989_v37 = vpop.f32.mrb[43].mxu1  ;;  %3012 = vrot.lane.b32.xlu0 %v3011_v46, %s3259_s23  ;;  %v3146_v46 = vpop.eup %3145  ;;  %s3261_s23 = smov [#allocation2]  }
 0x8d3   : > { %v2014_v13 = vmul.f32 %v3142_v3, %v1989_v37  ;;  %v3148_v52 = vpop.eup %3147  ;;  %v1038_v28 = vmul.f32 %v3146_v46, %v4241_v25  ;;  %s3163_s3 = sshll.u32 %s3261_s23, 4  ;;  %s3164_s3 = int_to_ptr.vmem [resolvable:$false] %s3163_s3 }
 0x8d4   : > { %v3026_v58 = vpack.i.bf16 %v2016_v40, %v2015_v42  ;;  %v3150_v44 = vpop.eup %3149  ;;  %v1037_v27 = vmul.f32 %v3148_v52, %v4239_v32  ;;  %v2995_v42 = vunpack.i.h.bf16 %v2993_v36  ;;  %v2994_v40 = vunpack.i.l.bf16 %v2993_v36  ;;  %s3165_s25 = scalar_lea.vmem %s3164_s3, 2048  ;;  %p3166_p6 = scmp.lt.s32.totalorder %s4151_s24, %s3164_s3 }
 0x8d5   : > { %v3021_v61 = vpack.i.bf16 %v2014_v13, %v2013_v41  ;;  %v1039_v48 = vmul.f32 %v3150_v44, %v4240_v0  ;;  %v2115_v22 = vsel %vm778_vm2, %v1038_v28, %v2979_v63  ;;  %v3152_v14 = vpop.eup %3151  ;;  %v3000_v13 = vunpack.i.h.bf16 %v2998_v54  ;;  %p3167_p7 = scmp.lt.s32.totalorder %s3165_s25, %s3159_s21 }
 0x8d6   : > { %3027 = vrot.lane.b32.xlu1 %v3026_v58, %s3260_s28  ;;  %v2114_v11 = vsel %vm778_vm2, %v1037_v27, %v2975_v47  ;;  %v2124_v18 = vsel %vm2121_vm4, %v2115_v22, %v2989_v57  ;;  %v3154_v31 = vpop.eup %3153  ;;  %v2999_v58 = vunpack.i.l.bf16 %v2998_v54 }
 0x8d7   : > { %3022 = vrot.lane.b32.xlu0 %v3021_v61, %s3260_s28  ;;  %v2116_v49 = vsel %vm778_vm2, %v1039_v48, %v2980_v35  ;;  %v2123_v23 = vsel %vm2121_vm4, %v2114_v11, %v2985_v6  ;;  %v3156_v21 = vpop.eup %3155  ;;  %v4242_v61 = vld [vmem:[#allocation12_spill] sm:$0xff]  ;;  %v1042_v56 = vmul.f32 %v3154_v31, %v4245_v10  ;;  %p3168_p9 = por %p3167_p7, %p3166_p6 }
 0x8d8   : > { %v2125_v17 = vsel %vm2121_vm4, %v2116_v49, %v2990_v26  ;;  %v3158_v3 = vpop.eup %3157  ;;  %v1040_v51 = vmul.f32 %v3152_v14, %v4242_v61  ;;  %v1041_v30 = vmul.f32 %v3156_v21, %v4243_v4  ;;  %v2445_v6 = vld [vmem:[%s4218_s8] ss:$0 sm:$0xff] }
 0x8d9   : > { %v1043_v38 = vmul.f32 %v3158_v3, %v4244_v19  ;;  %v2119_v44 = vsel %vm778_vm2, %v1042_v56, %v2999_v58  ;;  %p3169_p10 = pnand %p3168_p9, %p3162_p5 }
 0x8da   : > { %v2118_v53 = vsel %vm778_vm2, %v1041_v30, %v2995_v42  ;;  %v2117_v55 = vsel %vm778_vm2, %v1040_v51, %v2994_v40 }
 0x8db   : > { %v2120_v52 = vsel %vm778_vm2, %v1043_v38, %v3000_v13 }
 0x93f   : > { %v3003_v15 = vpop.permute.xlu1 %3002 }
 0x940   : > { %v3005_v1 = vunpack.i.h.bf16 %v3003_v15  ;;  %v3004_v29 = vunpack.i.l.bf16 %v3003_v15  ;;  %v3008_v33 = vpop.permute.xlu0 %3007 }
 0x941   : > { %v3010_v9 = vunpack.i.h.bf16 %v3008_v33  ;;  %v3009_v59 = vunpack.i.l.bf16 %v3008_v33 }
 0x942   : > { %v2134_v20 = vsel %vm2130_vm5, %v2125_v17, %v3005_v1  ;;  %v2133_v50 = vsel %vm2130_vm5, %v2124_v18, %v3004_v29 }
 0x943   : > { %v2140_v43 = vpack.c.bf16 %v2134_v20, %v2133_v50  ;;  %v2131_v45 = vsel %vm2130_vm5, %v2122_v62, %v3009_v59  ;;  %v2132_v8 = vsel %vm2130_vm5, %v2123_v23, %v3010_v9  ;;  %v3018_v2 = vpop.permute.xlu1 %3017 }
 0x944   : > { %v2139_v37 = vpack.c.bf16 %v2132_v8, %v2131_v45  ;;  %v3013_v41 = vpop.permute.xlu0 %3012  ;;  %v3020_v12 = vunpack.i.h.bf16 %v3018_v2  ;;  %v3019_v39 = vunpack.i.l.bf16 %v3018_v2 }
 0x945   : > { %v3015_v60 = vunpack.i.h.bf16 %v3013_v41  ;;  %v3014_v16 = vunpack.i.l.bf16 %v3013_v41 }
 0x946   : > { %2856 = vmatprep.mubr.msk.bf16.mxu1 %vm446_vm1, %v2139_v37  ;;  %v2129_v35 = vsel %vm2121_vm4, %v2120_v52, %v3020_v12  ;;  %v2128_v63 = vsel %vm2121_vm4, %v2119_v44, %v3019_v39 }
 0x947   : > { %2857 = vmatmul.mubr.msk.bf16.vlgmr.msra.gmra.mrb[44].mxu1 %vm446_vm1, %v2140_v43  ;;  %v2126_v32 = vsel %vm2121_vm4, %v2117_v55, %v3014_v16  ;;  %v2127_v27 = vsel %vm2121_vm4, %v2118_v53, %v3015_v60 }
 0x948   : > { %v3028_v46 = vpop.permute.xlu1 %3027 }
 0x949   : > { %v3030_v47 = vunpack.i.h.bf16 %v3028_v46  ;;  %v3029_v34 = vunpack.i.l.bf16 %v3028_v46  ;;  %v3023_v54 = vpop.permute.xlu0 %3022 }
 0x94a   : > { %v3025_v36 = vunpack.i.h.bf16 %v3023_v54  ;;  %v3024_v24 = vunpack.i.l.bf16 %v3023_v54 }
 0x94b   : > { %v2138_v26 = vsel %vm2130_vm5, %v2129_v35, %v3030_v47  ;;  %v2137_v57 = vsel %vm2130_vm5, %v2128_v63, %v3029_v34 }
 0x94c   : > { %v2142_v0 = vpack.c.bf16 %v2138_v26, %v2137_v57  ;;  %v2135_v48 = vsel %vm2130_vm5, %v2126_v32, %v3024_v24  ;;  %v2136_v25 = vsel %vm2130_vm5, %v2127_v27, %v3025_v36 }
 0x94d   : > { %v2141_v28 = vpack.c.bf16 %v2136_v25, %v2135_v48 }
 0x94f   : > { %2860 = vmatprep.mubr.msk.bf16.mxu1 %vm446_vm1, %v2141_v28 }
 0x950   : > { %2861 = vmatmul.mubr.msk.bf16.gmra.mrb[48].mxu1 %vm446_vm1, %v2142_v0 }
 0xa1a   : > { %v2858_v7 = vpop.f32.mrb[44].mxu1 }
 0xa1b   : > { %v2213_v11 = vadd.f32 %v2858_v7, %v2445_v6  ;;  %v2204_v5 = vpop.f32.mrb[45].mxu1 }
 0xa1c   : > { %v2205_v15 = vadd.f32 %v2445_v6, %v2204_v5  ;;  %v2859_v49 = vpop.f32.mrb[46].mxu1 }
 0xa1d   : > { %2237 = vst.msk [vmem:[%s381_s22 + $0x10] sm:$0xff] %vm446_vm1, %v2213_v11  ;;  %v2216_v22 = vadd.f32 %v2859_v49, %v2445_v6  ;;  %v2207_v1 = vpop.f32.mrb[47].mxu1 }
 0xa1e   : > { %2235 = vst.msk [vmem:[%s381_s22] sm:$0xff] %vm446_vm1, %v2205_v15  ;;  %v2208_v29 = vadd.f32 %v2445_v6, %v2207_v1 }
 0xa1f   : > { %2238 = vst.msk [vmem:[%s381_s22 + $0x18] sm:$0xff] %vm446_vm1, %v2216_v22 }
 0xa20   : > { %2236 = vst.msk [vmem:[%s381_s22 + $0x8] sm:$0xff] %vm446_vm1, %v2208_v29 }
 0xa23   : > { %v2862_v33 = vpop.f32.mrb[48].mxu1 }
 0xa24   : > { %v2229_v14 = vadd.f32 %v2862_v33, %v2445_v6  ;;  %v2220_v17 = vpop.f32.mrb[49].mxu1 }
 0xa25   : > { %v2221_v18 = vadd.f32 %v2445_v6, %v2220_v17  ;;  %v2863_v9 = vpop.f32.mrb[50].mxu1 }
 0xa26   : > { %2241 = vst.msk [vmem:[%s381_s22 + $0x30] sm:$0xff] %vm446_vm1, %v2229_v14  ;;  %v2232_v59 = vadd.f32 %v2863_v9, %v2445_v6  ;;  %v2223_v31 = vpop.f32.mrb[51].mxu1 }
 0xa27   : > { %2239 = vst.msk [vmem:[%s381_s22 + $0x20] sm:$0xff] %vm446_vm1, %v2221_v18  ;;  %v2224_v62 = vadd.f32 %v2445_v6, %v2223_v31 }
 0xa28   : > { %2242 = vst.msk [vmem:[%s381_s22 + $0x38] sm:$0xff] %vm446_vm1, %v2232_v59 }
 0xa29   : > { %2240 = vst.msk [vmem:[%s381_s22 + $0x28] sm:$0xff] %vm446_vm1, %v2224_v62 }
 0xa2a   : > { %3172 = shalt.err (!%p3169_p10)
}
 0xa2b   : > { %s3173_s30 = scalar_lea.hbm %s4149_s12, 1024  ;;  %s3177_s29 = scalar_lea.hbm %s4220_s10, 4096 }
 0xa2c   : > { %p3174_p11 = scmp.ne.s32.totalorder %s4149_s12, %s3173_s30  ;;  %p3178_p0 = scmp.lt.u32.totalorder %s4149_s12, %s4220_s10 }
 0xa2d   : > { %p3179_p1 = scmp.lt.u32.totalorder %s3177_s29, %s3173_s30  ;;  %p3181_p4 = scmp.lt.u32.totalorder %s3173_s30, %s4149_s12 }
 0xa2e   : > { %p3175_p12 = pnand %p3174_p11, %p3370_p3 }
 0xa2f   : > { %p3180_p2 = por %p3179_p1, %p3178_p0 }
 0xa30   : > { %p3176_p13 = pneg %p3175_p12 }
 0xa31   : > { %p3182_p5 = por %p3181_p4, %p3180_p2 }
 0xa33   : > { %p3183_p6 = pnand %p3182_p5, %p3176_p13 }
 0xa35   : > { %3186 = shalt.err (!%p3183_p6)
}
 0xa36   : > { %s3262_s21 = smov 128   ;;  %s3263_s23 = smov 8  }
 0xa37   : > { %2892 = dma.vmem_to_hbm [thread:$0]  (%p3370_p3), %s4151_s24, 1024, %s4149_s12, %s4158_s17, %s3262_s21, %s3262_s21, %s3263_s23  }
 0xa38 PF: > { %p2898_p7 = scmp.ge.s32.totalorder %s3253_s20, 2  ;;  %s2274_s3 = sand.u32 1, %s3225_s13  }
 0xa39   : > { %s2275_s25 = scalar_lea.sflag [#allocation3], %s2274_s3 }
 0xa3a   : > { %p2895_p9 = pnand %p2898_p7, %p3379_p8 }
 0xa3c   : > { %3220 = dma.done.wait (!%p2895_p9), %s2275_s25, 1024  }
 0xa3d   : > { %3222 = vsyncadd (!%p2895_p9), %s2275_s25, 4294966272  ;;  %s23_s20 = sadd.s32 1, %s3253_s20   ;;  %s4247_s17 = sld [smem:[#allocation5_spill]] }
 0xa3e   : > { %p20_p10 = scmp.ge.s32.totalorder %s23_s20, 6   ;;  %s4248_s26 = sld [smem:[#allocation6_spill]] }
 0xa3f   : > { %s4249_s19 = sld [smem:[#allocation7_spill]]  ;;  %s4250_s13 = smov %s3229_s14 }
 0xa40   : > { %s4251_s14 = smov %s3233_s15  ;;  %s4252_s15 = smov %s3388_s11 }
 0xa41   : > { %s4253_s16 = smov %s3245_s18  ;;  %22 = sbr.rel (!%p20_p10) target bundleno = 7 (0x7), region = 103 }
 0xa44   : > { %s4254_s18 = smov %s4248_s26 }
 0xa48   :  { %2280 = vsyncpa [#allocation3], 1 }
 0xa49   :  { %2282 = vsyncpa [#allocation3 + $0x1], 1 }

</bundles_post_ra>
